<compile_context>
chip_gen: v6e
topology: v6e:2x2x1
jax: 0.10.0
libtpu: 0.0.40
codegen_flags: <defaults>
</compile_context>

<pallas_src>
import functools

import jax
import jax.numpy as jnp
import numpy as np
from jax.experimental import pallas as pl
from jax.experimental.pallas import tpu as pltpu


def _bilstm_risk_kernel(
    x_ref,       # (T, BB, D)   f32
    len_ref,     # (BB, 1)      i32
    wih_ref,     # (D, 8H)      bf16   [fwd 4H | bwd 4H], PyTorch gate order i,f,g,o
    b_ref,       # (1, 8H)      f32    (b_ih + b_hh), fwd | bwd
    whh_f_ref,   # (H, 4H)      bf16
    whh_b_ref,   # (H, 4H)      bf16
    wc_f_ref,    # (H, 128)     f32    classifier, forward half (class-padded)
    wc_b_ref,    # (H, 128)     f32
    bc_ref,      # (1, 128)     f32
    w1_f_ref,    # (H, 128)     f32    risk hidden layer (64 real cols)
    w1_b_ref,    # (H, 128)     f32
    b1_ref,      # (1, 128)     f32
    w2_ref,      # (128, 128)   f32    risk output layer (1 real col)
    b2_ref,      # (1, 128)     f32
    logits_ref,  # (BB, 128)    f32 out
    risk_ref,    # (BB, 128)    f32 out
    gx_f_ref,    # (T, BB, 4H)  f32 scratch (precomputed x-gates, forward dir)
    gx_b_ref,    # (T, BB, 4H)  f32 scratch (precomputed x-gates, backward dir)
    *,
    unroll,
):
    T, BB, D = x_ref.shape
    H = whh_f_ref.shape[0]
    G = 4 * H

    lengths = len_ref[...]                                   # (BB, 1) int32

    # ---- hoisted input projection: one large MXU matmul for both directions ----
    x2d = x_ref[...].reshape(T * BB, D).astype(jnp.bfloat16)
    gx = jnp.dot(x2d, wih_ref[...], preferred_element_type=jnp.float32) + b_ref[...]
    gx_f_ref[...] = gx[:, :G].reshape(T, BB, G)
    gx_b_ref[...] = gx[:, G:].reshape(T, BB, G)

    whh_f = whh_f_ref[...]
    whh_b = whh_b_ref[...]

    def half_step(gx_t, h, c, whh):
        gates = gx_t + jnp.dot(h.astype(jnp.bfloat16), whh,
                               preferred_element_type=jnp.float32)
        # Full-width EUP passes over all 4H gate lanes, then cheap VPU slices.
        sig = jax.nn.sigmoid(gates)
        tnh = jnp.tanh(gates)
        i = sig[:, 0 * H:1 * H]
        f = sig[:, 1 * H:2 * H]
        g = tnh[:, 2 * H:3 * H]
        o = sig[:, 3 * H:4 * H]
        c_new = f * c + i * g
        h_new = o * jnp.tanh(c_new)
        return h_new, c_new

    zeros = jnp.zeros((BB, H), jnp.float32)

    # ---- fused fwd/bwd recurrence: two independent chains per iteration ----
    def body(k, carry):
        h_f, c_f, h_b, c_b = carry
        # forward chain at t = k (freeze state once t >= length)
        hf_new, cf_new = half_step(gx_f_ref[k], h_f, c_f, whh_f)
        vf = k < lengths
        h_f = jnp.where(vf, hf_new, h_f)
        c_f = jnp.where(vf, cf_new, c_f)
        # backward chain at t = T-1-k (only update while t < length)
        tb = T - 1 - k
        hb_new, cb_new = half_step(gx_b_ref[tb], h_b, c_b, whh_b)
        vb = tb < lengths
        h_b = jnp.where(vb, hb_new, h_b)
        c_b = jnp.where(vb, cb_new, c_b)
        return h_f, c_f, h_b, c_b

    h_f, _, h_b, _ = jax.lax.fori_loop(
        0, T, body, (zeros, zeros, zeros, zeros), unroll=unroll)

    # ---- heads: no concat; split-weight matmuls, lane-dense (BB, 128) outputs ----
    logits_ref[...] = (
        jnp.dot(h_f, wc_f_ref[...], preferred_element_type=jnp.float32)
        + jnp.dot(h_b, wc_b_ref[...], preferred_element_type=jnp.float32)
        + bc_ref[...]
    )
    z = jnp.maximum(
        jnp.dot(h_f, w1_f_ref[...], preferred_element_type=jnp.float32)
        + jnp.dot(h_b, w1_b_ref[...], preferred_element_type=jnp.float32)
        + b1_ref[...],
        0.0,
    )
    risk_ref[...] = jax.nn.sigmoid(
        jnp.dot(z, w2_ref[...], preferred_element_type=jnp.float32)
        + b2_ref[...]
    )


def _pack_params(params, num_classes):
    """Pack/pad params into kernel layout: bf16 LSTM matmul weights, split +
    lane-padded head weights (padding columns are zero => padded outputs are
    exactly zero / sigmoid(0) and get sliced off in the wrapper)."""
    H = params["whh_f"].shape[0]
    CPAD = 128   # padded class/risk lane width
    RPAD = 128   # padded risk-hidden width (real width 64)
    assert num_classes <= CPAD

    wih_cat = jnp.concatenate([params["wih_f"], params["wih_b"]], axis=1
                              ).astype(jnp.bfloat16)                     # (D, 8H)
    b_cat = jnp.concatenate([params["b_f"], params["b_b"]], axis=1
                            ).astype(jnp.float32)                        # (1, 8H)
    whh_f = params["whh_f"].astype(jnp.bfloat16)                         # (H, 4H)
    whh_b = params["whh_b"].astype(jnp.bfloat16)                         # (H, 4H)

    def pad_cols(w, width):
        w = w.astype(jnp.float32)
        return jnp.pad(w, ((0, 0), (0, width - w.shape[1])))

    wc_f = pad_cols(params["wc"][:H], CPAD)
    wc_b = pad_cols(params["wc"][H:], CPAD)
    bc = pad_cols(params["bc"], CPAD)
    w1_f = pad_cols(params["w1"][:H], RPAD)
    w1_b = pad_cols(params["w1"][H:], RPAD)
    b1 = pad_cols(params["b1"], RPAD)
    w2 = jnp.pad(params["w2"].astype(jnp.float32),
                 ((0, RPAD - params["w2"].shape[0]),
                  (0, CPAD - params["w2"].shape[1])))
    b2 = pad_cols(params["b2"], CPAD)

    return (wih_cat, b_cat, whh_f, whh_b,
            wc_f, wc_b, bc, w1_f, w1_b, b1, w2, b2)


def bilstm_with_risk(x, lengths, params, *, block_b=8):
    """x: (B, T, D) float32, lengths: (B,) int32.  Returns (logits, risk)."""
    B, T, D = x.shape
    H = params["whh_f"].shape[0]
    C = params["wc"].shape[1]
    G = 4 * H
    CPAD = 128
    assert block_b % 8 == 0

    # pad batch to a multiple of the batch tile (padded rows discarded below)
    Bp = ((B + block_b - 1) // block_b) * block_b
    x = x.astype(jnp.float32)
    lengths = lengths.astype(jnp.int32)
    if Bp != B:
        x = jnp.pad(x, ((0, Bp - B), (0, 0), (0, 0)))
        lengths = jnp.pad(lengths, (0, Bp - B), constant_values=1)

    x_tbd = jnp.transpose(x, (1, 0, 2))          # (T, Bp, D) time-major
    len_2d = lengths.reshape(Bp, 1)

    packed = _pack_params(params, C)

    grid = (Bp // block_b,)
    rep = lambda a: pl.BlockSpec(a.shape, lambda i: (0, 0))   # replicated weights

    in_specs = [
        pl.BlockSpec((T, block_b, D), lambda i: (0, i, 0)),   # x tile (batch-blocked)
        pl.BlockSpec((block_b, 1), lambda i: (i, 0)),         # lengths tile
    ] + [rep(a) for a in packed]

    out_spec = pl.BlockSpec((block_b, CPAD), lambda i: (i, 0))

    kernel = functools.partial(
        _bilstm_risk_kernel, unroll=(T if T <= 32 else 8))

    logits_pad, risk_pad = pl.pallas_call(
        kernel,
        grid=grid,
        in_specs=in_specs,
        out_specs=(out_spec, out_spec),
        out_shape=(
            jax.ShapeDtypeStruct((Bp, CPAD), jnp.float32),
            jax.ShapeDtypeStruct((Bp, CPAD), jnp.float32),
        ),
        scratch_shapes=[
            pltpu.VMEM((T, block_b, G), jnp.float32),   # precomputed x-gates, fwd
            pltpu.VMEM((T, block_b, G), jnp.float32),   # precomputed x-gates, bwd
        ],
        compiler_params=pltpu.CompilerParams(
            dimension_semantics=("parallel",),          # both TCs on v7x
            vmem_limit_bytes=32 * 1024 * 1024,
        ),
    )(x_tbd, len_2d, *packed)

    return logits_pad[:B, :C], risk_pad[:B, :1]


def make_params(key, input_size, hidden_size, num_classes):
    """Deterministic synthetic parameters (PyTorch-style uniform init)."""
    H = hidden_size
    ks = jax.random.split(key, 16)
    s = 1.0 / np.sqrt(H)

    def u(k, shape, scale):
        return jax.random.uniform(k, shape, jnp.float32, -scale, scale)

    return {
        # LSTM weights, stored pre-transposed: (in, 4H) with PyTorch gate order
        "wih_f": u(ks[0], (input_size, 4 * H), s),
        "whh_f": u(ks[1], (H, 4 * H), s),
        "b_f":   u(ks[2], (1, 4 * H), s) + u(ks[3], (1, 4 * H), s),  # b_ih + b_hh
        "wih_b": u(ks[4], (input_size, 4 * H), s),
        "whh_b": u(ks[5], (H, 4 * H), s),
        "b_b":   u(ks[6], (1, 4 * H), s) + u(ks[7], (1, 4 * H), s),
        # classifier: Linear(2H -> C)
        "wc": u(ks[8], (2 * H, num_classes), 1.0 / np.sqrt(2 * H)),
        "bc": u(ks[9], (1, num_classes), 1.0 / np.sqrt(2 * H)),
        # risk head: Linear(2H -> 64), Linear(64 -> 1)
        "w1": u(ks[10], (2 * H, 64), 1.0 / np.sqrt(2 * H)),
        "b1": u(ks[11], (1, 64), 1.0 / np.sqrt(2 * H)),
        "w2": u(ks[12], (64, 1), 1.0 / np.sqrt(64)),
        "b2": u(ks[13], (1, 1), 1.0 / np.sqrt(64)),
    }


def reference_forward(x, lengths, p, matmul_dtype=jnp.float32):
    """Pure-JAX reference mirroring packed-BiLSTM + heads semantics.
    matmul_dtype=bfloat16 mirrors the kernel's MXU operand precision."""
    B, T, D = x.shape
    H = p["whh_f"].shape[0]

    def mm(a, b):
        return jnp.dot(a.astype(matmul_dtype), b.astype(matmul_dtype),
                       preferred_element_type=jnp.float32)

    def cell(x_t, h, c, wih, whh, b):
        g = mm(x_t, wih) + mm(h, whh) + b
        i = jax.nn.sigmoid(g[:, 0 * H:1 * H])
        f = jax.nn.sigmoid(g[:, 1 * H:2 * H])
        gg = jnp.tanh(g[:, 2 * H:3 * H])
        o = jax.nn.sigmoid(g[:, 3 * H:4 * H])
        c_new = f * c + i * gg
        return o * jnp.tanh(c_new), c_new

    h = c = jnp.zeros((B, H), jnp.float32)
    for t in range(T):
        h_n, c_n = cell(x[:, t], h, c, p["wih_f"], p["whh_f"], p["b_f"])
        m = (t < lengths)[:, None]
        h, c = jnp.where(m, h_n, h), jnp.where(m, c_n, c)
    h_fwd = h

    h = c = jnp.zeros((B, H), jnp.float32)
    for t in range(T - 1, -1, -1):
        h_n, c_n = cell(x[:, t], h, c, p["wih_b"], p["whh_b"], p["b_b"])
        m = (t < lengths)[:, None]
        h, c = jnp.where(m, h_n, h), jnp.where(m, c_n, c)
    h_bwd = h

    hidden = jnp.concatenate([h_fwd, h_bwd], axis=1)
    logits = hidden @ p["wc"] + p["bc"]
    risk = jax.nn.sigmoid(
        jnp.maximum(hidden @ p["w1"] + p["b1"], 0.0) @ p["w2"] + p["b2"])
    return logits, risk


if __name__ == "__main__":
    # Small shapes consistent with the module's forward pass (batch padded to
    # full sublanes, two batch tiles so the parallel grid axis is exercised).
    B, T = 16, 16
    INPUT_SIZE, HIDDEN_SIZE, NUM_CLASSES = 64, 32, 3

    key = jax.random.PRNGKey(0)
    k_x, k_p = jax.random.split(key)

    x = jax.random.normal(k_x, (B, T, INPUT_SIZE), jnp.float32)
    lengths = jnp.array([16, 11, 7, 16, 3, 9, 14, 1, 5, 16, 12, 8, 2, 15, 6, 10],
                        dtype=jnp.int32)                    # variable lengths
    params = make_params(k_p, INPUT_SIZE, HIDDEN_SIZE, NUM_CLASSES)

    fwd = jax.jit(functools.partial(bilstm_with_risk, block_b=8))
    logits, risk = fwd(x, lengths, params)
    jax.block_until_ready((logits, risk))

    # Tight check vs a reference that mirrors the kernel's bf16 MXU operands.
    ref_l_bf, ref_r_bf = reference_forward(x, lengths, params,
                                           matmul_dtype=jnp.bfloat16)
    np.testing.assert_allclose(np.asarray(logits), np.asarray(ref_l_bf),
                               rtol=5e-3, atol=5e-3)
    np.testing.assert_allclose(np.asarray(risk), np.asarray(ref_r_bf),
                               rtol=5e-3, atol=5e-3)

    # Semantic check vs the full-f32 reference (looser tol: bf16 MXU operands).
    ref_l, ref_r = reference_forward(x, lengths, params,
                                     matmul_dtype=jnp.float32)
    np.testing.assert_allclose(np.asarray(logits), np.asarray(ref_l),
                               rtol=8e-2, atol=8e-2)
    np.testing.assert_allclose(np.asarray(risk), np.asarray(ref_r),
                               rtol=8e-2, atol=8e-2)

    assert logits.shape == (B, NUM_CLASSES) and risk.shape == (B, 1)
    print("KERNEL_OK")
</pallas_src>

<mosaic_0001>
module attributes {stable_mosaic.version = 11 : i64} {
  func.func @_bilstm_risk_kernel(%arg0: i32, %arg1: memref<16x8x64xf32, #tpu.memory_space<vmem>>, %arg2: memref<8x1xi32, #tpu.memory_space<vmem>>, %arg3: memref<64x256xbf16, #tpu.memory_space<vmem>>, %arg4: memref<1x256xf32, #tpu.memory_space<vmem>>, %arg5: memref<32x128xbf16, #tpu.memory_space<vmem>>, %arg6: memref<32x128xbf16, #tpu.memory_space<vmem>>, %arg7: memref<32x128xf32, #tpu.memory_space<vmem>>, %arg8: memref<32x128xf32, #tpu.memory_space<vmem>>, %arg9: memref<1x128xf32, #tpu.memory_space<vmem>>, %arg10: memref<32x128xf32, #tpu.memory_space<vmem>>, %arg11: memref<32x128xf32, #tpu.memory_space<vmem>>, %arg12: memref<1x128xf32, #tpu.memory_space<vmem>>, %arg13: memref<128x128xf32, #tpu.memory_space<vmem>>, %arg14: memref<1x128xf32, #tpu.memory_space<vmem>>, %arg15: memref<8x128xf32, #tpu.memory_space<vmem>>, %arg16: memref<8x128xf32, #tpu.memory_space<vmem>>, %arg17: memref<16x8x128xf32, #tpu.memory_space<vmem>>, %arg18: memref<16x8x128xf32, #tpu.memory_space<vmem>>) attributes {dimension_semantics = [#tpu.dimension_semantics<parallel>], iteration_bounds = array<i64: 2>, scalar_prefetch = 0 : i64, scratch_operands = 2 : i64, tpu.core_type = #tpu.core_type<tc>, window_params = [{transform_indices = @transform_0, window_bounds = array<i64: 16, 8, 64>}, {transform_indices = @transform_1, window_bounds = array<i64: 8, 1>}, {pipeline_mode = #tpu.pipeline_mode<synchronous>, transform_indices = @transform_2, window_bounds = array<i64: 64, 256>}, {pipeline_mode = #tpu.pipeline_mode<synchronous>, transform_indices = @transform_3, window_bounds = array<i64: 1, 256>}, {pipeline_mode = #tpu.pipeline_mode<synchronous>, transform_indices = @transform_4, window_bounds = array<i64: 32, 128>}, {pipeline_mode = #tpu.pipeline_mode<synchronous>, transform_indices = @transform_5, window_bounds = array<i64: 32, 128>}, {pipeline_mode = #tpu.pipeline_mode<synchronous>, transform_indices = @transform_6, window_bounds = array<i64: 32, 128>}, {pipeline_mode = #tpu.pipeline_mode<synchronous>, transform_indices = @transform_7, window_bounds = array<i64: 32, 128>}, {pipeline_mode = #tpu.pipeline_mode<synchronous>, transform_indices = @transform_8, window_bounds = array<i64: 1, 128>}, {pipeline_mode = #tpu.pipeline_mode<synchronous>, transform_indices = @transform_9, window_bounds = array<i64: 32, 128>}, {pipeline_mode = #tpu.pipeline_mode<synchronous>, transform_indices = @transform_10, window_bounds = array<i64: 32, 128>}, {pipeline_mode = #tpu.pipeline_mode<synchronous>, transform_indices = @transform_11, window_bounds = array<i64: 1, 128>}, {pipeline_mode = #tpu.pipeline_mode<synchronous>, transform_indices = @transform_12, window_bounds = array<i64: 128, 128>}, {pipeline_mode = #tpu.pipeline_mode<synchronous>, transform_indices = @transform_13, window_bounds = array<i64: 1, 128>}, {transform_indices = @transform_14, window_bounds = array<i64: 8, 128>}, {transform_indices = @transform_15, window_bounds = array<i64: 8, 128>}]} {
    %c0 = arith.constant 0 : index
    %c0_0 = arith.constant 0 : index
    %0 = vector.load %arg2[%c0, %c0_0] : memref<8x1xi32, #tpu.memory_space<vmem>>, vector<8x1xi32>
    %c0_1 = arith.constant 0 : index
    %c0_2 = arith.constant 0 : index
    %c0_3 = arith.constant 0 : index
    %1 = vector.load %arg1[%c0_1, %c0_2, %c0_3] : memref<16x8x64xf32, #tpu.memory_space<vmem>>, vector<16x8x64xf32>
    %2 = vector.shape_cast %1 : vector<16x8x64xf32> to vector<128x64xf32>
    %3 = arith.truncf %2 : vector<128x64xf32> to vector<128x64xbf16>
    %c0_4 = arith.constant 0 : index
    %c0_5 = arith.constant 0 : index
    %4 = vector.load %arg3[%c0_4, %c0_5] : memref<64x256xbf16, #tpu.memory_space<vmem>>, vector<64x256xbf16>
    %cst = arith.constant dense<0.000000e+00> : vector<128x256xf32>
    %5 = tpu.matmul %3, %4, %cst {dimension_numbers = #tpu.dot_dimension_numbers<[1], [0], [0], [1], [0, 0, 1, 1], [], []>} : vector<128x64xbf16>, vector<64x256xbf16>, vector<128x256xf32> -> vector<128x256xf32>
    %c0_6 = arith.constant 0 : index
    %c0_7 = arith.constant 0 : index
    %6 = vector.load %arg4[%c0_6, %c0_7] : memref<1x256xf32, #tpu.memory_space<vmem>>, vector<1x256xf32>
    %7 = vector.broadcast %6 : vector<1x256xf32> to vector<128x256xf32>
    %8 = arith.addf %5, %7 : vector<128x256xf32>
    %9 = vector.extract_strided_slice %8 {offsets = [0, 0], sizes = [128, 128], strides = [1, 1]} : vector<128x256xf32> to vector<128x128xf32>
    %10 = vector.shape_cast %9 : vector<128x128xf32> to vector<16x8x128xf32>
    %c0_8 = arith.constant 0 : index
    %c0_9 = arith.constant 0 : index
    %c0_10 = arith.constant 0 : index
    %11 = vector.load %arg17[%c0_8, %c0_9, %c0_10] : memref<16x8x128xf32, #tpu.memory_space<vmem>>, vector<16x8x128xf32>
    tpu.vector_store %arg17[%c0_8, %c0_9, %c0_10], %10 {strides = array<i32>} : memref<16x8x128xf32, #tpu.memory_space<vmem>>, vector<16x8x128xf32>,
    %12 = vector.extract_strided_slice %8 {offsets = [0, 128], sizes = [128, 128], strides = [1, 1]} : vector<128x256xf32> to vector<128x128xf32>
    %13 = vector.shape_cast %12 : vector<128x128xf32> to vector<16x8x128xf32>
    %c0_11 = arith.constant 0 : index
    %c0_12 = arith.constant 0 : index
    %c0_13 = arith.constant 0 : index
    %14 = vector.load %arg18[%c0_11, %c0_12, %c0_13] : memref<16x8x128xf32, #tpu.memory_space<vmem>>, vector<16x8x128xf32>
    tpu.vector_store %arg18[%c0_11, %c0_12, %c0_13], %13 {strides = array<i32>} : memref<16x8x128xf32, #tpu.memory_space<vmem>>, vector<16x8x128xf32>,
    %c0_14 = arith.constant 0 : index
    %c0_15 = arith.constant 0 : index
    %15 = vector.load %arg5[%c0_14, %c0_15] : memref<32x128xbf16, #tpu.memory_space<vmem>>, vector<32x128xbf16>
    %c0_16 = arith.constant 0 : index
    %c0_17 = arith.constant 0 : index
    %16 = vector.load %arg6[%c0_16, %c0_17] : memref<32x128xbf16, #tpu.memory_space<vmem>>, vector<32x128xbf16>
    %cst_18 = arith.constant 0.000000e+00 : f32
    %17 = vector.broadcast %cst_18 : f32 to vector<8x32xf32>
    %c0_i32 = arith.constant 0 : i32
    %18 = arith.index_cast %c0_i32 : i32 to index
    %c0_19 = arith.constant 0 : index
    %c0_20 = arith.constant 0 : index
    %19 = vector.load %arg17[%18, %c0_19, %c0_20] : memref<16x8x128xf32, #tpu.memory_space<vmem>>, vector<1x8x128xf32>
    %20 = vector.shape_cast %19 : vector<1x8x128xf32> to vector<8x128xf32>
    %21 = arith.truncf %17 : vector<8x32xf32> to vector<8x32xbf16>
    %cst_21 = arith.constant dense<0.000000e+00> : vector<8x128xf32>
    %22 = tpu.matmul %21, %15, %cst_21 {dimension_numbers = #tpu.dot_dimension_numbers<[1], [0], [0], [1], [0, 0, 1, 1], [], []>} : vector<8x32xbf16>, vector<32x128xbf16>, vector<8x128xf32> -> vector<8x128xf32>
    %23 = arith.addf %20, %22 : vector<8x128xf32>
    %24 = arith.negf %23 : vector<8x128xf32>
    %25 = math.exp %24 : vector<8x128xf32>
    %cst_22 = arith.constant 1.000000e+00 : f32
    %26 = vector.broadcast %cst_22 : f32 to vector<8x128xf32>
    %27 = arith.addf %26, %25 : vector<8x128xf32>
    %28 = arith.divf %26, %27 : vector<8x128xf32>
    %29 = math.tanh %23 : vector<8x128xf32>
    %30 = vector.extract_strided_slice %28 {offsets = [0, 0], sizes = [8, 32], strides = [1, 1]} : vector<8x128xf32> to vector<8x32xf32>
    %31 = vector.extract_strided_slice %28 {offsets = [0, 32], sizes = [8, 32], strides = [1, 1]} : vector<8x128xf32> to vector<8x32xf32>
    %32 = vector.extract_strided_slice %29 {offsets = [0, 64], sizes = [8, 32], strides = [1, 1]} : vector<8x128xf32> to vector<8x32xf32>
    %33 = vector.extract_strided_slice %28 {offsets = [0, 96], sizes = [8, 32], strides = [1, 1]} : vector<8x128xf32> to vector<8x32xf32>
    %34 = arith.mulf %31, %17 : vector<8x32xf32>
    %35 = arith.mulf %30, %32 : vector<8x32xf32>
    %36 = arith.addf %34, %35 : vector<8x32xf32>
    %37 = math.tanh %36 : vector<8x32xf32>
    %38 = arith.mulf %33, %37 : vector<8x32xf32>
    %39 = vector.broadcast %c0_i32 : i32 to vector<8x1xi32>
    %40 = arith.cmpi slt, %39, %0 : vector<8x1xi32>
    %41 = vector.shape_cast %40 : vector<8x1xi1> to vector<8x1xi1>
    %42 = vector.broadcast %41 : vector<8x1xi1> to vector<8x32xi1>
    %43 = arith.select %42, %38, %17 : vector<8x32xi1>, vector<8x32xf32>
    %44 = vector.shape_cast %40 : vector<8x1xi1> to vector<8x1xi1>
    %45 = vector.broadcast %44 : vector<8x1xi1> to vector<8x32xi1>
    %46 = arith.select %45, %36, %17 : vector<8x32xi1>, vector<8x32xf32>
    %c15_i32 = arith.constant 15 : i32
    %47 = arith.subi %c15_i32, %c0_i32 : i32
    %48 = arith.index_cast %47 : i32 to index
    %c0_23 = arith.constant 0 : index
    %c0_24 = arith.constant 0 : index
    %49 = vector.load %arg18[%48, %c0_23, %c0_24] : memref<16x8x128xf32, #tpu.memory_space<vmem>>, vector<1x8x128xf32>
    %50 = vector.shape_cast %49 : vector<1x8x128xf32> to vector<8x128xf32>
    %51 = arith.truncf %17 : vector<8x32xf32> to vector<8x32xbf16>
    %cst_25 = arith.constant dense<0.000000e+00> : vector<8x128xf32>
    %52 = tpu.matmul %51, %16, %cst_25 {dimension_numbers = #tpu.dot_dimension_numbers<[1], [0], [0], [1], [0, 0, 1, 1], [], []>} : vector<8x32xbf16>, vector<32x128xbf16>, vector<8x128xf32> -> vector<8x128xf32>
    %53 = arith.addf %50, %52 : vector<8x128xf32>
    %54 = arith.negf %53 : vector<8x128xf32>
    %55 = math.exp %54 : vector<8x128xf32>
    %cst_26 = arith.constant 1.000000e+00 : f32
    %56 = vector.broadcast %cst_26 : f32 to vector<8x128xf32>
    %57 = arith.addf %56, %55 : vector<8x128xf32>
    %58 = arith.divf %56, %57 : vector<8x128xf32>
    %59 = math.tanh %53 : vector<8x128xf32>
    %60 = vector.extract_strided_slice %58 {offsets = [0, 0], sizes = [8, 32], strides = [1, 1]} : vector<8x128xf32> to vector<8x32xf32>
    %61 = vector.extract_strided_slice %58 {offsets = [0, 32], sizes = [8, 32], strides = [1, 1]} : vector<8x128xf32> to vector<8x32xf32>
    %62 = vector.extract_strided_slice %59 {offsets = [0, 64], sizes = [8, 32], strides = [1, 1]} : vector<8x128xf32> to vector<8x32xf32>
    %63 = vector.extract_strided_slice %58 {offsets = [0, 96], sizes = [8, 32], strides = [1, 1]} : vector<8x128xf32> to vector<8x32xf32>
    %64 = arith.mulf %61, %17 : vector<8x32xf32>
    %65 = arith.mulf %60, %62 : vector<8x32xf32>
    %66 = arith.addf %64, %65 : vector<8x32xf32>
    %67 = math.tanh %66 : vector<8x32xf32>
    %68 = arith.mulf %63, %67 : vector<8x32xf32>
    %69 = vector.broadcast %47 : i32 to vector<8x1xi32>
    %70 = arith.cmpi slt, %69, %0 : vector<8x1xi32>
    %71 = vector.shape_cast %70 : vector<8x1xi1> to vector<8x1xi1>
    %72 = vector.broadcast %71 : vector<8x1xi1> to vector<8x32xi1>
    %73 = arith.select %72, %68, %17 : vector<8x32xi1>, vector<8x32xf32>
    %74 = vector.shape_cast %70 : vector<8x1xi1> to vector<8x1xi1>
    %75 = vector.broadcast %74 : vector<8x1xi1> to vector<8x32xi1>
    %76 = arith.select %75, %66, %17 : vector<8x32xi1>, vector<8x32xf32>
    %c1_i32 = arith.constant 1 : i32
    %77 = arith.index_cast %c1_i32 : i32 to index
    %c0_27 = arith.constant 0 : index
    %c0_28 = arith.constant 0 : index
    %78 = vector.load %arg17[%77, %c0_27, %c0_28] : memref<16x8x128xf32, #tpu.memory_space<vmem>>, vector<1x8x128xf32>
    %79 = vector.shape_cast %78 : vector<1x8x128xf32> to vector<8x128xf32>
    %80 = arith.truncf %43 : vector<8x32xf32> to vector<8x32xbf16>
    %cst_29 = arith.constant dense<0.000000e+00> : vector<8x128xf32>
    %81 = tpu.matmul %80, %15, %cst_29 {dimension_numbers = #tpu.dot_dimension_numbers<[1], [0], [0], [1], [0, 0, 1, 1], [], []>} : vector<8x32xbf16>, vector<32x128xbf16>, vector<8x128xf32> -> vector<8x128xf32>
    %82 = arith.addf %79, %81 : vector<8x128xf32>
    %83 = arith.negf %82 : vector<8x128xf32>
    %84 = math.exp %83 : vector<8x128xf32>
    %cst_30 = arith.constant 1.000000e+00 : f32
    %85 = vector.broadcast %cst_30 : f32 to vector<8x128xf32>
    %86 = arith.addf %85, %84 : vector<8x128xf32>
    %87 = arith.divf %85, %86 : vector<8x128xf32>
    %88 = math.tanh %82 : vector<8x128xf32>
    %89 = vector.extract_strided_slice %87 {offsets = [0, 0], sizes = [8, 32], strides = [1, 1]} : vector<8x128xf32> to vector<8x32xf32>
    %90 = vector.extract_strided_slice %87 {offsets = [0, 32], sizes = [8, 32], strides = [1, 1]} : vector<8x128xf32> to vector<8x32xf32>
    %91 = vector.extract_strided_slice %88 {offsets = [0, 64], sizes = [8, 32], strides = [1, 1]} : vector<8x128xf32> to vector<8x32xf32>
    %92 = vector.extract_strided_slice %87 {offsets = [0, 96], sizes = [8, 32], strides = [1, 1]} : vector<8x128xf32> to vector<8x32xf32>
    %93 = arith.mulf %90, %46 : vector<8x32xf32>
    %94 = arith.mulf %89, %91 : vector<8x32xf32>
    %95 = arith.addf %93, %94 : vector<8x32xf32>
    %96 = math.tanh %95 : vector<8x32xf32>
    %97 = arith.mulf %92, %96 : vector<8x32xf32>
    %98 = vector.broadcast %c1_i32 : i32 to vector<8x1xi32>
    %99 = arith.cmpi slt, %98, %0 : vector<8x1xi32>
    %100 = vector.shape_cast %99 : vector<8x1xi1> to vector<8x1xi1>
    %101 = vector.broadcast %100 : vector<8x1xi1> to vector<8x32xi1>
    %102 = arith.select %101, %97, %43 : vector<8x32xi1>, vector<8x32xf32>
    %103 = vector.shape_cast %99 : vector<8x1xi1> to vector<8x1xi1>
    %104 = vector.broadcast %103 : vector<8x1xi1> to vector<8x32xi1>
    %105 = arith.select %104, %95, %46 : vector<8x32xi1>, vector<8x32xf32>
    %c15_i32_31 = arith.constant 15 : i32
    %106 = arith.subi %c15_i32_31, %c1_i32 : i32
    %107 = arith.index_cast %106 : i32 to index
    %c0_32 = arith.constant 0 : index
    %c0_33 = arith.constant 0 : index
    %108 = vector.load %arg18[%107, %c0_32, %c0_33] : memref<16x8x128xf32, #tpu.memory_space<vmem>>, vector<1x8x128xf32>
    %109 = vector.shape_cast %108 : vector<1x8x128xf32> to vector<8x128xf32>
    %110 = arith.truncf %73 : vector<8x32xf32> to vector<8x32xbf16>
    %cst_34 = arith.constant dense<0.000000e+00> : vector<8x128xf32>
    %111 = tpu.matmul %110, %16, %cst_34 {dimension_numbers = #tpu.dot_dimension_numbers<[1], [0], [0], [1], [0, 0, 1, 1], [], []>} : vector<8x32xbf16>, vector<32x128xbf16>, vector<8x128xf32> -> vector<8x128xf32>
    %112 = arith.addf %109, %111 : vector<8x128xf32>
    %113 = arith.negf %112 : vector<8x128xf32>
    %114 = math.exp %113 : vector<8x128xf32>
    %cst_35 = arith.constant 1.000000e+00 : f32
    %115 = vector.broadcast %cst_35 : f32 to vector<8x128xf32>
    %116 = arith.addf %115, %114 : vector<8x128xf32>
    %117 = arith.divf %115, %116 : vector<8x128xf32>
    %118 = math.tanh %112 : vector<8x128xf32>
    %119 = vector.extract_strided_slice %117 {offsets = [0, 0], sizes = [8, 32], strides = [1, 1]} : vector<8x128xf32> to vector<8x32xf32>
    %120 = vector.extract_strided_slice %117 {offsets = [0, 32], sizes = [8, 32], strides = [1, 1]} : vector<8x128xf32> to vector<8x32xf32>
    %121 = vector.extract_strided_slice %118 {offsets = [0, 64], sizes = [8, 32], strides = [1, 1]} : vector<8x128xf32> to vector<8x32xf32>
    %122 = vector.extract_strided_slice %117 {offsets = [0, 96], sizes = [8, 32], strides = [1, 1]} : vector<8x128xf32> to vector<8x32xf32>
    %123 = arith.mulf %120, %76 : vector<8x32xf32>
    %124 = arith.mulf %119, %121 : vector<8x32xf32>
    %125 = arith.addf %123, %124 : vector<8x32xf32>
    %126 = math.tanh %125 : vector<8x32xf32>
    %127 = arith.mulf %122, %126 : vector<8x32xf32>
    %128 = vector.broadcast %106 : i32 to vector<8x1xi32>
    %129 = arith.cmpi slt, %128, %0 : vector<8x1xi32>
    %130 = vector.shape_cast %129 : vector<8x1xi1> to vector<8x1xi1>
    %131 = vector.broadcast %130 : vector<8x1xi1> to vector<8x32xi1>
    %132 = arith.select %131, %127, %73 : vector<8x32xi1>, vector<8x32xf32>
    %133 = vector.shape_cast %129 : vector<8x1xi1> to vector<8x1xi1>
    %134 = vector.broadcast %133 : vector<8x1xi1> to vector<8x32xi1>
    %135 = arith.select %134, %125, %76 : vector<8x32xi1>, vector<8x32xf32>
    %c2_i32 = arith.constant 2 : i32
    %136 = arith.index_cast %c2_i32 : i32 to index
    %c0_36 = arith.constant 0 : index
    %c0_37 = arith.constant 0 : index
    %137 = vector.load %arg17[%136, %c0_36, %c0_37] : memref<16x8x128xf32, #tpu.memory_space<vmem>>, vector<1x8x128xf32>
    %138 = vector.shape_cast %137 : vector<1x8x128xf32> to vector<8x128xf32>
    %139 = arith.truncf %102 : vector<8x32xf32> to vector<8x32xbf16>
    %cst_38 = arith.constant dense<0.000000e+00> : vector<8x128xf32>
    %140 = tpu.matmul %139, %15, %cst_38 {dimension_numbers = #tpu.dot_dimension_numbers<[1], [0], [0], [1], [0, 0, 1, 1], [], []>} : vector<8x32xbf16>, vector<32x128xbf16>, vector<8x128xf32> -> vector<8x128xf32>
    %141 = arith.addf %138, %140 : vector<8x128xf32>
    %142 = arith.negf %141 : vector<8x128xf32>
    %143 = math.exp %142 : vector<8x128xf32>
    %cst_39 = arith.constant 1.000000e+00 : f32
    %144 = vector.broadcast %cst_39 : f32 to vector<8x128xf32>
    %145 = arith.addf %144, %143 : vector<8x128xf32>
    %146 = arith.divf %144, %145 : vector<8x128xf32>
    %147 = math.tanh %141 : vector<8x128xf32>
    %148 = vector.extract_strided_slice %146 {offsets = [0, 0], sizes = [8, 32], strides = [1, 1]} : vector<8x128xf32> to vector<8x32xf32>
    %149 = vector.extract_strided_slice %146 {offsets = [0, 32], sizes = [8, 32], strides = [1, 1]} : vector<8x128xf32> to vector<8x32xf32>
    %150 = vector.extract_strided_slice %147 {offsets = [0, 64], sizes = [8, 32], strides = [1, 1]} : vector<8x128xf32> to vector<8x32xf32>
    %151 = vector.extract_strided_slice %146 {offsets = [0, 96], sizes = [8, 32], strides = [1, 1]} : vector<8x128xf32> to vector<8x32xf32>
    %152 = arith.mulf %149, %105 : vector<8x32xf32>
    %153 = arith.mulf %148, %150 : vector<8x32xf32>
    %154 = arith.addf %152, %153 : vector<8x32xf32>
    %155 = math.tanh %154 : vector<8x32xf32>
    %156 = arith.mulf %151, %155 : vector<8x32xf32>
    %157 = vector.broadcast %c2_i32 : i32 to vector<8x1xi32>
    %158 = arith.cmpi slt, %157, %0 : vector<8x1xi32>
    %159 = vector.shape_cast %158 : vector<8x1xi1> to vector<8x1xi1>
    %160 = vector.broadcast %159 : vector<8x1xi1> to vector<8x32xi1>
    %161 = arith.select %160, %156, %102 : vector<8x32xi1>, vector<8x32xf32>
    %162 = vector.shape_cast %158 : vector<8x1xi1> to vector<8x1xi1>
    %163 = vector.broadcast %162 : vector<8x1xi1> to vector<8x32xi1>
    %164 = arith.select %163, %154, %105 : vector<8x32xi1>, vector<8x32xf32>
    %c15_i32_40 = arith.constant 15 : i32
    %165 = arith.subi %c15_i32_40, %c2_i32 : i32
    %166 = arith.index_cast %165 : i32 to index
    %c0_41 = arith.constant 0 : index
    %c0_42 = arith.constant 0 : index
    %167 = vector.load %arg18[%166, %c0_41, %c0_42] : memref<16x8x128xf32, #tpu.memory_space<vmem>>, vector<1x8x128xf32>
    %168 = vector.shape_cast %167 : vector<1x8x128xf32> to vector<8x128xf32>
    %169 = arith.truncf %132 : vector<8x32xf32> to vector<8x32xbf16>
    %cst_43 = arith.constant dense<0.000000e+00> : vector<8x128xf32>
    %170 = tpu.matmul %169, %16, %cst_43 {dimension_numbers = #tpu.dot_dimension_numbers<[1], [0], [0], [1], [0, 0, 1, 1], [], []>} : vector<8x32xbf16>, vector<32x128xbf16>, vector<8x128xf32> -> vector<8x128xf32>
    %171 = arith.addf %168, %170 : vector<8x128xf32>
    %172 = arith.negf %171 : vector<8x128xf32>
    %173 = math.exp %172 : vector<8x128xf32>
    %cst_44 = arith.constant 1.000000e+00 : f32
    %174 = vector.broadcast %cst_44 : f32 to vector<8x128xf32>
    %175 = arith.addf %174, %173 : vector<8x128xf32>
    %176 = arith.divf %174, %175 : vector<8x128xf32>
    %177 = math.tanh %171 : vector<8x128xf32>
    %178 = vector.extract_strided_slice %176 {offsets = [0, 0], sizes = [8, 32], strides = [1, 1]} : vector<8x128xf32> to vector<8x32xf32>
    %179 = vector.extract_strided_slice %176 {offsets = [0, 32], sizes = [8, 32], strides = [1, 1]} : vector<8x128xf32> to vector<8x32xf32>
    %180 = vector.extract_strided_slice %177 {offsets = [0, 64], sizes = [8, 32], strides = [1, 1]} : vector<8x128xf32> to vector<8x32xf32>
    %181 = vector.extract_strided_slice %176 {offsets = [0, 96], sizes = [8, 32], strides = [1, 1]} : vector<8x128xf32> to vector<8x32xf32>
    %182 = arith.mulf %179, %135 : vector<8x32xf32>
    %183 = arith.mulf %178, %180 : vector<8x32xf32>
    %184 = arith.addf %182, %183 : vector<8x32xf32>
    %185 = math.tanh %184 : vector<8x32xf32>
    %186 = arith.mulf %181, %185 : vector<8x32xf32>
    %187 = vector.broadcast %165 : i32 to vector<8x1xi32>
    %188 = arith.cmpi slt, %187, %0 : vector<8x1xi32>
    %189 = vector.shape_cast %188 : vector<8x1xi1> to vector<8x1xi1>
    %190 = vector.broadcast %189 : vector<8x1xi1> to vector<8x32xi1>
    %191 = arith.select %190, %186, %132 : vector<8x32xi1>, vector<8x32xf32>
    %192 = vector.shape_cast %188 : vector<8x1xi1> to vector<8x1xi1>
    %193 = vector.broadcast %192 : vector<8x1xi1> to vector<8x32xi1>
    %194 = arith.select %193, %184, %135 : vector<8x32xi1>, vector<8x32xf32>
    %c3_i32 = arith.constant 3 : i32
    %195 = arith.index_cast %c3_i32 : i32 to index
    %c0_45 = arith.constant 0 : index
    %c0_46 = arith.constant 0 : index
    %196 = vector.load %arg17[%195, %c0_45, %c0_46] : memref<16x8x128xf32, #tpu.memory_space<vmem>>, vector<1x8x128xf32>
    %197 = vector.shape_cast %196 : vector<1x8x128xf32> to vector<8x128xf32>
    %198 = arith.truncf %161 : vector<8x32xf32> to vector<8x32xbf16>
    %cst_47 = arith.constant dense<0.000000e+00> : vector<8x128xf32>
    %199 = tpu.matmul %198, %15, %cst_47 {dimension_numbers = #tpu.dot_dimension_numbers<[1], [0], [0], [1], [0, 0, 1, 1], [], []>} : vector<8x32xbf16>, vector<32x128xbf16>, vector<8x128xf32> -> vector<8x128xf32>
    %200 = arith.addf %197, %199 : vector<8x128xf32>
    %201 = arith.negf %200 : vector<8x128xf32>
    %202 = math.exp %201 : vector<8x128xf32>
    %cst_48 = arith.constant 1.000000e+00 : f32
    %203 = vector.broadcast %cst_48 : f32 to vector<8x128xf32>
    %204 = arith.addf %203, %202 : vector<8x128xf32>
    %205 = arith.divf %203, %204 : vector<8x128xf32>
    %206 = math.tanh %200 : vector<8x128xf32>
    %207 = vector.extract_strided_slice %205 {offsets = [0, 0], sizes = [8, 32], strides = [1, 1]} : vector<8x128xf32> to vector<8x32xf32>
    %208 = vector.extract_strided_slice %205 {offsets = [0, 32], sizes = [8, 32], strides = [1, 1]} : vector<8x128xf32> to vector<8x32xf32>
    %209 = vector.extract_strided_slice %206 {offsets = [0, 64], sizes = [8, 32], strides = [1, 1]} : vector<8x128xf32> to vector<8x32xf32>
    %210 = vector.extract_strided_slice %205 {offsets = [0, 96], sizes = [8, 32], strides = [1, 1]} : vector<8x128xf32> to vector<8x32xf32>
    %211 = arith.mulf %208, %164 : vector<8x32xf32>
    %212 = arith.mulf %207, %209 : vector<8x32xf32>
    %213 = arith.addf %211, %212 : vector<8x32xf32>
    %214 = math.tanh %213 : vector<8x32xf32>
    %215 = arith.mulf %210, %214 : vector<8x32xf32>
    %216 = vector.broadcast %c3_i32 : i32 to vector<8x1xi32>
    %217 = arith.cmpi slt, %216, %0 : vector<8x1xi32>
    %218 = vector.shape_cast %217 : vector<8x1xi1> to vector<8x1xi1>
    %219 = vector.broadcast %218 : vector<8x1xi1> to vector<8x32xi1>
    %220 = arith.select %219, %215, %161 : vector<8x32xi1>, vector<8x32xf32>
    %221 = vector.shape_cast %217 : vector<8x1xi1> to vector<8x1xi1>
    %222 = vector.broadcast %221 : vector<8x1xi1> to vector<8x32xi1>
    %223 = arith.select %222, %213, %164 : vector<8x32xi1>, vector<8x32xf32>
    %c15_i32_49 = arith.constant 15 : i32
    %224 = arith.subi %c15_i32_49, %c3_i32 : i32
    %225 = arith.index_cast %224 : i32 to index
    %c0_50 = arith.constant 0 : index
    %c0_51 = arith.constant 0 : index
    %226 = vector.load %arg18[%225, %c0_50, %c0_51] : memref<16x8x128xf32, #tpu.memory_space<vmem>>, vector<1x8x128xf32>
    %227 = vector.shape_cast %226 : vector<1x8x128xf32> to vector<8x128xf32>
    %228 = arith.truncf %191 : vector<8x32xf32> to vector<8x32xbf16>
    %cst_52 = arith.constant dense<0.000000e+00> : vector<8x128xf32>
    %229 = tpu.matmul %228, %16, %cst_52 {dimension_numbers = #tpu.dot_dimension_numbers<[1], [0], [0], [1], [0, 0, 1, 1], [], []>} : vector<8x32xbf16>, vector<32x128xbf16>, vector<8x128xf32> -> vector<8x128xf32>
    %230 = arith.addf %227, %229 : vector<8x128xf32>
    %231 = arith.negf %230 : vector<8x128xf32>
    %232 = math.exp %231 : vector<8x128xf32>
    %cst_53 = arith.constant 1.000000e+00 : f32
    %233 = vector.broadcast %cst_53 : f32 to vector<8x128xf32>
    %234 = arith.addf %233, %232 : vector<8x128xf32>
    %235 = arith.divf %233, %234 : vector<8x128xf32>
    %236 = math.tanh %230 : vector<8x128xf32>
    %237 = vector.extract_strided_slice %235 {offsets = [0, 0], sizes = [8, 32], strides = [1, 1]} : vector<8x128xf32> to vector<8x32xf32>
    %238 = vector.extract_strided_slice %235 {offsets = [0, 32], sizes = [8, 32], strides = [1, 1]} : vector<8x128xf32> to vector<8x32xf32>
    %239 = vector.extract_strided_slice %236 {offsets = [0, 64], sizes = [8, 32], strides = [1, 1]} : vector<8x128xf32> to vector<8x32xf32>
    %240 = vector.extract_strided_slice %235 {offsets = [0, 96], sizes = [8, 32], strides = [1, 1]} : vector<8x128xf32> to vector<8x32xf32>
    %241 = arith.mulf %238, %194 : vector<8x32xf32>
    %242 = arith.mulf %237, %239 : vector<8x32xf32>
    %243 = arith.addf %241, %242 : vector<8x32xf32>
    %244 = math.tanh %243 : vector<8x32xf32>
    %245 = arith.mulf %240, %244 : vector<8x32xf32>
    %246 = vector.broadcast %224 : i32 to vector<8x1xi32>
    %247 = arith.cmpi slt, %246, %0 : vector<8x1xi32>
    %248 = vector.shape_cast %247 : vector<8x1xi1> to vector<8x1xi1>
    %249 = vector.broadcast %248 : vector<8x1xi1> to vector<8x32xi1>
    %250 = arith.select %249, %245, %191 : vector<8x32xi1>, vector<8x32xf32>
    %251 = vector.shape_cast %247 : vector<8x1xi1> to vector<8x1xi1>
    %252 = vector.broadcast %251 : vector<8x1xi1> to vector<8x32xi1>
    %253 = arith.select %252, %243, %194 : vector<8x32xi1>, vector<8x32xf32>
    %c4_i32 = arith.constant 4 : i32
    %254 = arith.index_cast %c4_i32 : i32 to index
    %c0_54 = arith.constant 0 : index
    %c0_55 = arith.constant 0 : index
    %255 = vector.load %arg17[%254, %c0_54, %c0_55] : memref<16x8x128xf32, #tpu.memory_space<vmem>>, vector<1x8x128xf32>
    %256 = vector.shape_cast %255 : vector<1x8x128xf32> to vector<8x128xf32>
    %257 = arith.truncf %220 : vector<8x32xf32> to vector<8x32xbf16>
    %cst_56 = arith.constant dense<0.000000e+00> : vector<8x128xf32>
    %258 = tpu.matmul %257, %15, %cst_56 {dimension_numbers = #tpu.dot_dimension_numbers<[1], [0], [0], [1], [0, 0, 1, 1], [], []>} : vector<8x32xbf16>, vector<32x128xbf16>, vector<8x128xf32> -> vector<8x128xf32>
    %259 = arith.addf %256, %258 : vector<8x128xf32>
    %260 = arith.negf %259 : vector<8x128xf32>
    %261 = math.exp %260 : vector<8x128xf32>
    %cst_57 = arith.constant 1.000000e+00 : f32
    %262 = vector.broadcast %cst_57 : f32 to vector<8x128xf32>
    %263 = arith.addf %262, %261 : vector<8x128xf32>
    %264 = arith.divf %262, %263 : vector<8x128xf32>
    %265 = math.tanh %259 : vector<8x128xf32>
    %266 = vector.extract_strided_slice %264 {offsets = [0, 0], sizes = [8, 32], strides = [1, 1]} : vector<8x128xf32> to vector<8x32xf32>
    %267 = vector.extract_strided_slice %264 {offsets = [0, 32], sizes = [8, 32], strides = [1, 1]} : vector<8x128xf32> to vector<8x32xf32>
    %268 = vector.extract_strided_slice %265 {offsets = [0, 64], sizes = [8, 32], strides = [1, 1]} : vector<8x128xf32> to vector<8x32xf32>
    %269 = vector.extract_strided_slice %264 {offsets = [0, 96], sizes = [8, 32], strides = [1, 1]} : vector<8x128xf32> to vector<8x32xf32>
    %270 = arith.mulf %267, %223 : vector<8x32xf32>
    %271 = arith.mulf %266, %268 : vector<8x32xf32>
    %272 = arith.addf %270, %271 : vector<8x32xf32>
    %273 = math.tanh %272 : vector<8x32xf32>
    %274 = arith.mulf %269, %273 : vector<8x32xf32>
    %275 = vector.broadcast %c4_i32 : i32 to vector<8x1xi32>
    %276 = arith.cmpi slt, %275, %0 : vector<8x1xi32>
    %277 = vector.shape_cast %276 : vector<8x1xi1> to vector<8x1xi1>
    %278 = vector.broadcast %277 : vector<8x1xi1> to vector<8x32xi1>
    %279 = arith.select %278, %274, %220 : vector<8x32xi1>, vector<8x32xf32>
    %280 = vector.shape_cast %276 : vector<8x1xi1> to vector<8x1xi1>
    %281 = vector.broadcast %280 : vector<8x1xi1> to vector<8x32xi1>
    %282 = arith.select %281, %272, %223 : vector<8x32xi1>, vector<8x32xf32>
    %c15_i32_58 = arith.constant 15 : i32
    %283 = arith.subi %c15_i32_58, %c4_i32 : i32
    %284 = arith.index_cast %283 : i32 to index
    %c0_59 = arith.constant 0 : index
    %c0_60 = arith.constant 0 : index
    %285 = vector.load %arg18[%284, %c0_59, %c0_60] : memref<16x8x128xf32, #tpu.memory_space<vmem>>, vector<1x8x128xf32>
    %286 = vector.shape_cast %285 : vector<1x8x128xf32> to vector<8x128xf32>
    %287 = arith.truncf %250 : vector<8x32xf32> to vector<8x32xbf16>
    %cst_61 = arith.constant dense<0.000000e+00> : vector<8x128xf32>
    %288 = tpu.matmul %287, %16, %cst_61 {dimension_numbers = #tpu.dot_dimension_numbers<[1], [0], [0], [1], [0, 0, 1, 1], [], []>} : vector<8x32xbf16>, vector<32x128xbf16>, vector<8x128xf32> -> vector<8x128xf32>
    %289 = arith.addf %286, %288 : vector<8x128xf32>
    %290 = arith.negf %289 : vector<8x128xf32>
    %291 = math.exp %290 : vector<8x128xf32>
    %cst_62 = arith.constant 1.000000e+00 : f32
    %292 = vector.broadcast %cst_62 : f32 to vector<8x128xf32>
    %293 = arith.addf %292, %291 : vector<8x128xf32>
    %294 = arith.divf %292, %293 : vector<8x128xf32>
    %295 = math.tanh %289 : vector<8x128xf32>
    %296 = vector.extract_strided_slice %294 {offsets = [0, 0], sizes = [8, 32], strides = [1, 1]} : vector<8x128xf32> to vector<8x32xf32>
    %297 = vector.extract_strided_slice %294 {offsets = [0, 32], sizes = [8, 32], strides = [1, 1]} : vector<8x128xf32> to vector<8x32xf32>
    %298 = vector.extract_strided_slice %295 {offsets = [0, 64], sizes = [8, 32], strides = [1, 1]} : vector<8x128xf32> to vector<8x32xf32>
    %299 = vector.extract_strided_slice %294 {offsets = [0, 96], sizes = [8, 32], strides = [1, 1]} : vector<8x128xf32> to vector<8x32xf32>
    %300 = arith.mulf %297, %253 : vector<8x32xf32>
    %301 = arith.mulf %296, %298 : vector<8x32xf32>
    %302 = arith.addf %300, %301 : vector<8x32xf32>
    %303 = math.tanh %302 : vector<8x32xf32>
    %304 = arith.mulf %299, %303 : vector<8x32xf32>
    %305 = vector.broadcast %283 : i32 to vector<8x1xi32>
    %306 = arith.cmpi slt, %305, %0 : vector<8x1xi32>
    %307 = vector.shape_cast %306 : vector<8x1xi1> to vector<8x1xi1>
    %308 = vector.broadcast %307 : vector<8x1xi1> to vector<8x32xi1>
    %309 = arith.select %308, %304, %250 : vector<8x32xi1>, vector<8x32xf32>
    %310 = vector.shape_cast %306 : vector<8x1xi1> to vector<8x1xi1>
    %311 = vector.broadcast %310 : vector<8x1xi1> to vector<8x32xi1>
    %312 = arith.select %311, %302, %253 : vector<8x32xi1>, vector<8x32xf32>
    %c5_i32 = arith.constant 5 : i32
    %313 = arith.index_cast %c5_i32 : i32 to index
    %c0_63 = arith.constant 0 : index
    %c0_64 = arith.constant 0 : index
    %314 = vector.load %arg17[%313, %c0_63, %c0_64] : memref<16x8x128xf32, #tpu.memory_space<vmem>>, vector<1x8x128xf32>
    %315 = vector.shape_cast %314 : vector<1x8x128xf32> to vector<8x128xf32>
    %316 = arith.truncf %279 : vector<8x32xf32> to vector<8x32xbf16>
    %cst_65 = arith.constant dense<0.000000e+00> : vector<8x128xf32>
    %317 = tpu.matmul %316, %15, %cst_65 {dimension_numbers = #tpu.dot_dimension_numbers<[1], [0], [0], [1], [0, 0, 1, 1], [], []>} : vector<8x32xbf16>, vector<32x128xbf16>, vector<8x128xf32> -> vector<8x128xf32>
    %318 = arith.addf %315, %317 : vector<8x128xf32>
    %319 = arith.negf %318 : vector<8x128xf32>
    %320 = math.exp %319 : vector<8x128xf32>
    %cst_66 = arith.constant 1.000000e+00 : f32
    %321 = vector.broadcast %cst_66 : f32 to vector<8x128xf32>
    %322 = arith.addf %321, %320 : vector<8x128xf32>
    %323 = arith.divf %321, %322 : vector<8x128xf32>
    %324 = math.tanh %318 : vector<8x128xf32>
    %325 = vector.extract_strided_slice %323 {offsets = [0, 0], sizes = [8, 32], strides = [1, 1]} : vector<8x128xf32> to vector<8x32xf32>
    %326 = vector.extract_strided_slice %323 {offsets = [0, 32], sizes = [8, 32], strides = [1, 1]} : vector<8x128xf32> to vector<8x32xf32>
    %327 = vector.extract_strided_slice %324 {offsets = [0, 64], sizes = [8, 32], strides = [1, 1]} : vector<8x128xf32> to vector<8x32xf32>
    %328 = vector.extract_strided_slice %323 {offsets = [0, 96], sizes = [8, 32], strides = [1, 1]} : vector<8x128xf32> to vector<8x32xf32>
    %329 = arith.mulf %326, %282 : vector<8x32xf32>
    %330 = arith.mulf %325, %327 : vector<8x32xf32>
    %331 = arith.addf %329, %330 : vector<8x32xf32>
    %332 = math.tanh %331 : vector<8x32xf32>
    %333 = arith.mulf %328, %332 : vector<8x32xf32>
    %334 = vector.broadcast %c5_i32 : i32 to vector<8x1xi32>
    %335 = arith.cmpi slt, %334, %0 : vector<8x1xi32>
    %336 = vector.shape_cast %335 : vector<8x1xi1> to vector<8x1xi1>
    %337 = vector.broadcast %336 : vector<8x1xi1> to vector<8x32xi1>
    %338 = arith.select %337, %333, %279 : vector<8x32xi1>, vector<8x32xf32>
    %339 = vector.shape_cast %335 : vector<8x1xi1> to vector<8x1xi1>
    %340 = vector.broadcast %339 : vector<8x1xi1> to vector<8x32xi1>
    %341 = arith.select %340, %331, %282 : vector<8x32xi1>, vector<8x32xf32>
    %c15_i32_67 = arith.constant 15 : i32
    %342 = arith.subi %c15_i32_67, %c5_i32 : i32
    %343 = arith.index_cast %342 : i32 to index
    %c0_68 = arith.constant 0 : index
    %c0_69 = arith.constant 0 : index
    %344 = vector.load %arg18[%343, %c0_68, %c0_69] : memref<16x8x128xf32, #tpu.memory_space<vmem>>, vector<1x8x128xf32>
    %345 = vector.shape_cast %344 : vector<1x8x128xf32> to vector<8x128xf32>
    %346 = arith.truncf %309 : vector<8x32xf32> to vector<8x32xbf16>
    %cst_70 = arith.constant dense<0.000000e+00> : vector<8x128xf32>
    %347 = tpu.matmul %346, %16, %cst_70 {dimension_numbers = #tpu.dot_dimension_numbers<[1], [0], [0], [1], [0, 0, 1, 1], [], []>} : vector<8x32xbf16>, vector<32x128xbf16>, vector<8x128xf32> -> vector<8x128xf32>
    %348 = arith.addf %345, %347 : vector<8x128xf32>
    %349 = arith.negf %348 : vector<8x128xf32>
    %350 = math.exp %349 : vector<8x128xf32>
    %cst_71 = arith.constant 1.000000e+00 : f32
    %351 = vector.broadcast %cst_71 : f32 to vector<8x128xf32>
    %352 = arith.addf %351, %350 : vector<8x128xf32>
    %353 = arith.divf %351, %352 : vector<8x128xf32>
    %354 = math.tanh %348 : vector<8x128xf32>
    %355 = vector.extract_strided_slice %353 {offsets = [0, 0], sizes = [8, 32], strides = [1, 1]} : vector<8x128xf32> to vector<8x32xf32>
    %356 = vector.extract_strided_slice %353 {offsets = [0, 32], sizes = [8, 32], strides = [1, 1]} : vector<8x128xf32> to vector<8x32xf32>
    %357 = vector.extract_strided_slice %354 {offsets = [0, 64], sizes = [8, 32], strides = [1, 1]} : vector<8x128xf32> to vector<8x32xf32>
    %358 = vector.extract_strided_slice %353 {offsets = [0, 96], sizes = [8, 32], strides = [1, 1]} : vector<8x128xf32> to vector<8x32xf32>
    %359 = arith.mulf %356, %312 : vector<8x32xf32>
    %360 = arith.mulf %355, %357 : vector<8x32xf32>
    %361 = arith.addf %359, %360 : vector<8x32xf32>
    %362 = math.tanh %361 : vector<8x32xf32>
    %363 = arith.mulf %358, %362 : vector<8x32xf32>
    %364 = vector.broadcast %342 : i32 to vector<8x1xi32>
    %365 = arith.cmpi slt, %364, %0 : vector<8x1xi32>
    %366 = vector.shape_cast %365 : vector<8x1xi1> to vector<8x1xi1>
    %367 = vector.broadcast %366 : vector<8x1xi1> to vector<8x32xi1>
    %368 = arith.select %367, %363, %309 : vector<8x32xi1>, vector<8x32xf32>
    %369 = vector.shape_cast %365 : vector<8x1xi1> to vector<8x1xi1>
    %370 = vector.broadcast %369 : vector<8x1xi1> to vector<8x32xi1>
    %371 = arith.select %370, %361, %312 : vector<8x32xi1>, vector<8x32xf32>
    %c6_i32 = arith.constant 6 : i32
    %372 = arith.index_cast %c6_i32 : i32 to index
    %c0_72 = arith.constant 0 : index
    %c0_73 = arith.constant 0 : index
    %373 = vector.load %arg17[%372, %c0_72, %c0_73] : memref<16x8x128xf32, #tpu.memory_space<vmem>>, vector<1x8x128xf32>
    %374 = vector.shape_cast %373 : vector<1x8x128xf32> to vector<8x128xf32>
    %375 = arith.truncf %338 : vector<8x32xf32> to vector<8x32xbf16>
    %cst_74 = arith.constant dense<0.000000e+00> : vector<8x128xf32>
    %376 = tpu.matmul %375, %15, %cst_74 {dimension_numbers = #tpu.dot_dimension_numbers<[1], [0], [0], [1], [0, 0, 1, 1], [], []>} : vector<8x32xbf16>, vector<32x128xbf16>, vector<8x128xf32> -> vector<8x128xf32>
    %377 = arith.addf %374, %376 : vector<8x128xf32>
    %378 = arith.negf %377 : vector<8x128xf32>
    %379 = math.exp %378 : vector<8x128xf32>
    %cst_75 = arith.constant 1.000000e+00 : f32
    %380 = vector.broadcast %cst_75 : f32 to vector<8x128xf32>
    %381 = arith.addf %380, %379 : vector<8x128xf32>
    %382 = arith.divf %380, %381 : vector<8x128xf32>
    %383 = math.tanh %377 : vector<8x128xf32>
    %384 = vector.extract_strided_slice %382 {offsets = [0, 0], sizes = [8, 32], strides = [1, 1]} : vector<8x128xf32> to vector<8x32xf32>
    %385 = vector.extract_strided_slice %382 {offsets = [0, 32], sizes = [8, 32], strides = [1, 1]} : vector<8x128xf32> to vector<8x32xf32>
    %386 = vector.extract_strided_slice %383 {offsets = [0, 64], sizes = [8, 32], strides = [1, 1]} : vector<8x128xf32> to vector<8x32xf32>
    %387 = vector.extract_strided_slice %382 {offsets = [0, 96], sizes = [8, 32], strides = [1, 1]} : vector<8x128xf32> to vector<8x32xf32>
    %388 = arith.mulf %385, %341 : vector<8x32xf32>
    %389 = arith.mulf %384, %386 : vector<8x32xf32>
    %390 = arith.addf %388, %389 : vector<8x32xf32>
    %391 = math.tanh %390 : vector<8x32xf32>
    %392 = arith.mulf %387, %391 : vector<8x32xf32>
    %393 = vector.broadcast %c6_i32 : i32 to vector<8x1xi32>
    %394 = arith.cmpi slt, %393, %0 : vector<8x1xi32>
    %395 = vector.shape_cast %394 : vector<8x1xi1> to vector<8x1xi1>
    %396 = vector.broadcast %395 : vector<8x1xi1> to vector<8x32xi1>
    %397 = arith.select %396, %392, %338 : vector<8x32xi1>, vector<8x32xf32>
    %398 = vector.shape_cast %394 : vector<8x1xi1> to vector<8x1xi1>
    %399 = vector.broadcast %398 : vector<8x1xi1> to vector<8x32xi1>
    %400 = arith.select %399, %390, %341 : vector<8x32xi1>, vector<8x32xf32>
    %c15_i32_76 = arith.constant 15 : i32
    %401 = arith.subi %c15_i32_76, %c6_i32 : i32
    %402 = arith.index_cast %401 : i32 to index
    %c0_77 = arith.constant 0 : index
    %c0_78 = arith.constant 0 : index
    %403 = vector.load %arg18[%402, %c0_77, %c0_78] : memref<16x8x128xf32, #tpu.memory_space<vmem>>, vector<1x8x128xf32>
    %404 = vector.shape_cast %403 : vector<1x8x128xf32> to vector<8x128xf32>
    %405 = arith.truncf %368 : vector<8x32xf32> to vector<8x32xbf16>
    %cst_79 = arith.constant dense<0.000000e+00> : vector<8x128xf32>
    %406 = tpu.matmul %405, %16, %cst_79 {dimension_numbers = #tpu.dot_dimension_numbers<[1], [0], [0], [1], [0, 0, 1, 1], [], []>} : vector<8x32xbf16>, vector<32x128xbf16>, vector<8x128xf32> -> vector<8x128xf32>
    %407 = arith.addf %404, %406 : vector<8x128xf32>
    %408 = arith.negf %407 : vector<8x128xf32>
    %409 = math.exp %408 : vector<8x128xf32>
    %cst_80 = arith.constant 1.000000e+00 : f32
    %410 = vector.broadcast %cst_80 : f32 to vector<8x128xf32>
    %411 = arith.addf %410, %409 : vector<8x128xf32>
    %412 = arith.divf %410, %411 : vector<8x128xf32>
    %413 = math.tanh %407 : vector<8x128xf32>
    %414 = vector.extract_strided_slice %412 {offsets = [0, 0], sizes = [8, 32], strides = [1, 1]} : vector<8x128xf32> to vector<8x32xf32>
    %415 = vector.extract_strided_slice %412 {offsets = [0, 32], sizes = [8, 32], strides = [1, 1]} : vector<8x128xf32> to vector<8x32xf32>
    %416 = vector.extract_strided_slice %413 {offsets = [0, 64], sizes = [8, 32], strides = [1, 1]} : vector<8x128xf32> to vector<8x32xf32>
    %417 = vector.extract_strided_slice %412 {offsets = [0, 96], sizes = [8, 32], strides = [1, 1]} : vector<8x128xf32> to vector<8x32xf32>
    %418 = arith.mulf %415, %371 : vector<8x32xf32>
    %419 = arith.mulf %414, %416 : vector<8x32xf32>
    %420 = arith.addf %418, %419 : vector<8x32xf32>
    %421 = math.tanh %420 : vector<8x32xf32>
    %422 = arith.mulf %417, %421 : vector<8x32xf32>
    %423 = vector.broadcast %401 : i32 to vector<8x1xi32>
    %424 = arith.cmpi slt, %423, %0 : vector<8x1xi32>
    %425 = vector.shape_cast %424 : vector<8x1xi1> to vector<8x1xi1>
    %426 = vector.broadcast %425 : vector<8x1xi1> to vector<8x32xi1>
    %427 = arith.select %426, %422, %368 : vector<8x32xi1>, vector<8x32xf32>
    %428 = vector.shape_cast %424 : vector<8x1xi1> to vector<8x1xi1>
    %429 = vector.broadcast %428 : vector<8x1xi1> to vector<8x32xi1>
    %430 = arith.select %429, %420, %371 : vector<8x32xi1>, vector<8x32xf32>
    %c7_i32 = arith.constant 7 : i32
    %431 = arith.index_cast %c7_i32 : i32 to index
    %c0_81 = arith.constant 0 : index
    %c0_82 = arith.constant 0 : index
    %432 = vector.load %arg17[%431, %c0_81, %c0_82] : memref<16x8x128xf32, #tpu.memory_space<vmem>>, vector<1x8x128xf32>
    %433 = vector.shape_cast %432 : vector<1x8x128xf32> to vector<8x128xf32>
    %434 = arith.truncf %397 : vector<8x32xf32> to vector<8x32xbf16>
    %cst_83 = arith.constant dense<0.000000e+00> : vector<8x128xf32>
    %435 = tpu.matmul %434, %15, %cst_83 {dimension_numbers = #tpu.dot_dimension_numbers<[1], [0], [0], [1], [0, 0, 1, 1], [], []>} : vector<8x32xbf16>, vector<32x128xbf16>, vector<8x128xf32> -> vector<8x128xf32>
    %436 = arith.addf %433, %435 : vector<8x128xf32>
    %437 = arith.negf %436 : vector<8x128xf32>
    %438 = math.exp %437 : vector<8x128xf32>
    %cst_84 = arith.constant 1.000000e+00 : f32
    %439 = vector.broadcast %cst_84 : f32 to vector<8x128xf32>
    %440 = arith.addf %439, %438 : vector<8x128xf32>
    %441 = arith.divf %439, %440 : vector<8x128xf32>
    %442 = math.tanh %436 : vector<8x128xf32>
    %443 = vector.extract_strided_slice %441 {offsets = [0, 0], sizes = [8, 32], strides = [1, 1]} : vector<8x128xf32> to vector<8x32xf32>
    %444 = vector.extract_strided_slice %441 {offsets = [0, 32], sizes = [8, 32], strides = [1, 1]} : vector<8x128xf32> to vector<8x32xf32>
    %445 = vector.extract_strided_slice %442 {offsets = [0, 64], sizes = [8, 32], strides = [1, 1]} : vector<8x128xf32> to vector<8x32xf32>
    %446 = vector.extract_strided_slice %441 {offsets = [0, 96], sizes = [8, 32], strides = [1, 1]} : vector<8x128xf32> to vector<8x32xf32>
    %447 = arith.mulf %444, %400 : vector<8x32xf32>
    %448 = arith.mulf %443, %445 : vector<8x32xf32>
    %449 = arith.addf %447, %448 : vector<8x32xf32>
    %450 = math.tanh %449 : vector<8x32xf32>
    %451 = arith.mulf %446, %450 : vector<8x32xf32>
    %452 = vector.broadcast %c7_i32 : i32 to vector<8x1xi32>
    %453 = arith.cmpi slt, %452, %0 : vector<8x1xi32>
    %454 = vector.shape_cast %453 : vector<8x1xi1> to vector<8x1xi1>
    %455 = vector.broadcast %454 : vector<8x1xi1> to vector<8x32xi1>
    %456 = arith.select %455, %451, %397 : vector<8x32xi1>, vector<8x32xf32>
    %457 = vector.shape_cast %453 : vector<8x1xi1> to vector<8x1xi1>
    %458 = vector.broadcast %457 : vector<8x1xi1> to vector<8x32xi1>
    %459 = arith.select %458, %449, %400 : vector<8x32xi1>, vector<8x32xf32>
    %c15_i32_85 = arith.constant 15 : i32
    %460 = arith.subi %c15_i32_85, %c7_i32 : i32
    %461 = arith.index_cast %460 : i32 to index
    %c0_86 = arith.constant 0 : index
    %c0_87 = arith.constant 0 : index
    %462 = vector.load %arg18[%461, %c0_86, %c0_87] : memref<16x8x128xf32, #tpu.memory_space<vmem>>, vector<1x8x128xf32>
    %463 = vector.shape_cast %462 : vector<1x8x128xf32> to vector<8x128xf32>
    %464 = arith.truncf %427 : vector<8x32xf32> to vector<8x32xbf16>
    %cst_88 = arith.constant dense<0.000000e+00> : vector<8x128xf32>
    %465 = tpu.matmul %464, %16, %cst_88 {dimension_numbers = #tpu.dot_dimension_numbers<[1], [0], [0], [1], [0, 0, 1, 1], [], []>} : vector<8x32xbf16>, vector<32x128xbf16>, vector<8x128xf32> -> vector<8x128xf32>
    %466 = arith.addf %463, %465 : vector<8x128xf32>
    %467 = arith.negf %466 : vector<8x128xf32>
    %468 = math.exp %467 : vector<8x128xf32>
    %cst_89 = arith.constant 1.000000e+00 : f32
    %469 = vector.broadcast %cst_89 : f32 to vector<8x128xf32>
    %470 = arith.addf %469, %468 : vector<8x128xf32>
    %471 = arith.divf %469, %470 : vector<8x128xf32>
    %472 = math.tanh %466 : vector<8x128xf32>
    %473 = vector.extract_strided_slice %471 {offsets = [0, 0], sizes = [8, 32], strides = [1, 1]} : vector<8x128xf32> to vector<8x32xf32>
    %474 = vector.extract_strided_slice %471 {offsets = [0, 32], sizes = [8, 32], strides = [1, 1]} : vector<8x128xf32> to vector<8x32xf32>
    %475 = vector.extract_strided_slice %472 {offsets = [0, 64], sizes = [8, 32], strides = [1, 1]} : vector<8x128xf32> to vector<8x32xf32>
    %476 = vector.extract_strided_slice %471 {offsets = [0, 96], sizes = [8, 32], strides = [1, 1]} : vector<8x128xf32> to vector<8x32xf32>
    %477 = arith.mulf %474, %430 : vector<8x32xf32>
    %478 = arith.mulf %473, %475 : vector<8x32xf32>
    %479 = arith.addf %477, %478 : vector<8x32xf32>
    %480 = math.tanh %479 : vector<8x32xf32>
    %481 = arith.mulf %476, %480 : vector<8x32xf32>
    %482 = vector.broadcast %460 : i32 to vector<8x1xi32>
    %483 = arith.cmpi slt, %482, %0 : vector<8x1xi32>
    %484 = vector.shape_cast %483 : vector<8x1xi1> to vector<8x1xi1>
    %485 = vector.broadcast %484 : vector<8x1xi1> to vector<8x32xi1>
    %486 = arith.select %485, %481, %427 : vector<8x32xi1>, vector<8x32xf32>
    %487 = vector.shape_cast %483 : vector<8x1xi1> to vector<8x1xi1>
    %488 = vector.broadcast %487 : vector<8x1xi1> to vector<8x32xi1>
    %489 = arith.select %488, %479, %430 : vector<8x32xi1>, vector<8x32xf32>
    %c8_i32 = arith.constant 8 : i32
    %490 = arith.index_cast %c8_i32 : i32 to index
    %c0_90 = arith.constant 0 : index
    %c0_91 = arith.constant 0 : index
    %491 = vector.load %arg17[%490, %c0_90, %c0_91] : memref<16x8x128xf32, #tpu.memory_space<vmem>>, vector<1x8x128xf32>
    %492 = vector.shape_cast %491 : vector<1x8x128xf32> to vector<8x128xf32>
    %493 = arith.truncf %456 : vector<8x32xf32> to vector<8x32xbf16>
    %cst_92 = arith.constant dense<0.000000e+00> : vector<8x128xf32>
    %494 = tpu.matmul %493, %15, %cst_92 {dimension_numbers = #tpu.dot_dimension_numbers<[1], [0], [0], [1], [0, 0, 1, 1], [], []>} : vector<8x32xbf16>, vector<32x128xbf16>, vector<8x128xf32> -> vector<8x128xf32>
    %495 = arith.addf %492, %494 : vector<8x128xf32>
    %496 = arith.negf %495 : vector<8x128xf32>
    %497 = math.exp %496 : vector<8x128xf32>
    %cst_93 = arith.constant 1.000000e+00 : f32
    %498 = vector.broadcast %cst_93 : f32 to vector<8x128xf32>
    %499 = arith.addf %498, %497 : vector<8x128xf32>
    %500 = arith.divf %498, %499 : vector<8x128xf32>
    %501 = math.tanh %495 : vector<8x128xf32>
    %502 = vector.extract_strided_slice %500 {offsets = [0, 0], sizes = [8, 32], strides = [1, 1]} : vector<8x128xf32> to vector<8x32xf32>
    %503 = vector.extract_strided_slice %500 {offsets = [0, 32], sizes = [8, 32], strides = [1, 1]} : vector<8x128xf32> to vector<8x32xf32>
    %504 = vector.extract_strided_slice %501 {offsets = [0, 64], sizes = [8, 32], strides = [1, 1]} : vector<8x128xf32> to vector<8x32xf32>
    %505 = vector.extract_strided_slice %500 {offsets = [0, 96], sizes = [8, 32], strides = [1, 1]} : vector<8x128xf32> to vector<8x32xf32>
    %506 = arith.mulf %503, %459 : vector<8x32xf32>
    %507 = arith.mulf %502, %504 : vector<8x32xf32>
    %508 = arith.addf %506, %507 : vector<8x32xf32>
    %509 = math.tanh %508 : vector<8x32xf32>
    %510 = arith.mulf %505, %509 : vector<8x32xf32>
    %511 = vector.broadcast %c8_i32 : i32 to vector<8x1xi32>
    %512 = arith.cmpi slt, %511, %0 : vector<8x1xi32>
    %513 = vector.shape_cast %512 : vector<8x1xi1> to vector<8x1xi1>
    %514 = vector.broadcast %513 : vector<8x1xi1> to vector<8x32xi1>
    %515 = arith.select %514, %510, %456 : vector<8x32xi1>, vector<8x32xf32>
    %516 = vector.shape_cast %512 : vector<8x1xi1> to vector<8x1xi1>
    %517 = vector.broadcast %516 : vector<8x1xi1> to vector<8x32xi1>
    %518 = arith.select %517, %508, %459 : vector<8x32xi1>, vector<8x32xf32>
    %c15_i32_94 = arith.constant 15 : i32
    %519 = arith.subi %c15_i32_94, %c8_i32 : i32
    %520 = arith.index_cast %519 : i32 to index
    %c0_95 = arith.constant 0 : index
    %c0_96 = arith.constant 0 : index
    %521 = vector.load %arg18[%520, %c0_95, %c0_96] : memref<16x8x128xf32, #tpu.memory_space<vmem>>, vector<1x8x128xf32>
    %522 = vector.shape_cast %521 : vector<1x8x128xf32> to vector<8x128xf32>
    %523 = arith.truncf %486 : vector<8x32xf32> to vector<8x32xbf16>
    %cst_97 = arith.constant dense<0.000000e+00> : vector<8x128xf32>
    %524 = tpu.matmul %523, %16, %cst_97 {dimension_numbers = #tpu.dot_dimension_numbers<[1], [0], [0], [1], [0, 0, 1, 1], [], []>} : vector<8x32xbf16>, vector<32x128xbf16>, vector<8x128xf32> -> vector<8x128xf32>
    %525 = arith.addf %522, %524 : vector<8x128xf32>
    %526 = arith.negf %525 : vector<8x128xf32>
    %527 = math.exp %526 : vector<8x128xf32>
    %cst_98 = arith.constant 1.000000e+00 : f32
    %528 = vector.broadcast %cst_98 : f32 to vector<8x128xf32>
    %529 = arith.addf %528, %527 : vector<8x128xf32>
    %530 = arith.divf %528, %529 : vector<8x128xf32>
    %531 = math.tanh %525 : vector<8x128xf32>
    %532 = vector.extract_strided_slice %530 {offsets = [0, 0], sizes = [8, 32], strides = [1, 1]} : vector<8x128xf32> to vector<8x32xf32>
    %533 = vector.extract_strided_slice %530 {offsets = [0, 32], sizes = [8, 32], strides = [1, 1]} : vector<8x128xf32> to vector<8x32xf32>
    %534 = vector.extract_strided_slice %531 {offsets = [0, 64], sizes = [8, 32], strides = [1, 1]} : vector<8x128xf32> to vector<8x32xf32>
    %535 = vector.extract_strided_slice %530 {offsets = [0, 96], sizes = [8, 32], strides = [1, 1]} : vector<8x128xf32> to vector<8x32xf32>
    %536 = arith.mulf %533, %489 : vector<8x32xf32>
    %537 = arith.mulf %532, %534 : vector<8x32xf32>
    %538 = arith.addf %536, %537 : vector<8x32xf32>
    %539 = math.tanh %538 : vector<8x32xf32>
    %540 = arith.mulf %535, %539 : vector<8x32xf32>
    %541 = vector.broadcast %519 : i32 to vector<8x1xi32>
    %542 = arith.cmpi slt, %541, %0 : vector<8x1xi32>
    %543 = vector.shape_cast %542 : vector<8x1xi1> to vector<8x1xi1>
    %544 = vector.broadcast %543 : vector<8x1xi1> to vector<8x32xi1>
    %545 = arith.select %544, %540, %486 : vector<8x32xi1>, vector<8x32xf32>
    %546 = vector.shape_cast %542 : vector<8x1xi1> to vector<8x1xi1>
    %547 = vector.broadcast %546 : vector<8x1xi1> to vector<8x32xi1>
    %548 = arith.select %547, %538, %489 : vector<8x32xi1>, vector<8x32xf32>
    %c9_i32 = arith.constant 9 : i32
    %549 = arith.index_cast %c9_i32 : i32 to index
    %c0_99 = arith.constant 0 : index
    %c0_100 = arith.constant 0 : index
    %550 = vector.load %arg17[%549, %c0_99, %c0_100] : memref<16x8x128xf32, #tpu.memory_space<vmem>>, vector<1x8x128xf32>
    %551 = vector.shape_cast %550 : vector<1x8x128xf32> to vector<8x128xf32>
    %552 = arith.truncf %515 : vector<8x32xf32> to vector<8x32xbf16>
    %cst_101 = arith.constant dense<0.000000e+00> : vector<8x128xf32>
    %553 = tpu.matmul %552, %15, %cst_101 {dimension_numbers = #tpu.dot_dimension_numbers<[1], [0], [0], [1], [0, 0, 1, 1], [], []>} : vector<8x32xbf16>, vector<32x128xbf16>, vector<8x128xf32> -> vector<8x128xf32>
    %554 = arith.addf %551, %553 : vector<8x128xf32>
    %555 = arith.negf %554 : vector<8x128xf32>
    %556 = math.exp %555 : vector<8x128xf32>
    %cst_102 = arith.constant 1.000000e+00 : f32
    %557 = vector.broadcast %cst_102 : f32 to vector<8x128xf32>
    %558 = arith.addf %557, %556 : vector<8x128xf32>
    %559 = arith.divf %557, %558 : vector<8x128xf32>
    %560 = math.tanh %554 : vector<8x128xf32>
    %561 = vector.extract_strided_slice %559 {offsets = [0, 0], sizes = [8, 32], strides = [1, 1]} : vector<8x128xf32> to vector<8x32xf32>
    %562 = vector.extract_strided_slice %559 {offsets = [0, 32], sizes = [8, 32], strides = [1, 1]} : vector<8x128xf32> to vector<8x32xf32>
    %563 = vector.extract_strided_slice %560 {offsets = [0, 64], sizes = [8, 32], strides = [1, 1]} : vector<8x128xf32> to vector<8x32xf32>
    %564 = vector.extract_strided_slice %559 {offsets = [0, 96], sizes = [8, 32], strides = [1, 1]} : vector<8x128xf32> to vector<8x32xf32>
    %565 = arith.mulf %562, %518 : vector<8x32xf32>
    %566 = arith.mulf %561, %563 : vector<8x32xf32>
    %567 = arith.addf %565, %566 : vector<8x32xf32>
    %568 = math.tanh %567 : vector<8x32xf32>
    %569 = arith.mulf %564, %568 : vector<8x32xf32>
    %570 = vector.broadcast %c9_i32 : i32 to vector<8x1xi32>
    %571 = arith.cmpi slt, %570, %0 : vector<8x1xi32>
    %572 = vector.shape_cast %571 : vector<8x1xi1> to vector<8x1xi1>
    %573 = vector.broadcast %572 : vector<8x1xi1> to vector<8x32xi1>
    %574 = arith.select %573, %569, %515 : vector<8x32xi1>, vector<8x32xf32>
    %575 = vector.shape_cast %571 : vector<8x1xi1> to vector<8x1xi1>
    %576 = vector.broadcast %575 : vector<8x1xi1> to vector<8x32xi1>
    %577 = arith.select %576, %567, %518 : vector<8x32xi1>, vector<8x32xf32>
    %c15_i32_103 = arith.constant 15 : i32
    %578 = arith.subi %c15_i32_103, %c9_i32 : i32
    %579 = arith.index_cast %578 : i32 to index
    %c0_104 = arith.constant 0 : index
    %c0_105 = arith.constant 0 : index
    %580 = vector.load %arg18[%579, %c0_104, %c0_105] : memref<16x8x128xf32, #tpu.memory_space<vmem>>, vector<1x8x128xf32>
    %581 = vector.shape_cast %580 : vector<1x8x128xf32> to vector<8x128xf32>
    %582 = arith.truncf %545 : vector<8x32xf32> to vector<8x32xbf16>
    %cst_106 = arith.constant dense<0.000000e+00> : vector<8x128xf32>
    %583 = tpu.matmul %582, %16, %cst_106 {dimension_numbers = #tpu.dot_dimension_numbers<[1], [0], [0], [1], [0, 0, 1, 1], [], []>} : vector<8x32xbf16>, vector<32x128xbf16>, vector<8x128xf32> -> vector<8x128xf32>
    %584 = arith.addf %581, %583 : vector<8x128xf32>
    %585 = arith.negf %584 : vector<8x128xf32>
    %586 = math.exp %585 : vector<8x128xf32>
    %cst_107 = arith.constant 1.000000e+00 : f32
    %587 = vector.broadcast %cst_107 : f32 to vector<8x128xf32>
    %588 = arith.addf %587, %586 : vector<8x128xf32>
    %589 = arith.divf %587, %588 : vector<8x128xf32>
    %590 = math.tanh %584 : vector<8x128xf32>
    %591 = vector.extract_strided_slice %589 {offsets = [0, 0], sizes = [8, 32], strides = [1, 1]} : vector<8x128xf32> to vector<8x32xf32>
    %592 = vector.extract_strided_slice %589 {offsets = [0, 32], sizes = [8, 32], strides = [1, 1]} : vector<8x128xf32> to vector<8x32xf32>
    %593 = vector.extract_strided_slice %590 {offsets = [0, 64], sizes = [8, 32], strides = [1, 1]} : vector<8x128xf32> to vector<8x32xf32>
    %594 = vector.extract_strided_slice %589 {offsets = [0, 96], sizes = [8, 32], strides = [1, 1]} : vector<8x128xf32> to vector<8x32xf32>
    %595 = arith.mulf %592, %548 : vector<8x32xf32>
    %596 = arith.mulf %591, %593 : vector<8x32xf32>
    %597 = arith.addf %595, %596 : vector<8x32xf32>
    %598 = math.tanh %597 : vector<8x32xf32>
    %599 = arith.mulf %594, %598 : vector<8x32xf32>
    %600 = vector.broadcast %578 : i32 to vector<8x1xi32>
    %601 = arith.cmpi slt, %600, %0 : vector<8x1xi32>
    %602 = vector.shape_cast %601 : vector<8x1xi1> to vector<8x1xi1>
    %603 = vector.broadcast %602 : vector<8x1xi1> to vector<8x32xi1>
    %604 = arith.select %603, %599, %545 : vector<8x32xi1>, vector<8x32xf32>
    %605 = vector.shape_cast %601 : vector<8x1xi1> to vector<8x1xi1>
    %606 = vector.broadcast %605 : vector<8x1xi1> to vector<8x32xi1>
    %607 = arith.select %606, %597, %548 : vector<8x32xi1>, vector<8x32xf32>
    %c10_i32 = arith.constant 10 : i32
    %608 = arith.index_cast %c10_i32 : i32 to index
    %c0_108 = arith.constant 0 : index
    %c0_109 = arith.constant 0 : index
    %609 = vector.load %arg17[%608, %c0_108, %c0_109] : memref<16x8x128xf32, #tpu.memory_space<vmem>>, vector<1x8x128xf32>
    %610 = vector.shape_cast %609 : vector<1x8x128xf32> to vector<8x128xf32>
    %611 = arith.truncf %574 : vector<8x32xf32> to vector<8x32xbf16>
    %cst_110 = arith.constant dense<0.000000e+00> : vector<8x128xf32>
    %612 = tpu.matmul %611, %15, %cst_110 {dimension_numbers = #tpu.dot_dimension_numbers<[1], [0], [0], [1], [0, 0, 1, 1], [], []>} : vector<8x32xbf16>, vector<32x128xbf16>, vector<8x128xf32> -> vector<8x128xf32>
    %613 = arith.addf %610, %612 : vector<8x128xf32>
    %614 = arith.negf %613 : vector<8x128xf32>
    %615 = math.exp %614 : vector<8x128xf32>
    %cst_111 = arith.constant 1.000000e+00 : f32
    %616 = vector.broadcast %cst_111 : f32 to vector<8x128xf32>
    %617 = arith.addf %616, %615 : vector<8x128xf32>
    %618 = arith.divf %616, %617 : vector<8x128xf32>
    %619 = math.tanh %613 : vector<8x128xf32>
    %620 = vector.extract_strided_slice %618 {offsets = [0, 0], sizes = [8, 32], strides = [1, 1]} : vector<8x128xf32> to vector<8x32xf32>
    %621 = vector.extract_strided_slice %618 {offsets = [0, 32], sizes = [8, 32], strides = [1, 1]} : vector<8x128xf32> to vector<8x32xf32>
    %622 = vector.extract_strided_slice %619 {offsets = [0, 64], sizes = [8, 32], strides = [1, 1]} : vector<8x128xf32> to vector<8x32xf32>
    %623 = vector.extract_strided_slice %618 {offsets = [0, 96], sizes = [8, 32], strides = [1, 1]} : vector<8x128xf32> to vector<8x32xf32>
    %624 = arith.mulf %621, %577 : vector<8x32xf32>
    %625 = arith.mulf %620, %622 : vector<8x32xf32>
    %626 = arith.addf %624, %625 : vector<8x32xf32>
    %627 = math.tanh %626 : vector<8x32xf32>
    %628 = arith.mulf %623, %627 : vector<8x32xf32>
    %629 = vector.broadcast %c10_i32 : i32 to vector<8x1xi32>
    %630 = arith.cmpi slt, %629, %0 : vector<8x1xi32>
    %631 = vector.shape_cast %630 : vector<8x1xi1> to vector<8x1xi1>
    %632 = vector.broadcast %631 : vector<8x1xi1> to vector<8x32xi1>
    %633 = arith.select %632, %628, %574 : vector<8x32xi1>, vector<8x32xf32>
    %634 = vector.shape_cast %630 : vector<8x1xi1> to vector<8x1xi1>
    %635 = vector.broadcast %634 : vector<8x1xi1> to vector<8x32xi1>
    %636 = arith.select %635, %626, %577 : vector<8x32xi1>, vector<8x32xf32>
    %c15_i32_112 = arith.constant 15 : i32
    %637 = arith.subi %c15_i32_112, %c10_i32 : i32
    %638 = arith.index_cast %637 : i32 to index
    %c0_113 = arith.constant 0 : index
    %c0_114 = arith.constant 0 : index
    %639 = vector.load %arg18[%638, %c0_113, %c0_114] : memref<16x8x128xf32, #tpu.memory_space<vmem>>, vector<1x8x128xf32>
    %640 = vector.shape_cast %639 : vector<1x8x128xf32> to vector<8x128xf32>
    %641 = arith.truncf %604 : vector<8x32xf32> to vector<8x32xbf16>
    %cst_115 = arith.constant dense<0.000000e+00> : vector<8x128xf32>
    %642 = tpu.matmul %641, %16, %cst_115 {dimension_numbers = #tpu.dot_dimension_numbers<[1], [0], [0], [1], [0, 0, 1, 1], [], []>} : vector<8x32xbf16>, vector<32x128xbf16>, vector<8x128xf32> -> vector<8x128xf32>
    %643 = arith.addf %640, %642 : vector<8x128xf32>
    %644 = arith.negf %643 : vector<8x128xf32>
    %645 = math.exp %644 : vector<8x128xf32>
    %cst_116 = arith.constant 1.000000e+00 : f32
    %646 = vector.broadcast %cst_116 : f32 to vector<8x128xf32>
    %647 = arith.addf %646, %645 : vector<8x128xf32>
    %648 = arith.divf %646, %647 : vector<8x128xf32>
    %649 = math.tanh %643 : vector<8x128xf32>
    %650 = vector.extract_strided_slice %648 {offsets = [0, 0], sizes = [8, 32], strides = [1, 1]} : vector<8x128xf32> to vector<8x32xf32>
    %651 = vector.extract_strided_slice %648 {offsets = [0, 32], sizes = [8, 32], strides = [1, 1]} : vector<8x128xf32> to vector<8x32xf32>
    %652 = vector.extract_strided_slice %649 {offsets = [0, 64], sizes = [8, 32], strides = [1, 1]} : vector<8x128xf32> to vector<8x32xf32>
    %653 = vector.extract_strided_slice %648 {offsets = [0, 96], sizes = [8, 32], strides = [1, 1]} : vector<8x128xf32> to vector<8x32xf32>
    %654 = arith.mulf %651, %607 : vector<8x32xf32>
    %655 = arith.mulf %650, %652 : vector<8x32xf32>
    %656 = arith.addf %654, %655 : vector<8x32xf32>
    %657 = math.tanh %656 : vector<8x32xf32>
    %658 = arith.mulf %653, %657 : vector<8x32xf32>
    %659 = vector.broadcast %637 : i32 to vector<8x1xi32>
    %660 = arith.cmpi slt, %659, %0 : vector<8x1xi32>
    %661 = vector.shape_cast %660 : vector<8x1xi1> to vector<8x1xi1>
    %662 = vector.broadcast %661 : vector<8x1xi1> to vector<8x32xi1>
    %663 = arith.select %662, %658, %604 : vector<8x32xi1>, vector<8x32xf32>
    %664 = vector.shape_cast %660 : vector<8x1xi1> to vector<8x1xi1>
    %665 = vector.broadcast %664 : vector<8x1xi1> to vector<8x32xi1>
    %666 = arith.select %665, %656, %607 : vector<8x32xi1>, vector<8x32xf32>
    %c11_i32 = arith.constant 11 : i32
    %667 = arith.index_cast %c11_i32 : i32 to index
    %c0_117 = arith.constant 0 : index
    %c0_118 = arith.constant 0 : index
    %668 = vector.load %arg17[%667, %c0_117, %c0_118] : memref<16x8x128xf32, #tpu.memory_space<vmem>>, vector<1x8x128xf32>
    %669 = vector.shape_cast %668 : vector<1x8x128xf32> to vector<8x128xf32>
    %670 = arith.truncf %633 : vector<8x32xf32> to vector<8x32xbf16>
    %cst_119 = arith.constant dense<0.000000e+00> : vector<8x128xf32>
    %671 = tpu.matmul %670, %15, %cst_119 {dimension_numbers = #tpu.dot_dimension_numbers<[1], [0], [0], [1], [0, 0, 1, 1], [], []>} : vector<8x32xbf16>, vector<32x128xbf16>, vector<8x128xf32> -> vector<8x128xf32>
    %672 = arith.addf %669, %671 : vector<8x128xf32>
    %673 = arith.negf %672 : vector<8x128xf32>
    %674 = math.exp %673 : vector<8x128xf32>
    %cst_120 = arith.constant 1.000000e+00 : f32
    %675 = vector.broadcast %cst_120 : f32 to vector<8x128xf32>
    %676 = arith.addf %675, %674 : vector<8x128xf32>
    %677 = arith.divf %675, %676 : vector<8x128xf32>
    %678 = math.tanh %672 : vector<8x128xf32>
    %679 = vector.extract_strided_slice %677 {offsets = [0, 0], sizes = [8, 32], strides = [1, 1]} : vector<8x128xf32> to vector<8x32xf32>
    %680 = vector.extract_strided_slice %677 {offsets = [0, 32], sizes = [8, 32], strides = [1, 1]} : vector<8x128xf32> to vector<8x32xf32>
    %681 = vector.extract_strided_slice %678 {offsets = [0, 64], sizes = [8, 32], strides = [1, 1]} : vector<8x128xf32> to vector<8x32xf32>
    %682 = vector.extract_strided_slice %677 {offsets = [0, 96], sizes = [8, 32], strides = [1, 1]} : vector<8x128xf32> to vector<8x32xf32>
    %683 = arith.mulf %680, %636 : vector<8x32xf32>
    %684 = arith.mulf %679, %681 : vector<8x32xf32>
    %685 = arith.addf %683, %684 : vector<8x32xf32>
    %686 = math.tanh %685 : vector<8x32xf32>
    %687 = arith.mulf %682, %686 : vector<8x32xf32>
    %688 = vector.broadcast %c11_i32 : i32 to vector<8x1xi32>
    %689 = arith.cmpi slt, %688, %0 : vector<8x1xi32>
    %690 = vector.shape_cast %689 : vector<8x1xi1> to vector<8x1xi1>
    %691 = vector.broadcast %690 : vector<8x1xi1> to vector<8x32xi1>
    %692 = arith.select %691, %687, %633 : vector<8x32xi1>, vector<8x32xf32>
    %693 = vector.shape_cast %689 : vector<8x1xi1> to vector<8x1xi1>
    %694 = vector.broadcast %693 : vector<8x1xi1> to vector<8x32xi1>
    %695 = arith.select %694, %685, %636 : vector<8x32xi1>, vector<8x32xf32>
    %c15_i32_121 = arith.constant 15 : i32
    %696 = arith.subi %c15_i32_121, %c11_i32 : i32
    %697 = arith.index_cast %696 : i32 to index
    %c0_122 = arith.constant 0 : index
    %c0_123 = arith.constant 0 : index
    %698 = vector.load %arg18[%697, %c0_122, %c0_123] : memref<16x8x128xf32, #tpu.memory_space<vmem>>, vector<1x8x128xf32>
    %699 = vector.shape_cast %698 : vector<1x8x128xf32> to vector<8x128xf32>
    %700 = arith.truncf %663 : vector<8x32xf32> to vector<8x32xbf16>
    %cst_124 = arith.constant dense<0.000000e+00> : vector<8x128xf32>
    %701 = tpu.matmul %700, %16, %cst_124 {dimension_numbers = #tpu.dot_dimension_numbers<[1], [0], [0], [1], [0, 0, 1, 1], [], []>} : vector<8x32xbf16>, vector<32x128xbf16>, vector<8x128xf32> -> vector<8x128xf32>
    %702 = arith.addf %699, %701 : vector<8x128xf32>
    %703 = arith.negf %702 : vector<8x128xf32>
    %704 = math.exp %703 : vector<8x128xf32>
    %cst_125 = arith.constant 1.000000e+00 : f32
    %705 = vector.broadcast %cst_125 : f32 to vector<8x128xf32>
    %706 = arith.addf %705, %704 : vector<8x128xf32>
    %707 = arith.divf %705, %706 : vector<8x128xf32>
    %708 = math.tanh %702 : vector<8x128xf32>
    %709 = vector.extract_strided_slice %707 {offsets = [0, 0], sizes = [8, 32], strides = [1, 1]} : vector<8x128xf32> to vector<8x32xf32>
    %710 = vector.extract_strided_slice %707 {offsets = [0, 32], sizes = [8, 32], strides = [1, 1]} : vector<8x128xf32> to vector<8x32xf32>
    %711 = vector.extract_strided_slice %708 {offsets = [0, 64], sizes = [8, 32], strides = [1, 1]} : vector<8x128xf32> to vector<8x32xf32>
    %712 = vector.extract_strided_slice %707 {offsets = [0, 96], sizes = [8, 32], strides = [1, 1]} : vector<8x128xf32> to vector<8x32xf32>
    %713 = arith.mulf %710, %666 : vector<8x32xf32>
    %714 = arith.mulf %709, %711 : vector<8x32xf32>
    %715 = arith.addf %713, %714 : vector<8x32xf32>
    %716 = math.tanh %715 : vector<8x32xf32>
    %717 = arith.mulf %712, %716 : vector<8x32xf32>
    %718 = vector.broadcast %696 : i32 to vector<8x1xi32>
    %719 = arith.cmpi slt, %718, %0 : vector<8x1xi32>
    %720 = vector.shape_cast %719 : vector<8x1xi1> to vector<8x1xi1>
    %721 = vector.broadcast %720 : vector<8x1xi1> to vector<8x32xi1>
    %722 = arith.select %721, %717, %663 : vector<8x32xi1>, vector<8x32xf32>
    %723 = vector.shape_cast %719 : vector<8x1xi1> to vector<8x1xi1>
    %724 = vector.broadcast %723 : vector<8x1xi1> to vector<8x32xi1>
    %725 = arith.select %724, %715, %666 : vector<8x32xi1>, vector<8x32xf32>
    %c12_i32 = arith.constant 12 : i32
    %726 = arith.index_cast %c12_i32 : i32 to index
    %c0_126 = arith.constant 0 : index
    %c0_127 = arith.constant 0 : index
    %727 = vector.load %arg17[%726, %c0_126, %c0_127] : memref<16x8x128xf32, #tpu.memory_space<vmem>>, vector<1x8x128xf32>
    %728 = vector.shape_cast %727 : vector<1x8x128xf32> to vector<8x128xf32>
    %729 = arith.truncf %692 : vector<8x32xf32> to vector<8x32xbf16>
    %cst_128 = arith.constant dense<0.000000e+00> : vector<8x128xf32>
    %730 = tpu.matmul %729, %15, %cst_128 {dimension_numbers = #tpu.dot_dimension_numbers<[1], [0], [0], [1], [0, 0, 1, 1], [], []>} : vector<8x32xbf16>, vector<32x128xbf16>, vector<8x128xf32> -> vector<8x128xf32>
    %731 = arith.addf %728, %730 : vector<8x128xf32>
    %732 = arith.negf %731 : vector<8x128xf32>
    %733 = math.exp %732 : vector<8x128xf32>
    %cst_129 = arith.constant 1.000000e+00 : f32
    %734 = vector.broadcast %cst_129 : f32 to vector<8x128xf32>
    %735 = arith.addf %734, %733 : vector<8x128xf32>
    %736 = arith.divf %734, %735 : vector<8x128xf32>
    %737 = math.tanh %731 : vector<8x128xf32>
    %738 = vector.extract_strided_slice %736 {offsets = [0, 0], sizes = [8, 32], strides = [1, 1]} : vector<8x128xf32> to vector<8x32xf32>
    %739 = vector.extract_strided_slice %736 {offsets = [0, 32], sizes = [8, 32], strides = [1, 1]} : vector<8x128xf32> to vector<8x32xf32>
    %740 = vector.extract_strided_slice %737 {offsets = [0, 64], sizes = [8, 32], strides = [1, 1]} : vector<8x128xf32> to vector<8x32xf32>
    %741 = vector.extract_strided_slice %736 {offsets = [0, 96], sizes = [8, 32], strides = [1, 1]} : vector<8x128xf32> to vector<8x32xf32>
    %742 = arith.mulf %739, %695 : vector<8x32xf32>
    %743 = arith.mulf %738, %740 : vector<8x32xf32>
    %744 = arith.addf %742, %743 : vector<8x32xf32>
    %745 = math.tanh %744 : vector<8x32xf32>
    %746 = arith.mulf %741, %745 : vector<8x32xf32>
    %747 = vector.broadcast %c12_i32 : i32 to vector<8x1xi32>
    %748 = arith.cmpi slt, %747, %0 : vector<8x1xi32>
    %749 = vector.shape_cast %748 : vector<8x1xi1> to vector<8x1xi1>
    %750 = vector.broadcast %749 : vector<8x1xi1> to vector<8x32xi1>
    %751 = arith.select %750, %746, %692 : vector<8x32xi1>, vector<8x32xf32>
    %752 = vector.shape_cast %748 : vector<8x1xi1> to vector<8x1xi1>
    %753 = vector.broadcast %752 : vector<8x1xi1> to vector<8x32xi1>
    %754 = arith.select %753, %744, %695 : vector<8x32xi1>, vector<8x32xf32>
    %c15_i32_130 = arith.constant 15 : i32
    %755 = arith.subi %c15_i32_130, %c12_i32 : i32
    %756 = arith.index_cast %755 : i32 to index
    %c0_131 = arith.constant 0 : index
    %c0_132 = arith.constant 0 : index
    %757 = vector.load %arg18[%756, %c0_131, %c0_132] : memref<16x8x128xf32, #tpu.memory_space<vmem>>, vector<1x8x128xf32>
    %758 = vector.shape_cast %757 : vector<1x8x128xf32> to vector<8x128xf32>
    %759 = arith.truncf %722 : vector<8x32xf32> to vector<8x32xbf16>
    %cst_133 = arith.constant dense<0.000000e+00> : vector<8x128xf32>
    %760 = tpu.matmul %759, %16, %cst_133 {dimension_numbers = #tpu.dot_dimension_numbers<[1], [0], [0], [1], [0, 0, 1, 1], [], []>} : vector<8x32xbf16>, vector<32x128xbf16>, vector<8x128xf32> -> vector<8x128xf32>
    %761 = arith.addf %758, %760 : vector<8x128xf32>
    %762 = arith.negf %761 : vector<8x128xf32>
    %763 = math.exp %762 : vector<8x128xf32>
    %cst_134 = arith.constant 1.000000e+00 : f32
    %764 = vector.broadcast %cst_134 : f32 to vector<8x128xf32>
    %765 = arith.addf %764, %763 : vector<8x128xf32>
    %766 = arith.divf %764, %765 : vector<8x128xf32>
    %767 = math.tanh %761 : vector<8x128xf32>
    %768 = vector.extract_strided_slice %766 {offsets = [0, 0], sizes = [8, 32], strides = [1, 1]} : vector<8x128xf32> to vector<8x32xf32>
    %769 = vector.extract_strided_slice %766 {offsets = [0, 32], sizes = [8, 32], strides = [1, 1]} : vector<8x128xf32> to vector<8x32xf32>
    %770 = vector.extract_strided_slice %767 {offsets = [0, 64], sizes = [8, 32], strides = [1, 1]} : vector<8x128xf32> to vector<8x32xf32>
    %771 = vector.extract_strided_slice %766 {offsets = [0, 96], sizes = [8, 32], strides = [1, 1]} : vector<8x128xf32> to vector<8x32xf32>
    %772 = arith.mulf %769, %725 : vector<8x32xf32>
    %773 = arith.mulf %768, %770 : vector<8x32xf32>
    %774 = arith.addf %772, %773 : vector<8x32xf32>
    %775 = math.tanh %774 : vector<8x32xf32>
    %776 = arith.mulf %771, %775 : vector<8x32xf32>
    %777 = vector.broadcast %755 : i32 to vector<8x1xi32>
    %778 = arith.cmpi slt, %777, %0 : vector<8x1xi32>
    %779 = vector.shape_cast %778 : vector<8x1xi1> to vector<8x1xi1>
    %780 = vector.broadcast %779 : vector<8x1xi1> to vector<8x32xi1>
    %781 = arith.select %780, %776, %722 : vector<8x32xi1>, vector<8x32xf32>
    %782 = vector.shape_cast %778 : vector<8x1xi1> to vector<8x1xi1>
    %783 = vector.broadcast %782 : vector<8x1xi1> to vector<8x32xi1>
    %784 = arith.select %783, %774, %725 : vector<8x32xi1>, vector<8x32xf32>
    %c13_i32 = arith.constant 13 : i32
    %785 = arith.index_cast %c13_i32 : i32 to index
    %c0_135 = arith.constant 0 : index
    %c0_136 = arith.constant 0 : index
    %786 = vector.load %arg17[%785, %c0_135, %c0_136] : memref<16x8x128xf32, #tpu.memory_space<vmem>>, vector<1x8x128xf32>
    %787 = vector.shape_cast %786 : vector<1x8x128xf32> to vector<8x128xf32>
    %788 = arith.truncf %751 : vector<8x32xf32> to vector<8x32xbf16>
    %cst_137 = arith.constant dense<0.000000e+00> : vector<8x128xf32>
    %789 = tpu.matmul %788, %15, %cst_137 {dimension_numbers = #tpu.dot_dimension_numbers<[1], [0], [0], [1], [0, 0, 1, 1], [], []>} : vector<8x32xbf16>, vector<32x128xbf16>, vector<8x128xf32> -> vector<8x128xf32>
    %790 = arith.addf %787, %789 : vector<8x128xf32>
    %791 = arith.negf %790 : vector<8x128xf32>
    %792 = math.exp %791 : vector<8x128xf32>
    %cst_138 = arith.constant 1.000000e+00 : f32
    %793 = vector.broadcast %cst_138 : f32 to vector<8x128xf32>
    %794 = arith.addf %793, %792 : vector<8x128xf32>
    %795 = arith.divf %793, %794 : vector<8x128xf32>
    %796 = math.tanh %790 : vector<8x128xf32>
    %797 = vector.extract_strided_slice %795 {offsets = [0, 0], sizes = [8, 32], strides = [1, 1]} : vector<8x128xf32> to vector<8x32xf32>
    %798 = vector.extract_strided_slice %795 {offsets = [0, 32], sizes = [8, 32], strides = [1, 1]} : vector<8x128xf32> to vector<8x32xf32>
    %799 = vector.extract_strided_slice %796 {offsets = [0, 64], sizes = [8, 32], strides = [1, 1]} : vector<8x128xf32> to vector<8x32xf32>
    %800 = vector.extract_strided_slice %795 {offsets = [0, 96], sizes = [8, 32], strides = [1, 1]} : vector<8x128xf32> to vector<8x32xf32>
    %801 = arith.mulf %798, %754 : vector<8x32xf32>
    %802 = arith.mulf %797, %799 : vector<8x32xf32>
    %803 = arith.addf %801, %802 : vector<8x32xf32>
    %804 = math.tanh %803 : vector<8x32xf32>
    %805 = arith.mulf %800, %804 : vector<8x32xf32>
    %806 = vector.broadcast %c13_i32 : i32 to vector<8x1xi32>
    %807 = arith.cmpi slt, %806, %0 : vector<8x1xi32>
    %808 = vector.shape_cast %807 : vector<8x1xi1> to vector<8x1xi1>
    %809 = vector.broadcast %808 : vector<8x1xi1> to vector<8x32xi1>
    %810 = arith.select %809, %805, %751 : vector<8x32xi1>, vector<8x32xf32>
    %811 = vector.shape_cast %807 : vector<8x1xi1> to vector<8x1xi1>
    %812 = vector.broadcast %811 : vector<8x1xi1> to vector<8x32xi1>
    %813 = arith.select %812, %803, %754 : vector<8x32xi1>, vector<8x32xf32>
    %c15_i32_139 = arith.constant 15 : i32
    %814 = arith.subi %c15_i32_139, %c13_i32 : i32
    %815 = arith.index_cast %814 : i32 to index
    %c0_140 = arith.constant 0 : index
    %c0_141 = arith.constant 0 : index
    %816 = vector.load %arg18[%815, %c0_140, %c0_141] : memref<16x8x128xf32, #tpu.memory_space<vmem>>, vector<1x8x128xf32>
    %817 = vector.shape_cast %816 : vector<1x8x128xf32> to vector<8x128xf32>
    %818 = arith.truncf %781 : vector<8x32xf32> to vector<8x32xbf16>
    %cst_142 = arith.constant dense<0.000000e+00> : vector<8x128xf32>
    %819 = tpu.matmul %818, %16, %cst_142 {dimension_numbers = #tpu.dot_dimension_numbers<[1], [0], [0], [1], [0, 0, 1, 1], [], []>} : vector<8x32xbf16>, vector<32x128xbf16>, vector<8x128xf32> -> vector<8x128xf32>
    %820 = arith.addf %817, %819 : vector<8x128xf32>
    %821 = arith.negf %820 : vector<8x128xf32>
    %822 = math.exp %821 : vector<8x128xf32>
    %cst_143 = arith.constant 1.000000e+00 : f32
    %823 = vector.broadcast %cst_143 : f32 to vector<8x128xf32>
    %824 = arith.addf %823, %822 : vector<8x128xf32>
    %825 = arith.divf %823, %824 : vector<8x128xf32>
    %826 = math.tanh %820 : vector<8x128xf32>
    %827 = vector.extract_strided_slice %825 {offsets = [0, 0], sizes = [8, 32], strides = [1, 1]} : vector<8x128xf32> to vector<8x32xf32>
    %828 = vector.extract_strided_slice %825 {offsets = [0, 32], sizes = [8, 32], strides = [1, 1]} : vector<8x128xf32> to vector<8x32xf32>
    %829 = vector.extract_strided_slice %826 {offsets = [0, 64], sizes = [8, 32], strides = [1, 1]} : vector<8x128xf32> to vector<8x32xf32>
    %830 = vector.extract_strided_slice %825 {offsets = [0, 96], sizes = [8, 32], strides = [1, 1]} : vector<8x128xf32> to vector<8x32xf32>
    %831 = arith.mulf %828, %784 : vector<8x32xf32>
    %832 = arith.mulf %827, %829 : vector<8x32xf32>
    %833 = arith.addf %831, %832 : vector<8x32xf32>
    %834 = math.tanh %833 : vector<8x32xf32>
    %835 = arith.mulf %830, %834 : vector<8x32xf32>
    %836 = vector.broadcast %814 : i32 to vector<8x1xi32>
    %837 = arith.cmpi slt, %836, %0 : vector<8x1xi32>
    %838 = vector.shape_cast %837 : vector<8x1xi1> to vector<8x1xi1>
    %839 = vector.broadcast %838 : vector<8x1xi1> to vector<8x32xi1>
    %840 = arith.select %839, %835, %781 : vector<8x32xi1>, vector<8x32xf32>
    %841 = vector.shape_cast %837 : vector<8x1xi1> to vector<8x1xi1>
    %842 = vector.broadcast %841 : vector<8x1xi1> to vector<8x32xi1>
    %843 = arith.select %842, %833, %784 : vector<8x32xi1>, vector<8x32xf32>
    %c14_i32 = arith.constant 14 : i32
    %844 = arith.index_cast %c14_i32 : i32 to index
    %c0_144 = arith.constant 0 : index
    %c0_145 = arith.constant 0 : index
    %845 = vector.load %arg17[%844, %c0_144, %c0_145] : memref<16x8x128xf32, #tpu.memory_space<vmem>>, vector<1x8x128xf32>
    %846 = vector.shape_cast %845 : vector<1x8x128xf32> to vector<8x128xf32>
    %847 = arith.truncf %810 : vector<8x32xf32> to vector<8x32xbf16>
    %cst_146 = arith.constant dense<0.000000e+00> : vector<8x128xf32>
    %848 = tpu.matmul %847, %15, %cst_146 {dimension_numbers = #tpu.dot_dimension_numbers<[1], [0], [0], [1], [0, 0, 1, 1], [], []>} : vector<8x32xbf16>, vector<32x128xbf16>, vector<8x128xf32> -> vector<8x128xf32>
    %849 = arith.addf %846, %848 : vector<8x128xf32>
    %850 = arith.negf %849 : vector<8x128xf32>
    %851 = math.exp %850 : vector<8x128xf32>
    %cst_147 = arith.constant 1.000000e+00 : f32
    %852 = vector.broadcast %cst_147 : f32 to vector<8x128xf32>
    %853 = arith.addf %852, %851 : vector<8x128xf32>
    %854 = arith.divf %852, %853 : vector<8x128xf32>
    %855 = math.tanh %849 : vector<8x128xf32>
    %856 = vector.extract_strided_slice %854 {offsets = [0, 0], sizes = [8, 32], strides = [1, 1]} : vector<8x128xf32> to vector<8x32xf32>
    %857 = vector.extract_strided_slice %854 {offsets = [0, 32], sizes = [8, 32], strides = [1, 1]} : vector<8x128xf32> to vector<8x32xf32>
    %858 = vector.extract_strided_slice %855 {offsets = [0, 64], sizes = [8, 32], strides = [1, 1]} : vector<8x128xf32> to vector<8x32xf32>
    %859 = vector.extract_strided_slice %854 {offsets = [0, 96], sizes = [8, 32], strides = [1, 1]} : vector<8x128xf32> to vector<8x32xf32>
    %860 = arith.mulf %857, %813 : vector<8x32xf32>
    %861 = arith.mulf %856, %858 : vector<8x32xf32>
    %862 = arith.addf %860, %861 : vector<8x32xf32>
    %863 = math.tanh %862 : vector<8x32xf32>
    %864 = arith.mulf %859, %863 : vector<8x32xf32>
    %865 = vector.broadcast %c14_i32 : i32 to vector<8x1xi32>
    %866 = arith.cmpi slt, %865, %0 : vector<8x1xi32>
    %867 = vector.shape_cast %866 : vector<8x1xi1> to vector<8x1xi1>
    %868 = vector.broadcast %867 : vector<8x1xi1> to vector<8x32xi1>
    %869 = arith.select %868, %864, %810 : vector<8x32xi1>, vector<8x32xf32>
    %870 = vector.shape_cast %866 : vector<8x1xi1> to vector<8x1xi1>
    %871 = vector.broadcast %870 : vector<8x1xi1> to vector<8x32xi1>
    %872 = arith.select %871, %862, %813 : vector<8x32xi1>, vector<8x32xf32>
    %c15_i32_148 = arith.constant 15 : i32
    %873 = arith.subi %c15_i32_148, %c14_i32 : i32
    %874 = arith.index_cast %873 : i32 to index
    %c0_149 = arith.constant 0 : index
    %c0_150 = arith.constant 0 : index
    %875 = vector.load %arg18[%874, %c0_149, %c0_150] : memref<16x8x128xf32, #tpu.memory_space<vmem>>, vector<1x8x128xf32>
    %876 = vector.shape_cast %875 : vector<1x8x128xf32> to vector<8x128xf32>
    %877 = arith.truncf %840 : vector<8x32xf32> to vector<8x32xbf16>
    %cst_151 = arith.constant dense<0.000000e+00> : vector<8x128xf32>
    %878 = tpu.matmul %877, %16, %cst_151 {dimension_numbers = #tpu.dot_dimension_numbers<[1], [0], [0], [1], [0, 0, 1, 1], [], []>} : vector<8x32xbf16>, vector<32x128xbf16>, vector<8x128xf32> -> vector<8x128xf32>
    %879 = arith.addf %876, %878 : vector<8x128xf32>
    %880 = arith.negf %879 : vector<8x128xf32>
    %881 = math.exp %880 : vector<8x128xf32>
    %cst_152 = arith.constant 1.000000e+00 : f32
    %882 = vector.broadcast %cst_152 : f32 to vector<8x128xf32>
    %883 = arith.addf %882, %881 : vector<8x128xf32>
    %884 = arith.divf %882, %883 : vector<8x128xf32>
    %885 = math.tanh %879 : vector<8x128xf32>
    %886 = vector.extract_strided_slice %884 {offsets = [0, 0], sizes = [8, 32], strides = [1, 1]} : vector<8x128xf32> to vector<8x32xf32>
    %887 = vector.extract_strided_slice %884 {offsets = [0, 32], sizes = [8, 32], strides = [1, 1]} : vector<8x128xf32> to vector<8x32xf32>
    %888 = vector.extract_strided_slice %885 {offsets = [0, 64], sizes = [8, 32], strides = [1, 1]} : vector<8x128xf32> to vector<8x32xf32>
    %889 = vector.extract_strided_slice %884 {offsets = [0, 96], sizes = [8, 32], strides = [1, 1]} : vector<8x128xf32> to vector<8x32xf32>
    %890 = arith.mulf %887, %843 : vector<8x32xf32>
    %891 = arith.mulf %886, %888 : vector<8x32xf32>
    %892 = arith.addf %890, %891 : vector<8x32xf32>
    %893 = math.tanh %892 : vector<8x32xf32>
    %894 = arith.mulf %889, %893 : vector<8x32xf32>
    %895 = vector.broadcast %873 : i32 to vector<8x1xi32>
    %896 = arith.cmpi slt, %895, %0 : vector<8x1xi32>
    %897 = vector.shape_cast %896 : vector<8x1xi1> to vector<8x1xi1>
    %898 = vector.broadcast %897 : vector<8x1xi1> to vector<8x32xi1>
    %899 = arith.select %898, %894, %840 : vector<8x32xi1>, vector<8x32xf32>
    %900 = vector.shape_cast %896 : vector<8x1xi1> to vector<8x1xi1>
    %901 = vector.broadcast %900 : vector<8x1xi1> to vector<8x32xi1>
    %902 = arith.select %901, %892, %843 : vector<8x32xi1>, vector<8x32xf32>
    %c15_i32_153 = arith.constant 15 : i32
    %903 = arith.index_cast %c15_i32_153 : i32 to index
    %c0_154 = arith.constant 0 : index
    %c0_155 = arith.constant 0 : index
    %904 = vector.load %arg17[%903, %c0_154, %c0_155] : memref<16x8x128xf32, #tpu.memory_space<vmem>>, vector<1x8x128xf32>
    %905 = vector.shape_cast %904 : vector<1x8x128xf32> to vector<8x128xf32>
    %906 = arith.truncf %869 : vector<8x32xf32> to vector<8x32xbf16>
    %cst_156 = arith.constant dense<0.000000e+00> : vector<8x128xf32>
    %907 = tpu.matmul %906, %15, %cst_156 {dimension_numbers = #tpu.dot_dimension_numbers<[1], [0], [0], [1], [0, 0, 1, 1], [], []>} : vector<8x32xbf16>, vector<32x128xbf16>, vector<8x128xf32> -> vector<8x128xf32>
    %908 = arith.addf %905, %907 : vector<8x128xf32>
    %909 = arith.negf %908 : vector<8x128xf32>
    %910 = math.exp %909 : vector<8x128xf32>
    %cst_157 = arith.constant 1.000000e+00 : f32
    %911 = vector.broadcast %cst_157 : f32 to vector<8x128xf32>
    %912 = arith.addf %911, %910 : vector<8x128xf32>
    %913 = arith.divf %911, %912 : vector<8x128xf32>
    %914 = math.tanh %908 : vector<8x128xf32>
    %915 = vector.extract_strided_slice %913 {offsets = [0, 0], sizes = [8, 32], strides = [1, 1]} : vector<8x128xf32> to vector<8x32xf32>
    %916 = vector.extract_strided_slice %913 {offsets = [0, 32], sizes = [8, 32], strides = [1, 1]} : vector<8x128xf32> to vector<8x32xf32>
    %917 = vector.extract_strided_slice %914 {offsets = [0, 64], sizes = [8, 32], strides = [1, 1]} : vector<8x128xf32> to vector<8x32xf32>
    %918 = vector.extract_strided_slice %913 {offsets = [0, 96], sizes = [8, 32], strides = [1, 1]} : vector<8x128xf32> to vector<8x32xf32>
    %919 = arith.mulf %916, %872 : vector<8x32xf32>
    %920 = arith.mulf %915, %917 : vector<8x32xf32>
    %921 = arith.addf %919, %920 : vector<8x32xf32>
    %922 = math.tanh %921 : vector<8x32xf32>
    %923 = arith.mulf %918, %922 : vector<8x32xf32>
    %924 = vector.broadcast %c15_i32_153 : i32 to vector<8x1xi32>
    %925 = arith.cmpi slt, %924, %0 : vector<8x1xi32>
    %926 = vector.shape_cast %925 : vector<8x1xi1> to vector<8x1xi1>
    %927 = vector.broadcast %926 : vector<8x1xi1> to vector<8x32xi1>
    %928 = arith.select %927, %923, %869 : vector<8x32xi1>, vector<8x32xf32>
    %929 = vector.shape_cast %925 : vector<8x1xi1> to vector<8x1xi1>
    %930 = vector.broadcast %929 : vector<8x1xi1> to vector<8x32xi1>
    %931 = arith.select %930, %921, %872 : vector<8x32xi1>, vector<8x32xf32>
    %c15_i32_158 = arith.constant 15 : i32
    %932 = arith.subi %c15_i32_158, %c15_i32_153 : i32
    %933 = arith.index_cast %932 : i32 to index
    %c0_159 = arith.constant 0 : index
    %c0_160 = arith.constant 0 : index
    %934 = vector.load %arg18[%933, %c0_159, %c0_160] : memref<16x8x128xf32, #tpu.memory_space<vmem>>, vector<1x8x128xf32>
    %935 = vector.shape_cast %934 : vector<1x8x128xf32> to vector<8x128xf32>
    %936 = arith.truncf %899 : vector<8x32xf32> to vector<8x32xbf16>
    %cst_161 = arith.constant dense<0.000000e+00> : vector<8x128xf32>
    %937 = tpu.matmul %936, %16, %cst_161 {dimension_numbers = #tpu.dot_dimension_numbers<[1], [0], [0], [1], [0, 0, 1, 1], [], []>} : vector<8x32xbf16>, vector<32x128xbf16>, vector<8x128xf32> -> vector<8x128xf32>
    %938 = arith.addf %935, %937 : vector<8x128xf32>
    %939 = arith.negf %938 : vector<8x128xf32>
    %940 = math.exp %939 : vector<8x128xf32>
    %cst_162 = arith.constant 1.000000e+00 : f32
    %941 = vector.broadcast %cst_162 : f32 to vector<8x128xf32>
    %942 = arith.addf %941, %940 : vector<8x128xf32>
    %943 = arith.divf %941, %942 : vector<8x128xf32>
    %944 = math.tanh %938 : vector<8x128xf32>
    %945 = vector.extract_strided_slice %943 {offsets = [0, 0], sizes = [8, 32], strides = [1, 1]} : vector<8x128xf32> to vector<8x32xf32>
    %946 = vector.extract_strided_slice %943 {offsets = [0, 32], sizes = [8, 32], strides = [1, 1]} : vector<8x128xf32> to vector<8x32xf32>
    %947 = vector.extract_strided_slice %944 {offsets = [0, 64], sizes = [8, 32], strides = [1, 1]} : vector<8x128xf32> to vector<8x32xf32>
    %948 = vector.extract_strided_slice %943 {offsets = [0, 96], sizes = [8, 32], strides = [1, 1]} : vector<8x128xf32> to vector<8x32xf32>
    %949 = arith.mulf %946, %902 : vector<8x32xf32>
    %950 = arith.mulf %945, %947 : vector<8x32xf32>
    %951 = arith.addf %949, %950 : vector<8x32xf32>
    %952 = math.tanh %951 : vector<8x32xf32>
    %953 = arith.mulf %948, %952 : vector<8x32xf32>
    %954 = vector.broadcast %932 : i32 to vector<8x1xi32>
    %955 = arith.cmpi slt, %954, %0 : vector<8x1xi32>
    %956 = vector.shape_cast %955 : vector<8x1xi1> to vector<8x1xi1>
    %957 = vector.broadcast %956 : vector<8x1xi1> to vector<8x32xi1>
    %958 = arith.select %957, %953, %899 : vector<8x32xi1>, vector<8x32xf32>
    %959 = vector.shape_cast %955 : vector<8x1xi1> to vector<8x1xi1>
    %960 = vector.broadcast %959 : vector<8x1xi1> to vector<8x32xi1>
    %961 = arith.select %960, %951, %902 : vector<8x32xi1>, vector<8x32xf32>
    %c16_i32 = arith.constant 16 : i32
    %c0_163 = arith.constant 0 : index
    %c0_164 = arith.constant 0 : index
    %962 = vector.load %arg7[%c0_163, %c0_164] : memref<32x128xf32, #tpu.memory_space<vmem>>, vector<32x128xf32>
    %cst_165 = arith.constant dense<0.000000e+00> : vector<8x128xf32>
    %963 = tpu.matmul %928, %962, %cst_165 {dimension_numbers = #tpu.dot_dimension_numbers<[1], [0], [0], [1], [0, 0, 1, 1], [], []>} : vector<8x32xf32>, vector<32x128xf32>, vector<8x128xf32> -> vector<8x128xf32>
    %c0_166 = arith.constant 0 : index
    %c0_167 = arith.constant 0 : index
    %964 = vector.load %arg8[%c0_166, %c0_167] : memref<32x128xf32, #tpu.memory_space<vmem>>, vector<32x128xf32>
    %cst_168 = arith.constant dense<0.000000e+00> : vector<8x128xf32>
    %965 = tpu.matmul %958, %964, %cst_168 {dimension_numbers = #tpu.dot_dimension_numbers<[1], [0], [0], [1], [0, 0, 1, 1], [], []>} : vector<8x32xf32>, vector<32x128xf32>, vector<8x128xf32> -> vector<8x128xf32>
    %966 = arith.addf %963, %965 : vector<8x128xf32>
    %c0_169 = arith.constant 0 : index
    %c0_170 = arith.constant 0 : index
    %967 = vector.load %arg9[%c0_169, %c0_170] : memref<1x128xf32, #tpu.memory_space<vmem>>, vector<1x128xf32>
    %968 = vector.broadcast %967 : vector<1x128xf32> to vector<8x128xf32>
    %969 = arith.addf %966, %968 : vector<8x128xf32>
    %c0_171 = arith.constant 0 : index
    %c0_172 = arith.constant 0 : index
    %970 = vector.load %arg15[%c0_171, %c0_172] : memref<8x128xf32, #tpu.memory_space<vmem>>, vector<8x128xf32>
    tpu.vector_store %arg15[%c0_171, %c0_172], %969 {strides = array<i32>} : memref<8x128xf32, #tpu.memory_space<vmem>>, vector<8x128xf32>,
    %c0_173 = arith.constant 0 : index
    %c0_174 = arith.constant 0 : index
    %971 = vector.load %arg10[%c0_173, %c0_174] : memref<32x128xf32, #tpu.memory_space<vmem>>, vector<32x128xf32>
    %cst_175 = arith.constant dense<0.000000e+00> : vector<8x128xf32>
    %972 = tpu.matmul %928, %971, %cst_175 {dimension_numbers = #tpu.dot_dimension_numbers<[1], [0], [0], [1], [0, 0, 1, 1], [], []>} : vector<8x32xf32>, vector<32x128xf32>, vector<8x128xf32> -> vector<8x128xf32>
    %c0_176 = arith.constant 0 : index
    %c0_177 = arith.constant 0 : index
    %973 = vector.load %arg11[%c0_176, %c0_177] : memref<32x128xf32, #tpu.memory_space<vmem>>, vector<32x128xf32>
    %cst_178 = arith.constant dense<0.000000e+00> : vector<8x128xf32>
    %974 = tpu.matmul %958, %973, %cst_178 {dimension_numbers = #tpu.dot_dimension_numbers<[1], [0], [0], [1], [0, 0, 1, 1], [], []>} : vector<8x32xf32>, vector<32x128xf32>, vector<8x128xf32> -> vector<8x128xf32>
    %975 = arith.addf %972, %974 : vector<8x128xf32>
    %c0_179 = arith.constant 0 : index
    %c0_180 = arith.constant 0 : index
    %976 = vector.load %arg12[%c0_179, %c0_180] : memref<1x128xf32, #tpu.memory_space<vmem>>, vector<1x128xf32>
    %977 = vector.broadcast %976 : vector<1x128xf32> to vector<8x128xf32>
    %978 = arith.addf %975, %977 : vector<8x128xf32>
    %cst_181 = arith.constant 0.000000e+00 : f32
    %979 = vector.broadcast %cst_181 : f32 to vector<8x128xf32>
    %980 = arith.maximumf %978, %979 : vector<8x128xf32>
    %c0_182 = arith.constant 0 : index
    %c0_183 = arith.constant 0 : index
    %981 = vector.load %arg13[%c0_182, %c0_183] : memref<128x128xf32, #tpu.memory_space<vmem>>, vector<128x128xf32>
    %cst_184 = arith.constant dense<0.000000e+00> : vector<8x128xf32>
    %982 = tpu.matmul %980, %981, %cst_184 {dimension_numbers = #tpu.dot_dimension_numbers<[1], [0], [0], [1], [0, 0, 1, 1], [], []>} : vector<8x128xf32>, vector<128x128xf32>, vector<8x128xf32> -> vector<8x128xf32>
    %c0_185 = arith.constant 0 : index
    %c0_186 = arith.constant 0 : index
    %983 = vector.load %arg14[%c0_185, %c0_186] : memref<1x128xf32, #tpu.memory_space<vmem>>, vector<1x128xf32>
    %984 = vector.broadcast %983 : vector<1x128xf32> to vector<8x128xf32>
    %985 = arith.addf %982, %984 : vector<8x128xf32>
    %986 = arith.negf %985 : vector<8x128xf32>
    %987 = math.exp %986 : vector<8x128xf32>
    %cst_187 = arith.constant 1.000000e+00 : f32
    %988 = vector.broadcast %cst_187 : f32 to vector<8x128xf32>
    %989 = arith.addf %988, %987 : vector<8x128xf32>
    %990 = arith.divf %988, %989 : vector<8x128xf32>
    %c0_188 = arith.constant 0 : index
    %c0_189 = arith.constant 0 : index
    %991 = vector.load %arg16[%c0_188, %c0_189] : memref<8x128xf32, #tpu.memory_space<vmem>>, vector<8x128xf32>
    tpu.vector_store %arg16[%c0_188, %c0_189], %990 {strides = array<i32>} : memref<8x128xf32, #tpu.memory_space<vmem>>, vector<8x128xf32>,
    return
  }
  func.func @transform_0(%arg0: i32) -> (i32, i32, i32) {
    %c0_i32 = arith.constant 0 : i32
    %c0_i32_0 = arith.constant 0 : i32
    %c0_i32_1 = arith.constant 0 : i32
    return %c0_i32, %arg0, %c0_i32_0 : i32, i32, i32
  }
  func.func @transform_1(%arg0: i32) -> (i32, i32) {
    %c0_i32 = arith.constant 0 : i32
    %c0_i32_0 = arith.constant 0 : i32
    return %arg0, %c0_i32 : i32, i32
  }
  func.func @transform_2(%arg0: i32) -> (i32, i32) {
    %c0_i32 = arith.constant 0 : i32
    %c0_i32_0 = arith.constant 0 : i32
    %c0_i32_1 = arith.constant 0 : i32
    return %c0_i32, %c0_i32_0 : i32, i32
  }
  func.func @transform_3(%arg0: i32) -> (i32, i32) {
    %c0_i32 = arith.constant 0 : i32
    %c0_i32_0 = arith.constant 0 : i32
    %c0_i32_1 = arith.constant 0 : i32
    return %c0_i32, %c0_i32_0 : i32, i32
  }
  func.func @transform_4(%arg0: i32) -> (i32, i32) {
    %c0_i32 = arith.constant 0 : i32
    %c0_i32_0 = arith.constant 0 : i32
    %c0_i32_1 = arith.constant 0 : i32
    return %c0_i32, %c0_i32_0 : i32, i32
  }
  func.func @transform_5(%arg0: i32) -> (i32, i32) {
    %c0_i32 = arith.constant 0 : i32
    %c0_i32_0 = arith.constant 0 : i32
    %c0_i32_1 = arith.constant 0 : i32
    return %c0_i32, %c0_i32_0 : i32, i32
  }
  func.func @transform_6(%arg0: i32) -> (i32, i32) {
    %c0_i32 = arith.constant 0 : i32
    %c0_i32_0 = arith.constant 0 : i32
    %c0_i32_1 = arith.constant 0 : i32
    return %c0_i32, %c0_i32_0 : i32, i32
  }
  func.func @transform_7(%arg0: i32) -> (i32, i32) {
    %c0_i32 = arith.constant 0 : i32
    %c0_i32_0 = arith.constant 0 : i32
    %c0_i32_1 = arith.constant 0 : i32
    return %c0_i32, %c0_i32_0 : i32, i32
  }
  func.func @transform_8(%arg0: i32) -> (i32, i32) {
    %c0_i32 = arith.constant 0 : i32
    %c0_i32_0 = arith.constant 0 : i32
    %c0_i32_1 = arith.constant 0 : i32
    return %c0_i32, %c0_i32_0 : i32, i32
  }
  func.func @transform_9(%arg0: i32) -> (i32, i32) {
    %c0_i32 = arith.constant 0 : i32
    %c0_i32_0 = arith.constant 0 : i32
    %c0_i32_1 = arith.constant 0 : i32
    return %c0_i32, %c0_i32_0 : i32, i32
  }
  func.func @transform_10(%arg0: i32) -> (i32, i32) {
    %c0_i32 = arith.constant 0 : i32
    %c0_i32_0 = arith.constant 0 : i32
    %c0_i32_1 = arith.constant 0 : i32
    return %c0_i32, %c0_i32_0 : i32, i32
  }
  func.func @transform_11(%arg0: i32) -> (i32, i32) {
    %c0_i32 = arith.constant 0 : i32
    %c0_i32_0 = arith.constant 0 : i32
    %c0_i32_1 = arith.constant 0 : i32
    return %c0_i32, %c0_i32_0 : i32, i32
  }
  func.func @transform_12(%arg0: i32) -> (i32, i32) {
    %c0_i32 = arith.constant 0 : i32
    %c0_i32_0 = arith.constant 0 : i32
    %c0_i32_1 = arith.constant 0 : i32
    return %c0_i32, %c0_i32_0 : i32, i32
  }
  func.func @transform_13(%arg0: i32) -> (i32, i32) {
    %c0_i32 = arith.constant 0 : i32
    %c0_i32_0 = arith.constant 0 : i32
    %c0_i32_1 = arith.constant 0 : i32
    return %c0_i32, %c0_i32_0 : i32, i32
  }
  func.func @transform_14(%arg0: i32) -> (i32, i32) {
    %c0_i32 = arith.constant 0 : i32
    %c0_i32_0 = arith.constant 0 : i32
    return %arg0, %c0_i32 : i32, i32
  }
  func.func @transform_15(%arg0: i32) -> (i32, i32) {
    %c0_i32 = arith.constant 0 : i32
    %c0_i32_0 = arith.constant 0 : i32
    return %arg0, %c0_i32 : i32, i32
  }
}

</mosaic_0001>

<bundles_post_ra>
// kernel: bilstm_with_risk.1
= control target key start
LH: loop header
LB: loop body
LE: loop exit
PB: predicated region body
PF: predicated region fallthrough
CT: control target
= control target key end

     0   :  { %s4940_s18 = smov 0   ;;  %s4942_s19 = smov 0   ;;  %s6367_s0 = inlined_call_operand.vmem [shape: f32[16,16,64], index: 0, kind: input, shape index: {}]   ;;  %s6368_s1 = inlined_call_operand.vmem [shape: s32[16,1], index: 1, kind: input, shape index: {}]   ;;  %s6369_s2 = inlined_call_operand.vmem [shape: bf16[64,256], index: 2, kind: input, shape index: {}]   ;;  %s6370_s3 = inlined_call_operand.vmem [shape: f32[1,256], index: 3, kind: input, shape index: {}]   ;;  %s6371_s4 = inlined_call_operand.vmem [shape: bf16[32,128], index: 4, kind: input, shape index: {}]   ;;  %s6372_s5 = inlined_call_operand.vmem [shape: bf16[32,128], index: 5, kind: input, shape index: {}]   ;;  %s6373_s6 = inlined_call_operand.vmem [shape: f32[32,128], index: 6, kind: input, shape index: {}]   ;;  %s6374_s7 = inlined_call_operand.vmem [shape: f32[32,128], index: 7, kind: input, shape index: {}]   ;;  %s6375_s8 = inlined_call_operand.vmem [shape: f32[1,128], index: 8, kind: input, shape index: {}]   ;;  %s6376_s9 = inlined_call_operand.vmem [shape: f32[32,128], index: 9, kind: input, shape index: {}]   ;;  %s6377_s10 = inlined_call_operand.vmem [shape: f32[32,128], index: 10, kind: input, shape index: {}]   ;;  %s6378_s11 = inlined_call_operand.vmem [shape: f32[1,128], index: 11, kind: input, shape index: {}]   ;;  %s6379_s12 = inlined_call_operand.vmem [shape: f32[128,128], index: 12, kind: input, shape index: {}]   ;;  %s6380_s13 = inlined_call_operand.vmem [shape: f32[1,128], index: 13, kind: input, shape index: {}]   ;;  %s6381_s14 = inlined_call_operand.vmem [shape: f32[16,128], index: 14, kind: output, shape index: {0}]   ;;  %s6382_s15 = inlined_call_operand.vmem [shape: f32[16,128], index: 15, kind: output, shape index: {1}]  }
   0x1   :  { %s4944_s20 = smov 0  }
   0x2 LB: > { %s3944_s21 = sadd.s32 4294967295, %s4853_s20   ;;  %s4957_s22 = sadd.s32 1, %s4853_s20   ;;  %s4853_s20 = sphi %s4944_s20, %s6389_s20   ;;  %s4849_s19 = sphi %s4942_s19, %s6388_s19   ;;  %s4845_s18 = sphi %s4940_s18, %s6387_s18  }
   0x3   : > { %s30_s23 = ssub.s32 %s4853_s20, %s4957_s22  ;;  %s33_s24 = sadd.s32 1, %s4849_s19 }
   0x4   : > { %p31_p0 = scmp.eq.s32.totalorder %s30_s23, 0  ;;  %p40_p1 = scmp.ne.s32.totalorder %s4849_s19, %s4845_s18 }
   0x5   : > { %p41_p2 = scmp.eq.s32.totalorder %s4853_s20, 0  ;;  %p3947_p4 = scmp.ge.s32.totalorder %s4853_s20, 2 }
   0x6   : > { %s4966_s25 = scalar_select %p31_p0, %s4849_s19, %s33_s24  }
   0x7   : > { %p42_p3 = por %p41_p2, %p40_p1  ;;  %432 = sbr.rel (%p3947_p4) target bundleno = 24 (0x18), region = 64 }
   0xc   : > { %435 = sbr.rel (!%p42_p3) target bundleno = 24 (0x18), region = 68  ;;  %s437_s26 = sand.u32 (%p42_p3), 1, %s4849_s19  }
   0xd   : > { %s3949_s27 = sshll.u32 (%p42_p3), %s4853_s20, 3  ;;  %s3948_s28 = sshll.u32 (%p42_p3), %s437_s26, 7 }
   0xe   : > { %s4974_s16 = scalar_lea.vmem (%p42_p3), %s6367_s0, %s3949_s27  ;;  %s439_s17 = scalar_lea.vmem (%p42_p3), [#allocation4], %s3948_s28 }
   0xf   : > { %v500_v0 = vld [vmem:[%s4974_s16] sm:$0xff] (%p42_p3)  ;;  %v502_v1 = vld [vmem:[%s4974_s16 + $0x10] sm:$0xff] (%p42_p3) }
  0x10   : > { %v504_v2 = vld [vmem:[%s4974_s16 + $0x20] sm:$0xff] (%p42_p3)  ;;  %501 = vst [vmem:[%s439_s17] sm:$0xff] (%p42_p3), %v500_v0  ;;  %503 = vst [vmem:[%s439_s17 + $0x8] sm:$0xff] (%p42_p3), %v502_v1  ;;  %v506_v3 = vld [vmem:[%s4974_s16 + $0x30] sm:$0xff] (%p42_p3) }
  0x11   : > { %505 = vst [vmem:[%s439_s17 + $0x10] sm:$0xff] %v504_v2  ;;  %v508_v4 = vld [vmem:[%s4974_s16 + $0x40] sm:$0xff]  ;;  %v510_v5 = vld [vmem:[%s4974_s16 + $0x50] sm:$0xff]  ;;  %507 = vst [vmem:[%s439_s17 + $0x18] sm:$0xff] %v506_v3 }
  0x12   : > { %509 = vst [vmem:[%s439_s17 + $0x20] sm:$0xff] %v508_v4  ;;  %511 = vst [vmem:[%s439_s17 + $0x28] sm:$0xff] %v510_v5  ;;  %v512_v6 = vld [vmem:[%s4974_s16 + $0x60] sm:$0xff]  ;;  %v514_v7 = vld [vmem:[%s4974_s16 + $0x70] sm:$0xff] }
  0x13   : > { %v516_v8 = vld [vmem:[%s4974_s16 + $0x80] sm:$0xff]  ;;  %513 = vst [vmem:[%s439_s17 + $0x30] sm:$0xff] %v512_v6  ;;  %515 = vst [vmem:[%s439_s17 + $0x38] sm:$0xff] %v514_v7  ;;  %v518_v9 = vld [vmem:[%s4974_s16 + $0x90] sm:$0xff] }
  0x14   : > { %517 = vst [vmem:[%s439_s17 + $0x40] sm:$0xff] %v516_v8  ;;  %v520_v10 = vld [vmem:[%s4974_s16 + $0xa0] sm:$0xff]  ;;  %v522_v11 = vld [vmem:[%s4974_s16 + $0xb0] sm:$0xff]  ;;  %519 = vst [vmem:[%s439_s17 + $0x48] sm:$0xff] %v518_v9 }
  0x15   : > { %521 = vst [vmem:[%s439_s17 + $0x50] sm:$0xff] %v520_v10  ;;  %523 = vst [vmem:[%s439_s17 + $0x58] sm:$0xff] %v522_v11  ;;  %v524_v12 = vld [vmem:[%s4974_s16 + $0xc0] sm:$0xff]  ;;  %v526_v13 = vld [vmem:[%s4974_s16 + $0xd0] sm:$0xff] }
  0x16   : > { %v528_v14 = vld [vmem:[%s4974_s16 + $0xe0] sm:$0xff]  ;;  %525 = vst [vmem:[%s439_s17 + $0x60] sm:$0xff] %v524_v12  ;;  %527 = vst [vmem:[%s439_s17 + $0x68] sm:$0xff] %v526_v13  ;;  %v530_v15 = vld [vmem:[%s4974_s16 + $0xf0] sm:$0xff] }
  0x17   : > { %529 = vst [vmem:[%s439_s17 + $0x70] sm:$0xff] %v528_v14  ;;  %531 = vst [vmem:[%s439_s17 + $0x78] sm:$0xff] %v530_v15 }
  0x18 PF: > { %p3950_p5 = scmp.ge.s32.totalorder %s4853_s20, 1  ;;  %p543_p6 = scmp.lt.s32.totalorder %s4853_s20, 3 }
  0x1a   : > { %p544_p7 = pnand %p3950_p5, %p543_p6 }
  0x1b   : > { %s550_s30 = sand.u32 (!%p544_p7), 1, %s4845_s18   ;;  %p604_p8 = scmp.lt.s32.totalorder (!%p544_p7), %s3944_s21, 1 }
  0x1c   : > { %547 = sbr.rel (%p544_p7) target bundleno = 11632 (0x2d70), region = 110  ;;  %s3951_s26 = sshll.u32 (!%p544_p7), %s550_s30, 7 }
  0x1d   : > { %s5025_s30 = scalar_lea.vmem (!%p544_p7), [#allocation4], %s3951_s26  ;;  %s4858_s26 = smov (!%p544_p7), 64  }
  0x1e   : > { %s4859_s20 = smov (!%p544_p7), 32  }
  0x21   : > { %v4546_v16 = vld [vmem:[%s6369_s2 + $0x34] ss:$8 sps:$4 sm:$0xff]   ;;  %v4548_v17 = vld [vmem:[%s6369_s2 + $0x30] ss:$8 sps:$4 sm:$0xff]   ;;  %v4855_v18 = vmov 0   ;;  %v4856_v22 = vmov 0.0   ;;  %v652_v54 = vlaneseq }
  0x22   : > { %759 = vmatprep.mubr.bf16.mxu0 %v4855_v18  ;;  %4544 = vset.pattern.permute.xlu0 %v4855_v18  ;;  %v4549_v19 = vld [vmem:[%s6369_s2 + $0x24] ss:$8 sps:$4 sm:$0xff]   ;;  %v4551_v20 = vld [vmem:[%s6369_s2 + $0x20] ss:$8 sps:$4 sm:$0xff]   ;;  %v4552_v21 = vld [vmem:[%s6369_s2 + $0x14] ss:$8 sps:$4 sm:$0xff]  }
  0x23   : > { %735 = vmatprep.subr.bf16.mxu0 %v4546_v16  ;;  %4545 = vset.pattern.permute.xlu1 %v4855_v18  ;;  %vm4857_vm0 = vmmov 0   ;;  %v4554_v23 = vld [vmem:[%s6369_s2 + $0x10] ss:$8 sps:$4 sm:$0xff]   ;;  %v4555_v24 = vld [vmem:[%s6369_s2 + $0x4] ss:$8 sps:$4 sm:$0xff]   ;;  %vm702_vm1 = vcmask 523264  }
  0x24   : > { %736 = vmatpush1.bf16.msra.mxu0 %v4548_v17  ;;  %4188 = vmatprep.subr.bf16.mxu1 %v4856_v22  ;;  %v4557_v25 = vld [vmem:[%s6369_s2] ss:$8 sps:$4 sm:$0xff]   ;;  %v620_v32 = vld [vmem:[%s5025_s30 + $0x10] sm:$0xff]  ;;  %v621_v33 = vld [vmem:[%s5025_s30 + $0x18] sm:$0xff]  ;;  %v653_v55 = vshrl.u32 %v652_v54, 7  ;;  %s6391_s21 = smov (!%p604_p8, %s3944_s21), 1 }
  0x25   : > { %737 = vmatprep.subr.bf16.mxu0 %v4549_v19  ;;  %4192 = vmatprep.mubr.msk.bf16.mxu1 %vm4857_vm0, %v4856_v22  ;;  %v618_v26 = vld [vmem:[%s5025_s30] sm:$0xff]  ;;  %v619_v27 = vld [vmem:[%s5025_s30 + $0x8] sm:$0xff]  ;;  %v635_v35 = vpack.c.bf16 %v621_v33, %v620_v32  ;;  %v624_v39 = vld [vmem:[%s5025_s30 + $0x30] sm:$0xff]  ;;  %s5212_s23 = sshll.u32 %s6391_s21, 3  ;;  %vm893_vm6 = vcmask 261120  }
  0x26   : > { %v5032_v28 = vld [vmem:[%s6372_s5 + $0x8] sm:$0xff]   ;;  %v634_v29 = vpack.c.bf16 %v619_v27, %v618_v26  ;;  %v5045_v31 = vld [vmem:[%s6372_s5] sm:$0xff]   ;;  %v625_v40 = vld [vmem:[%s5025_s30 + $0x38] sm:$0xff]  ;;  %v658_v56 = vsub.s32 1, %v653_v55  ;;  %v654_v58 = vsub.s32 0, %v653_v55  ;;  %s5218_s27 = scalar_lea.vmem %s6368_s1, %s5212_s23  ;;  %s611_s29 = scalar_lea.vmem %s6381_s14, %s5212_s23 }
  0x27   : > { %v5037_v30 = vld [vmem:[%s6371_s4 + $0x8] sm:$0xff]   ;;  %4189 = vmatpush3.bf16.msra.mxu1 %v5032_v28  ;;  %v5055_v34 = vld [vmem:[%s6371_s4] sm:$0xff]   ;;  %v637_v41 = vpack.c.bf16 %v625_v40, %v624_v39  ;;  %v628_v45 = vld [vmem:[%s5025_s30 + $0x50] sm:$0xff] }
  0x28   : > { %738 = vmatpush1.bf16.msra.mxu0 %v4551_v20  ;;  %4190 = vmatprep.subr.bf16.mxu1 %v4856_v22  ;;  %v622_v36 = vld [vmem:[%s5025_s30 + $0x20] sm:$0xff]  ;;  %v623_v37 = vld [vmem:[%s5025_s30 + $0x28] sm:$0xff]  ;;  %v629_v46 = vld [vmem:[%s5025_s30 + $0x58] sm:$0xff] }
  0x29   : > { %739 = vmatprep.subr.bf16.mxu0 %v4552_v21  ;;  %v636_v38 = vpack.c.bf16 %v623_v37, %v622_v36  ;;  %v626_v42 = vld [vmem:[%s5025_s30 + $0x40] sm:$0xff]  ;;  %v627_v43 = vld [vmem:[%s5025_s30 + $0x48] sm:$0xff]  ;;  %v639_v47 = vpack.c.bf16 %v629_v46, %v628_v45  ;;  %v632_v51 = vld [vmem:[%s5025_s30 + $0x70] sm:$0xff] }
  0x2a   : > { %v638_v44 = vpack.c.bf16 %v627_v43, %v626_v42  ;;  %v630_v48 = vld [vmem:[%s5025_s30 + $0x60] sm:$0xff]  ;;  %v631_v49 = vld [vmem:[%s5025_s30 + $0x68] sm:$0xff]  ;;  %v633_v52 = vld [vmem:[%s5025_s30 + $0x78] sm:$0xff] }
  0x2b   : > { %4191 = vmatpush3.bf16.msra.mxu1 %v5045_v31  ;;  %v640_v50 = vpack.c.bf16 %v631_v49, %v630_v48  ;;  %v641_v53 = vpack.c.bf16 %v633_v52, %v632_v51  ;;  %v650_v57 = vld [vmem:[%s6370_s3] sm:$0x3] }
  0x2c   : > { %740 = vmatpush1.bf16.msra.mxu0 %v4554_v23  ;;  %4196 = vmatprep.subr.bf16.mxu1 %v4856_v22  ;;  %v5106_v59 = vrot.slane %v650_v57, %v658_v56  ;;  %v5110_v62 = vrot.slane %v650_v57, %v654_v58 }
  0x2d   : > { %741 = vmatprep.subr.bf16.mxu0 %v4555_v24 }
  0x2e   : > { %4193 = vmatmul.mubr.bf16.vlgmr.msra.gmra.mxu1 %v4855_v18 }
  0x2f   : > { %4197 = vmatpush3.bf16.msra.mxu1 %v5037_v30  ;;  %4200 = vmatprep.mubr.msk.bf16.mxu1 %vm4857_vm0, %v4856_v22 }
  0x30   : > { %742 = vmatpush1.bf16.msra.mxu0 %v4557_v25  ;;  %4198 = vmatprep.subr.bf16.mxu1 %v4856_v22 }
  0x31   : > { %4180 = vmatprep.subr.bf16.mxu0 %v4856_v22 }
  0x33   : > { %3963 = vmatmul.mubr.msk.bf16.vlgmr.msra.gmra.mxu0 %vm702_vm1, %v634_v29  ;;  %4199 = vmatpush3.bf16.msra.mxu1 %v5055_v34 }
  0x34   : > { %4181 = vmatpush3.bf16.msra.mxu0 %v5037_v30  ;;  %769 = vmatprep.mubr.bf16.mxu0 %v4855_v18 }
  0x35   : > { %4182 = vmatprep.subr.bf16.mxu0 %v4856_v22  ;;  %4204 = vmatprep.subr.bf16.mxu1 %v4856_v22 }
  0x38   : > { %4183 = vmatpush3.bf16.msra.mxu0 %v5055_v34 }
  0x39   : > { %4252 = vmatprep.subr.bf16.mxu0 %v4856_v22 }
  0x3b   : > { %3964 = vmatmul.mubr.msk.bf16.gmra.mxu0 %vm702_vm1, %v635_v35 }
  0x3c   : > { %779 = vmatprep.mubr.bf16.mxu0 %v4855_v18 }
  0x43   : > { %3965 = vmatmul.mubr.msk.bf16.gmra.mxu0 %vm702_vm1, %v636_v38 }
  0x44   : > { %789 = vmatprep.mubr.bf16.mxu0 %v4855_v18 }
  0x4b   : > { %3966 = vmatmul.mubr.msk.bf16.gmra.mxu0 %vm702_vm1, %v637_v41 }
  0x4c   : > { %799 = vmatprep.mubr.bf16.mxu0 %v4855_v18 }
  0x53   : > { %3967 = vmatmul.mubr.msk.bf16.gmra.mxu0 %vm702_vm1, %v638_v44 }
  0x54   : > { %809 = vmatprep.mubr.bf16.mxu0 %v4855_v18 }
  0x5b   : > { %3968 = vmatmul.mubr.msk.bf16.gmra.mxu0 %vm702_vm1, %v639_v47 }
  0x5c   : > { %819 = vmatprep.mubr.bf16.mxu0 %v4855_v18 }
  0x63   : > { %3969 = vmatmul.mubr.msk.bf16.gmra.mxu0 %vm702_vm1, %v640_v50 }
  0x64   : > { %829 = vmatprep.mubr.bf16.mxu0 %v4855_v18 }
  0x6b   : > { %3970 = vmatmul.mubr.msk.bf16.gmra.mxu0 %vm702_vm1, %v641_v53 }
  0x6c   : > { %4184 = vmatprep.mubr.msk.bf16.mxu0 %vm4857_vm0, %v4856_v22 }
  0x73   : > { %4185 = vmatmul.mubr.bf16.vlgmr.msra.gmra.mxu0 %v4855_v18 }
  0x74   : > { %4253 = vmatpush3.bf16.msra.mxu0 %v5032_v28  ;;  %4256 = vmatprep.mubr.msk.bf16.mxu0 %vm4857_vm0, %v4856_v22 }
  0x75   : > { %4254 = vmatprep.subr.bf16.mxu0 %v4856_v22 }
  0x78   : > { %4255 = vmatpush3.bf16.msra.mxu0 %v5045_v31 }
  0x79   : > { %4268 = vmatprep.subr.bf16.mxu0 %v4856_v22 }
  0xee   : > { %v5118_v2 = vpop.f32.mrf.mxu1 }
  0xf0   : > { %v4194_v5 = vpop.f32.mrf.mxu1 }
  0xf2   : > { %v1021_v8 = vpop.f32.mrf.mxu1 }
  0xf3   : > { %v5108_v60 = vpop.f32.mrf.mxu0 }
  0xf4   : > { %v4195_v11 = vpop.f32.mrf.mxu1 }
  0xf5   : > { %v763_v61 = vpop.f32.mrf.mxu0 }
  0xf6   : > { %v5113_v63 = vadd.f32 %v763_v61, %v5106_v59 }
  0xf7   : > { %v765_v0 = vpop.f32.mrf.mxu0 }
  0xf8   : > { %v5116_v1 = vadd.f32 %v765_v0, %v5110_v62 }
  0xf9   : > { %v767_v3 = vpop.f32.mrf.mxu0 }
  0xfa   : > { %v5121_v4 = vadd.f32 %v767_v3, %v5106_v59 }
  0xfb   : > { %v771_v6 = vpop.f32.mrf.mxu0 }
  0xfc   : > { %v5124_v7 = vadd.f32 %v771_v6, %v5110_v62 }
  0xfd   : > { %v773_v9 = vpop.f32.mrf.mxu0 }
  0xfe   : > { %v5127_v10 = vadd.f32 %v773_v9, %v5106_v59 }
  0xff   : > { %v775_v12 = vpop.f32.mrf.mxu0 }
 0x100   : > { %v5130_v13 = vadd.f32 %v775_v12, %v5110_v62 }
 0x101   : > { %v777_v14 = vpop.f32.mrf.mxu0 }
 0x102   : > { %v5133_v15 = vadd.f32 %v777_v14, %v5106_v59 }
 0x103   : > { %v781_v16 = vpop.f32.mrf.mxu0 }
 0x104   : > { %v5136_v17 = vadd.f32 %v781_v16, %v5110_v62  ;;  %v762_v16 = vadd.f32 %v5108_v60, %v5110_v62  ;;  %v5221_v60 = vld [vmem:[%s5218_s27] sm:$0xff] }
 0x105   : > { %v783_v19 = vpop.f32.mrf.mxu0  ;;  %vm962_vm2 = vcmp.gt.s32.totalorder %v5221_v60, 0  ;;  %vm1049_vm3 = vcmp.gt.s32.totalorder %v5221_v60, 15  ;;  %vm1131_vm7 = vcmp.gt.s32.totalorder %v5221_v60, 1  ;;  %vm1213_vm8 = vcmp.gt.s32.totalorder %v5221_v60, 14 }
 0x106   : > { %v5139_v20 = vadd.f32 %v783_v19, %v5106_v59  ;;  %vm1295_vm11 = vcmp.gt.s32.totalorder %v5221_v60, 2  ;;  %vm1377_vm12 = vcmp.gt.s32.totalorder %v5221_v60, 13  ;;  %vm1459_vm15 = vcmp.gt.s32.totalorder %v5221_v60, 3 }
 0x107   : > { %v785_v21 = vpop.f32.mrf.mxu0  ;;  %vm1541_vm1 = vcmp.gt.s32.totalorder %v5221_v60, 12 }
 0x108   : > { %v5142_v23 = vadd.f32 %v785_v21, %v5110_v62 }
 0x109   : > { %v787_v24 = vpop.f32.mrf.mxu0 }
 0x10a   : > { %v5145_v25 = vadd.f32 %v787_v24, %v5106_v59 }
 0x10b   : > { %v791_v26 = vpop.f32.mrf.mxu0 }
 0x10c   : > { %v5148_v27 = vadd.f32 %v791_v26, %v5110_v62 }
 0x10d   : > { %v793_v29 = vpop.f32.mrf.mxu0 }
 0x10e   : > { %v5151_v32 = vadd.f32 %v793_v29, %v5106_v59 }
 0x10f   : > { %v795_v33 = vpop.f32.mrf.mxu0 }
 0x110   : > { %v5154_v35 = vadd.f32 %v795_v33, %v5110_v62 }
 0x111   : > { %v797_v36 = vpop.f32.mrf.mxu0 }
 0x112   : > { %v5157_v37 = vadd.f32 %v797_v36, %v5106_v59 }
 0x113   : > { %v801_v38 = vpop.f32.mrf.mxu0 }
 0x114   : > { %v5160_v39 = vadd.f32 %v801_v38, %v5110_v62 }
 0x115   : > { %v803_v40 = vpop.f32.mrf.mxu0 }
 0x116   : > { %v5163_v41 = vadd.f32 %v803_v40, %v5106_v59 }
 0x117   : > { %v805_v42 = vpop.f32.mrf.mxu0 }
 0x118   : > { %v5166_v43 = vadd.f32 %v805_v42, %v5110_v62 }
 0x119   : > { %v807_v44 = vpop.f32.mrf.mxu0 }
 0x11a   : > { %v5169_v45 = vadd.f32 %v807_v44, %v5106_v59 }
 0x11b   : > { %v811_v46 = vpop.f32.mrf.mxu0 }
 0x11c   : > { %v5172_v47 = vadd.f32 %v811_v46, %v5110_v62 }
 0x11d   : > { %v813_v48 = vpop.f32.mrf.mxu0 }
 0x11e   : > { %v5175_v49 = vadd.f32 %v813_v48, %v5106_v59 }
 0x11f   : > { %v815_v50 = vpop.f32.mrf.mxu0 }
 0x120   : > { %v5178_v51 = vadd.f32 %v815_v50, %v5110_v62 }
 0x121   : > { %v817_v52 = vpop.f32.mrf.mxu0 }
 0x122   : > { %v5181_v53 = vadd.f32 %v817_v52, %v5106_v59 }
 0x123   : > { %v821_v54 = vpop.f32.mrf.mxu0 }
 0x124   : > { %v5184_v55 = vadd.f32 %v821_v54, %v5110_v62 }
 0x125   : > { %v823_v56 = vpop.f32.mrf.mxu0 }
 0x126   : > { %v5187_v57 = vadd.f32 %v823_v56, %v5106_v59 }
 0x127   : > { %v825_v58 = vpop.f32.mrf.mxu0 }
 0x128   : > { %v5190_v61 = vadd.f32 %v825_v58, %v5110_v62 }
 0x129   : > { %v827_v0 = vpop.f32.mrf.mxu0 }
 0x12a   : > { %v5193_v3 = vadd.f32 %v827_v0, %v5106_v59 }
 0x12b   : > { %v831_v5 = vpop.f32.mrf.mxu0 }
 0x12c   : > { %v5196_v6 = vadd.f32 %v831_v5, %v5110_v62 }
 0x12d   : > { %v833_v8 = vpop.f32.mrf.mxu0 }
 0x12e   : > { %v5199_v9 = vadd.f32 %v833_v8, %v5106_v59 }
 0x12f   : > { %v835_v11 = vpop.f32.mrf.mxu0 }
 0x130   : > { %v5202_v12 = vadd.f32 %v835_v11, %v5110_v62 }
 0x131   : > { %v837_v14 = vpop.f32.mrf.mxu0 }
 0x132   : > { %v838_v19 = vadd.f32 %v837_v14, %v5106_v59 }
 0x133   : > { %v931_v21 = vpop.f32.mrf.mxu0 }
 0x134   : > { %v937_v24 = vadd.f32 %v931_v21, %v762_v16  ;;  %v1024_v29 = vadd.f32 %v5118_v2, %v838_v19  ;;  %v963_v2 = vsel %vm962_vm2, 1, %v4855_v18 }
 0x135   : > { %v4186_v26 = vpop.f32.mrf.mxu0 }
 0x136   : > { %4562 = vtanh.f32 %v937_v24  ;;  %v3973_v38 = vmul.f32 -1.442695, %v937_v24  ;;  %v3976_v40 = vmul.f32 -1.442695, %v1024_v29  ;;  %v1050_v24 = vsel %vm1049_vm3, 1, %v4855_v18 }
 0x137   : > { %v934_v33 = vpop.f32.mrf.mxu0  ;;  %4564 = vtanh.f32 %v1024_v29 }
 0x138   : > { %4566 = vpow2.f32 %v3973_v38 }
 0x139   : > { %v4187_v36 = vpop.f32.mrf.mxu0  ;;  %4568 = vpow2.f32 %v3976_v40 }
 0x143   : > { %v4563_v59 = vpop.eup %4562 }
 0x144   : > { %947 = vrot.lane.b32.xlu0 %v4563_v59, %s4858_s26  ;;  %v4565_v62 = vpop.eup %4564 }
 0x145   : > { %v4567_v42 = vpop.eup %4566 }
 0x146   : > { %v941_v44 = vadd.f32 1.0, %v4567_v42  ;;  %v4569_v46 = vpop.eup %4568 }
 0x147   : > { %v1028_v48 = vadd.f32 1.0, %v4569_v46 }
 0x148   : > { %1034 = vrot.lane.b32.xlu0 %v4565_v62, %s4858_s26  ;;  %4570 = vrcp.f32 %v941_v44 }
 0x149   : > { %4572 = vrcp.f32 %v1028_v48 }
 0x14c   : > { %965 = vperm.xlu0 %4544, %v963_v2  }
 0x155   : > { %v4571_v50 = vpop.eup %4570 }
 0x156   : > { %v4573_v56 = vpop.eup %4572  ;;  %v945_v5 = vmul.f32 0.0, %v4571_v50 }
 0x157   : > { %v1032_v14 = vmul.f32 0.0, %v4573_v56 }
 0x1b6   : > { %v948_v52 = vpop.permute.xlu0 %947 }
 0x1b7   : > { %v950_v54 = vmul.f32 %v4571_v50, %v948_v52 }
 0x1b9   : > { %952 = vrot.lane.b32.xlu1 %v950_v54, %s4859_s20 }
 0x1ba   : > { %v1035_v58 = vpop.permute.xlu0 %1034 }
 0x1bb   : > { %v1037_v0 = vmul.f32 %v4573_v56, %v1035_v58 }
 0x1bd   : > { %1039 = vrot.lane.b32.xlu1 %v1037_v0, %s4859_s20 }
 0x1c7   : > { %v5239_v29 = vpop.permute.xlu0 %965 }
 0x1c8   : > { %vm6383_vm4 = vcmp.eq.s32.totalorder %v5239_v29, 1 }
 0x22b   : > { %v953_v8 = vpop.permute.xlu1 %952 }
 0x22c   : > { %v5229_v11 = vadd.f32 %v953_v8, %v945_v5 }
 0x22e   : > { %4574 = vtanh.f32 %v5229_v11 }
 0x22f   : > { %v1040_v16 = vpop.permute.xlu1 %1039 }
 0x230   : > { %v5232_v19 = vadd.f32 %v1040_v16, %v1032_v14 }
 0x232   : > { %4576 = vtanh.f32 %v5232_v19 }
 0x23b   : > { %v4575_v21 = vpop.eup %4574 }
 0x23c   : > { %958 = vrot.lane.b32.xlu1 %v4575_v21, %s4858_s26 }
 0x23f   : > { %v4577_v26 = vpop.eup %4576 }
 0x240   : > { %1045 = vrot.lane.b32.xlu0 %v4577_v26, %s4858_s26  ;;  %1052 = vperm.xlu1 %4545, %v1050_v24  }
 0x2ae   : > { %v959_v33 = vpop.permute.xlu1 %958 }
 0x2af   : > { %v961_v36 = vmul.f32 %v4571_v50, %v959_v33 }
 0x2b1   : > { %v5244_v59 = vsel %vm6383_vm4, %v961_v36, 0.0 }
 0x2b2   : > { %v1059_v62 = vpack.c.bf16 %v5244_v59, %v5244_v59  ;;  %v1046_v2 = vpop.permute.xlu0 %1045 }
 0x2b3   : > { %v1048_v38 = vmul.f32 %v4573_v56, %v1046_v2 }
 0x2b4   : > { %1061 = vrot.lane.b32.xlu1 %v1059_v62, %s4859_s20 }
 0x2bb   : > { %v5249_v40 = vpop.permute.xlu1 %1052 }
 0x2bc   : > { %vm6384_vm5 = vcmp.eq.s32.totalorder %v5249_v40, 1 }
 0x2bd   : > { %v5254_v42 = vsel %vm6384_vm5, %v1048_v38, 0.0 }
 0x2be   : > { %v1141_v44 = vpack.c.bf16 %v5254_v42, %v5254_v42 }
 0x2c0   : > { %1143 = vrot.lane.b32.xlu0 %v1141_v44, %s4859_s20 }
 0x326   : > { %v1062_v46 = vpop.permute.xlu1 %1061 }
 0x327   : > { %4201 = vmatmul.mubr.msk.bf16.vlgmr.msra.gmra.mxu1 %vm893_vm6, %v1062_v46  ;;  %v1132_v46 = vsel %vm1131_vm7, 1, %v4855_v18  ;;  %vm1623_vm7 = vcmp.gt.s32.totalorder %v5221_v60, 4 }
 0x328   : > { %4205 = vmatpush3.bf16.msra.mxu1 %v5032_v28  ;;  %4208 = vmatprep.mubr.msk.bf16.mxu1 %vm4857_vm0, %v4856_v22 }
 0x329   : > { %4206 = vmatprep.subr.bf16.mxu1 %v4856_v22 }
 0x32c   : > { %4207 = vmatpush3.bf16.msra.mxu1 %v5045_v31 }
 0x32d   : > { %4212 = vmatprep.subr.bf16.mxu1 %v4856_v22 }
 0x332   : > { %v1144_v48 = vpop.permute.xlu0 %1143 }
 0x333   : > { %4209 = vmatmul.mubr.msk.bf16.vlgmr.msra.gmra.mxu1 %vm893_vm6, %v1144_v48  ;;  %v1214_v48 = vsel %vm1213_vm8, 1, %v4855_v18  ;;  %vm1705_vm8 = vcmp.gt.s32.totalorder %v5221_v60, 11 }
 0x334   : > { %4213 = vmatpush3.bf16.msra.mxu1 %v5037_v30  ;;  %4216 = vmatprep.mubr.msk.bf16.mxu1 %vm4857_vm0, %v4856_v22 }
 0x335   : > { %4214 = vmatprep.subr.bf16.mxu1 %v4856_v22 }
 0x338   : > { %4215 = vmatpush3.bf16.msra.mxu1 %v5055_v34 }
 0x339   : > { %4220 = vmatprep.subr.bf16.mxu1 %v4856_v22 }
 0x3e7   : > { %v1100_v50 = vpop.f32.mrf.mxu1 }
 0x3e8   : > { %v1106_v52 = vadd.f32 %v1100_v50, %v5116_v1 }
 0x3e9   : > { %v4202_v54 = vpop.f32.mrf.mxu1 }
 0x3ea   : > { %4578 = vtanh.f32 %v1106_v52  ;;  %v3978_v26 = vmul.f32 -1.442695, %v1106_v52 }
 0x3eb   : > { %v1103_v56 = vpop.f32.mrf.mxu1 }
 0x3ec   : > { %v5286_v56 = vsel %vm6383_vm4, %v5229_v11, 0.0 }
 0x3ed   : > { %v4203_v58 = vpop.f32.mrf.mxu1 }
 0x3f3   : > { %v1182_v0 = vpop.f32.mrf.mxu1 }
 0x3f4   : > { %v1188_v5 = vadd.f32 %v1182_v0, %v5199_v9 }
 0x3f5   : > { %v4210_v8 = vpop.f32.mrf.mxu1 }
 0x3f6   : > { %4580 = vtanh.f32 %v1188_v5  ;;  %v3980_v1 = vmul.f32 -1.442695, %v1188_v5  ;;  %v5295_v8 = vsel %vm6384_vm5, %v5232_v19, 0.0 }
 0x3f7   : > { %v4579_v14 = vpop.eup %4578  ;;  %v1185_v16 = vpop.f32.mrf.mxu1  ;;  %4582 = vpow2.f32 %v3978_v26 }
 0x3f8   : > { %1116 = vrot.lane.b32.xlu1 %v4579_v14, %s4858_s26  ;;  %4584 = vpow2.f32 %v3980_v1 }
 0x3f9   : > { %v4211_v21 = vpop.f32.mrf.mxu1 }
 0x403   : > { %v4581_v24 = vpop.eup %4580 }
 0x404   : > { %1198 = vrot.lane.b32.xlu0 %v4581_v24, %s4858_s26  ;;  %v4583_v33 = vpop.eup %4582 }
 0x405   : > { %v1110_v36 = vadd.f32 1.0, %v4583_v33  ;;  %v4585_v62 = vpop.eup %4584 }
 0x406   : > { %v1192_v2 = vadd.f32 1.0, %v4585_v62 }
 0x407   : > { %4586 = vrcp.f32 %v1110_v36 }
 0x408   : > { %4588 = vrcp.f32 %v1192_v2 }
 0x414   : > { %v4587_v9 = vpop.eup %4586 }
 0x415   : > { %v4589_v50 = vpop.eup %4588  ;;  %v1114_v58 = vmul.f32 %v4587_v9, %v5286_v56 }
 0x416   : > { %v1196_v14 = vmul.f32 %v4589_v50, %v5295_v8 }
 0x46a   : > { %v1117_v38 = vpop.permute.xlu1 %1116 }
 0x46b   : > { %v1119_v44 = vmul.f32 %v4587_v9, %v1117_v38 }
 0x46d   : > { %1121 = vrot.lane.b32.xlu1 %v1119_v44, %s4859_s20 }
 0x471   : > { %1134 = vperm.xlu1 %4545, %v1132_v46  }
 0x475   : > { %1216 = vperm.xlu1 %4545, %v1214_v48  }
 0x476   : > { %v1199_v52 = vpop.permute.xlu0 %1198 }
 0x477   : > { %v1201_v54 = vmul.f32 %v4589_v50, %v1199_v52 }
 0x479   : > { %1203 = vrot.lane.b32.xlu0 %v1201_v54, %s4859_s20 }
 0x4df   : > { %v1122_v0 = vpop.permute.xlu1 %1121 }
 0x4e0   : > { %v5289_v5 = vadd.f32 %v1122_v0, %v1114_v58 }
 0x4e2   : > { %4590 = vtanh.f32 %v5289_v5 }
 0x4eb   : > { %v1204_v16 = vpop.permute.xlu0 %1203 }
 0x4ec   : > { %v5298_v21 = vadd.f32 %v1204_v16, %v1196_v14  ;;  %v5303_v26 = vpop.permute.xlu1 %1134 }
 0x4ed   : > { %vm1136_vm9 = vcmp.eq.s32.totalorder %v5303_v26, 1  ;;  %v3419_v26 = vld [vmem:[%s6373_s6 + $0x8] sm:$0xff] }
 0x4ee   : > { %4592 = vtanh.f32 %v5298_v21 }
 0x4ef   : > { %v4591_v11 = vpop.eup %4590 }
 0x4f0   : > { %1127 = vrot.lane.b32.xlu0 %v4591_v11, %s4858_s26  ;;  %v5314_v62 = vpop.permute.xlu1 %1216 }
 0x4f1   : > { %vm1218_vm10 = vcmp.eq.s32.totalorder %v5314_v62, 1  ;;  %v3421_v62 = vld [vmem:[%s6373_s6 + $0x18] sm:$0xff] }
 0x4fb   : > { %v4593_v24 = vpop.eup %4592 }
 0x4fc   : > { %1209 = vrot.lane.b32.xlu0 %v4593_v24, %s4858_s26 }
 0x562   : > { %v1128_v1 = vpop.permute.xlu0 %1127 }
 0x563   : > { %v1130_v33 = vmul.f32 %v4587_v9, %v1128_v1 }
 0x565   : > { %v5309_v19 = vsel %vm1136_vm9, %v1130_v33, %v5244_v59 }
 0x566   : > { %v1223_v36 = vpack.c.bf16 %v5309_v19, %v5309_v19 }
 0x568   : > { %1225 = vrot.lane.b32.xlu1 %v1223_v36, %s4859_s20 }
 0x56e   : > { %v1210_v2 = vpop.permute.xlu0 %1209 }
 0x56f   : > { %v1212_v38 = vmul.f32 %v4589_v50, %v1210_v2 }
 0x571   : > { %v5320_v9 = vsel %vm1218_vm10, %v1212_v38, %v5254_v42 }
 0x572   : > { %v1305_v59 = vpack.c.bf16 %v5320_v9, %v5320_v9 }
 0x574   : > { %1307 = vrot.lane.b32.xlu0 %v1305_v59, %s4859_s20 }
 0x5da   : > { %v1226_v44 = vpop.permute.xlu1 %1225 }
 0x5db   : > { %4217 = vmatmul.mubr.msk.bf16.vlgmr.msra.gmra.mxu1 %vm893_vm6, %v1226_v44 }
 0x5dc   : > { %4221 = vmatpush3.bf16.msra.mxu1 %v5032_v28  ;;  %4224 = vmatprep.mubr.msk.bf16.mxu1 %vm4857_vm0, %v4856_v22 }
 0x5dd   : > { %4222 = vmatprep.subr.bf16.mxu1 %v4856_v22 }
 0x5e0   : > { %4223 = vmatpush3.bf16.msra.mxu1 %v5045_v31 }
 0x5e1   : > { %4228 = vmatprep.subr.bf16.mxu1 %v4856_v22 }
 0x5e6   : > { %v1308_v42 = vpop.permute.xlu0 %1307 }
 0x5e7   : > { %4225 = vmatmul.mubr.msk.bf16.vlgmr.msra.gmra.mxu1 %vm893_vm6, %v1308_v42 }
 0x5e8   : > { %4229 = vmatpush3.bf16.msra.mxu1 %v5037_v30  ;;  %4232 = vmatprep.mubr.msk.bf16.mxu1 %vm4857_vm0, %v4856_v22 }
 0x5e9   : > { %4230 = vmatprep.subr.bf16.mxu1 %v4856_v22 }
 0x5ec   : > { %4231 = vmatpush3.bf16.msra.mxu1 %v5055_v34 }
 0x5ed   : > { %4236 = vmatprep.subr.bf16.mxu1 %v4856_v22 }
 0x69b   : > { %v1264_v46 = vpop.f32.mrf.mxu1 }
 0x69c   : > { %v1270_v48 = vadd.f32 %v1264_v46, %v5124_v7  ;;  %v1296_v46 = vsel %vm1295_vm11, 1, %v4855_v18 }
 0x69d   : > { %v4218_v50 = vpop.f32.mrf.mxu1 }
 0x69e   : > { %4594 = vtanh.f32 %v1270_v48  ;;  %v3982_v33 = vmul.f32 -1.442695, %v1270_v48  ;;  %v1378_v48 = vsel %vm1377_vm12, 1, %v4855_v18 }
 0x69f   : > { %v1267_v52 = vpop.f32.mrf.mxu1 }
 0x6a1   : > { %v4219_v54 = vpop.f32.mrf.mxu1 }
 0x6a7   : > { %v1346_v58 = vpop.f32.mrf.mxu1 }
 0x6a8   : > { %v1352_v0 = vadd.f32 %v1346_v58, %v5193_v3  ;;  %v5353_v58 = vsel %vm1136_vm9, %v5289_v5, %v5286_v56 }
 0x6a9   : > { %v4226_v14 = vpop.f32.mrf.mxu1 }
 0x6aa   : > { %4596 = vtanh.f32 %v1352_v0  ;;  %v3984_v7 = vmul.f32 -1.442695, %v1352_v0 }
 0x6ab   : > { %v4595_v16 = vpop.eup %4594  ;;  %v1349_v11 = vpop.f32.mrf.mxu1  ;;  %4598 = vpow2.f32 %v3982_v33 }
 0x6ac   : > { %1280 = vrot.lane.b32.xlu1 %v4595_v16, %s4858_s26  ;;  %4600 = vpow2.f32 %v3984_v7  ;;  %v5363_v11 = vsel %vm1218_vm10, %v5298_v21, %v5295_v8 }
 0x6ad   : > { %v4227_v24 = vpop.f32.mrf.mxu1 }
 0x6b7   : > { %v4597_v1 = vpop.eup %4596 }
 0x6b8   : > { %1362 = vrot.lane.b32.xlu0 %v4597_v1, %s4858_s26  ;;  %v4599_v36 = vpop.eup %4598 }
 0x6b9   : > { %v1274_v2 = vadd.f32 1.0, %v4599_v36  ;;  %v4601_v38 = vpop.eup %4600 }
 0x6ba   : > { %v1356_v59 = vadd.f32 1.0, %v4601_v38 }
 0x6bb   : > { %4602 = vrcp.f32 %v1274_v2 }
 0x6bc   : > { %4604 = vrcp.f32 %v1356_v59 }
 0x6c8   : > { %v4603_v3 = vpop.eup %4602 }
 0x6c9   : > { %v4605_v50 = vpop.eup %4604  ;;  %v1278_v0 = vmul.f32 %v4603_v3, %v5353_v58 }
 0x6ca   : > { %v1360_v24 = vmul.f32 %v4605_v50, %v5363_v11 }
 0x71e   : > { %v1281_v44 = vpop.permute.xlu1 %1280 }
 0x71f   : > { %v1283_v42 = vmul.f32 %v4603_v3, %v1281_v44 }
 0x721   : > { %1285 = vrot.lane.b32.xlu1 %v1283_v42, %s4859_s20 }
 0x725   : > { %1298 = vperm.xlu1 %4545, %v1296_v46  }
 0x729   : > { %1380 = vperm.xlu1 %4545, %v1378_v48  }
 0x72a   : > { %v1363_v52 = vpop.permute.xlu0 %1362 }
 0x72b   : > { %v1365_v54 = vmul.f32 %v4605_v50, %v1363_v52 }
 0x72d   : > { %1367 = vrot.lane.b32.xlu0 %v1365_v54, %s4859_s20 }
 0x793   : > { %v1286_v14 = vpop.permute.xlu1 %1285 }
 0x794   : > { %v5356_v16 = vadd.f32 %v1286_v14, %v1278_v0 }
 0x796   : > { %4606 = vtanh.f32 %v5356_v16 }
 0x79f   : > { %v1368_v1 = vpop.permute.xlu0 %1367 }
 0x7a0   : > { %v5366_v33 = vadd.f32 %v1368_v1, %v1360_v24  ;;  %v5371_v7 = vpop.permute.xlu1 %1298 }
 0x7a1   : > { %vm1300_vm13 = vcmp.eq.s32.totalorder %v5371_v7, 1 }
 0x7a2   : > { %4608 = vtanh.f32 %v5366_v33 }
 0x7a3   : > { %v4607_v56 = vpop.eup %4606 }
 0x7a4   : > { %1291 = vrot.lane.b32.xlu0 %v4607_v56, %s4858_s26  ;;  %v5382_v38 = vpop.permute.xlu1 %1380 }
 0x7a5   : > { %vm1382_vm14 = vcmp.eq.s32.totalorder %v5382_v38, 1 }
 0x7af   : > { %v4609_v5 = vpop.eup %4608 }
 0x7b0   : > { %1373 = vrot.lane.b32.xlu0 %v4609_v5, %s4858_s26 }
 0x816   : > { %v1292_v36 = vpop.permute.xlu0 %1291 }
 0x817   : > { %v1294_v2 = vmul.f32 %v4603_v3, %v1292_v36 }
 0x819   : > { %v5377_v8 = vsel %vm1300_vm13, %v1294_v2, %v5309_v19 }
 0x81a   : > { %v1387_v21 = vpack.c.bf16 %v5377_v8, %v5377_v8 }
 0x81c   : > { %1389 = vrot.lane.b32.xlu1 %v1387_v21, %s4859_s20 }
 0x822   : > { %v1374_v59 = vpop.permute.xlu0 %1373 }
 0x823   : > { %v1376_v44 = vmul.f32 %v4605_v50, %v1374_v59 }
 0x825   : > { %v5388_v3 = vsel %vm1382_vm14, %v1376_v44, %v5320_v9 }
 0x826   : > { %v1469_v19 = vpack.c.bf16 %v5388_v3, %v5388_v3 }
 0x828   : > { %1471 = vrot.lane.b32.xlu0 %v1469_v19, %s4859_s20 }
 0x88e   : > { %v1390_v42 = vpop.permute.xlu1 %1389 }
 0x88f   : > { %4233 = vmatmul.mubr.msk.bf16.vlgmr.msra.gmra.mxu1 %vm893_vm6, %v1390_v42 }
 0x890   : > { %4237 = vmatpush3.bf16.msra.mxu1 %v5032_v28  ;;  %4240 = vmatprep.mubr.msk.bf16.mxu1 %vm4857_vm0, %v4856_v22 }
 0x891   : > { %4238 = vmatprep.subr.bf16.mxu1 %v4856_v22 }
 0x894   : > { %4239 = vmatpush3.bf16.msra.mxu1 %v5045_v31 }
 0x895   : > { %4244 = vmatprep.subr.bf16.mxu1 %v4856_v22 }
 0x89a   : > { %v1472_v9 = vpop.permute.xlu0 %1471 }
 0x89b   : > { %4241 = vmatmul.mubr.msk.bf16.vlgmr.msra.gmra.mxu1 %vm893_vm6, %v1472_v9 }
 0x89c   : > { %4245 = vmatpush3.bf16.msra.mxu1 %v5037_v30  ;;  %4248 = vmatprep.mubr.msk.bf16.mxu1 %vm4857_vm0, %v4856_v22 }
 0x89d   : > { %4246 = vmatprep.subr.bf16.mxu1 %v4856_v22 }
 0x8a0   : > { %4247 = vmatpush3.bf16.msra.mxu1 %v5055_v34 }
 0x8a1   : > { %4260 = vmatprep.subr.bf16.mxu1 %v4856_v22 }
 0x94f   : > { %v1428_v46 = vpop.f32.mrf.mxu1 }
 0x950   : > { %v1434_v48 = vadd.f32 %v1428_v46, %v5130_v13  ;;  %v1460_v46 = vsel %vm1459_vm15, 1, %v4855_v18  ;;  %vm1787_vm15 = vcmp.gt.s32.totalorder %v5221_v60, 5 }
 0x951   : > { %v4234_v50 = vpop.f32.mrf.mxu1 }
 0x952   : > { %4610 = vtanh.f32 %v1434_v48  ;;  %v3986_v2 = vmul.f32 -1.442695, %v1434_v48 }
 0x953   : > { %v1431_v52 = vpop.f32.mrf.mxu1 }
 0x955   : > { %v4235_v54 = vpop.f32.mrf.mxu1 }
 0x956   : > { %v1542_v54 = vsel %vm1541_vm1, 1, %v4855_v18  ;;  %vm1869_vm1 = vcmp.gt.s32.totalorder %v5221_v60, 10 }
 0x95b   : > { %v1510_v0 = vpop.f32.mrf.mxu1 }
 0x95c   : > { %v1516_v14 = vadd.f32 %v1510_v0, %v5187_v57  ;;  %v5421_v0 = vsel %vm1300_vm13, %v5356_v16, %v5353_v58 }
 0x95d   : > { %v4242_v24 = vpop.f32.mrf.mxu1 }
 0x95e   : > { %4612 = vtanh.f32 %v1516_v14  ;;  %v3988_v13 = vmul.f32 -1.442695, %v1516_v14 }
 0x95f   : > { %v4611_v1 = vpop.eup %4610  ;;  %v1513_v56 = vpop.f32.mrf.mxu1  ;;  %4614 = vpow2.f32 %v3986_v2 }
 0x960   : > { %1444 = vrot.lane.b32.xlu1 %v4611_v1, %s4858_s26  ;;  %4616 = vpow2.f32 %v3988_v13  ;;  %v5431_v56 = vsel %vm1382_vm14, %v5366_v33, %v5363_v11 }
 0x961   : > { %v4243_v5 = vpop.f32.mrf.mxu1 }
 0x96b   : > { %v4613_v36 = vpop.eup %4612 }
 0x96c   : > { %1526 = vrot.lane.b32.xlu0 %v4613_v36, %s4858_s26  ;;  %v4615_v21 = vpop.eup %4614 }
 0x96d   : > { %v1438_v59 = vadd.f32 1.0, %v4615_v21  ;;  %v4617_v44 = vpop.eup %4616 }
 0x96e   : > { %v1520_v19 = vadd.f32 1.0, %v4617_v44 }
 0x96f   : > { %4618 = vrcp.f32 %v1438_v59 }
 0x970   : > { %4620 = vrcp.f32 %v1520_v19 }
 0x97c   : > { %v4619_v57 = vpop.eup %4618 }
 0x97d   : > { %v4621_v48 = vpop.eup %4620  ;;  %v1442_v14 = vmul.f32 %v4619_v57, %v5421_v0 }
 0x97e   : > { %v1524_v5 = vmul.f32 %v4621_v48, %v5431_v56 }
 0x9d2   : > { %v1445_v42 = vpop.permute.xlu1 %1444 }
 0x9d3   : > { %v1447_v9 = vmul.f32 %v4619_v57, %v1445_v42 }
 0x9d5   : > { %1449 = vrot.lane.b32.xlu1 %v1447_v9, %s4859_s20 }
 0x9d9   : > { %1462 = vperm.xlu1 %4545, %v1460_v46  }
 0x9de   : > { %v1527_v50 = vpop.permute.xlu0 %1526 }
 0x9df   : > { %v1529_v52 = vmul.f32 %v4621_v48, %v1527_v50 }
 0x9e1   : > { %1531 = vrot.lane.b32.xlu0 %v1529_v52, %s4859_s20 }
 0x9e5   : > { %1544 = vperm.xlu0 %4544, %v1542_v54  }
 0xa47   : > { %v1450_v24 = vpop.permute.xlu1 %1449 }
 0xa48   : > { %v5424_v1 = vadd.f32 %v1450_v24, %v1442_v14 }
 0xa4a   : > { %4622 = vtanh.f32 %v5424_v1 }
 0xa53   : > { %v1532_v36 = vpop.permute.xlu0 %1531 }
 0xa54   : > { %v5434_v2 = vadd.f32 %v1532_v36, %v1524_v5  ;;  %v5439_v13 = vpop.permute.xlu1 %1462 }
 0xa55   : > { %vm1464_vm2 = vcmp.eq.s32.totalorder %v5439_v13, 1 }
 0xa56   : > { %4624 = vtanh.f32 %v5434_v2 }
 0xa57   : > { %v4623_v58 = vpop.eup %4622 }
 0xa58   : > { %1455 = vrot.lane.b32.xlu1 %v4623_v58, %s4858_s26 }
 0xa60   : > { %v5450_v44 = vpop.permute.xlu0 %1544 }
 0xa61   : > { %vm1546_vm3 = vcmp.eq.s32.totalorder %v5450_v44, 1 }
 0xa63   : > { %v4625_v16 = vpop.eup %4624 }
 0xa64   : > { %1537 = vrot.lane.b32.xlu0 %v4625_v16, %s4858_s26 }
 0xaca   : > { %v1456_v21 = vpop.permute.xlu1 %1455 }
 0xacb   : > { %v1458_v59 = vmul.f32 %v4619_v57, %v1456_v21 }
 0xacd   : > { %v5445_v11 = vsel %vm1464_vm2, %v1458_v59, %v5377_v8 }
 0xace   : > { %v1551_v33 = vpack.c.bf16 %v5445_v11, %v5445_v11 }
 0xad0   : > { %1553 = vrot.lane.b32.xlu1 %v1551_v33, %s4859_s20 }
 0xad6   : > { %v1538_v19 = vpop.permute.xlu0 %1537 }
 0xad7   : > { %v1540_v42 = vmul.f32 %v4621_v48, %v1538_v19 }
 0xad9   : > { %v5456_v57 = vsel %vm1546_vm3, %v1540_v42, %v5388_v3  ;;  %v1624_v42 = vsel %vm1623_vm7, 1, %v4855_v18 }
 0xada   : > { %v1633_v8 = vpack.c.bf16 %v5456_v57, %v5456_v57 }
 0xadc   : > { %1635 = vrot.lane.b32.xlu0 %v1633_v8, %s4859_s20 }
 0xb42   : > { %v1554_v9 = vpop.permute.xlu1 %1553 }
 0xb43   : > { %4249 = vmatmul.mubr.msk.bf16.vlgmr.msra.gmra.mxu1 %vm893_vm6, %v1554_v9 }
 0xb44   : > { %4261 = vmatpush3.bf16.msra.mxu1 %v5037_v30  ;;  %4264 = vmatprep.mubr.msk.bf16.mxu1 %vm4857_vm0, %v4856_v22 }
 0xb45   : > { %4262 = vmatprep.subr.bf16.mxu1 %v4856_v22 }
 0xb48   : > { %4263 = vmatpush3.bf16.msra.mxu1 %v5055_v34 }
 0xb49   : > { %4276 = vmatprep.subr.bf16.mxu1 %v4856_v22 }
 0xb4e   : > { %v1636_v3 = vpop.permute.xlu0 %1635 }
 0xb4f   : > { %4257 = vmatmul.mubr.msk.bf16.vlgmr.msra.gmra.mxu0 %vm893_vm6, %v1636_v3 }
 0xb50   : > { %4269 = vmatpush3.bf16.msra.mxu0 %v5032_v28  ;;  %4272 = vmatprep.mubr.msk.bf16.mxu0 %vm4857_vm0, %v4856_v22 }
 0xb51   : > { %4270 = vmatprep.subr.bf16.mxu0 %v4856_v22 }
 0xb54   : > { %4271 = vmatpush3.bf16.msra.mxu0 %v5045_v31 }
 0xb55   : > { %4284 = vmatprep.subr.bf16.mxu0 %v4856_v22 }
 0xc03   : > { %v1592_v30 = vpop.f32.mrf.mxu1 }
 0xc04   : > { %v1598_v46 = vadd.f32 %v1592_v30, %v5136_v17  ;;  %v1706_v30 = vsel %vm1705_vm8, 1, %v4855_v18 }
 0xc05   : > { %v4250_v34 = vpop.f32.mrf.mxu1 }
 0xc06   : > { %4626 = vtanh.f32 %v1598_v46  ;;  %v3990_v36 = vmul.f32 -1.442695, %v1598_v46  ;;  %v5489_v46 = vsel %vm1464_vm2, %v5424_v1, %v5421_v0 }
 0xc07   : > { %v1595_v48 = vpop.f32.mrf.mxu1 }
 0xc09   : > { %v4251_v50 = vpop.f32.mrf.mxu1 }
 0xc0f   : > { %v1674_v52 = vpop.f32.mrf.mxu0 }
 0xc10   : > { %v1680_v54 = vadd.f32 %v1674_v52, %v5181_v53  ;;  %v5499_v52 = vsel %vm1546_vm3, %v5434_v2, %v5431_v56 }
 0xc11   : > { %v4258_v28 = vpop.f32.mrf.mxu0 }
 0xc12   : > { %4628 = vtanh.f32 %v1680_v54  ;;  %v3992_v17 = vmul.f32 -1.442695, %v1680_v54 }
 0xc13   : > { %v4627_v14 = vpop.eup %4626  ;;  %v1677_v24 = vpop.f32.mrf.mxu0  ;;  %4630 = vpow2.f32 %v3990_v36 }
 0xc14   : > { %1608 = vrot.lane.b32.xlu1 %v4627_v14, %s4858_s26  ;;  %4632 = vpow2.f32 %v3992_v17 }
 0xc15   : > { %v4259_v5 = vpop.f32.mrf.mxu0 }
 0xc1f   : > { %v4629_v31 = vpop.eup %4628 }
 0xc20   : > { %1690 = vrot.lane.b32.xlu0 %v4629_v31, %s4858_s26  ;;  %v4631_v58 = vpop.eup %4630 }
 0xc21   : > { %v1602_v16 = vadd.f32 1.0, %v4631_v58  ;;  %v4633_v21 = vpop.eup %4632 }
 0xc22   : > { %v1684_v59 = vadd.f32 1.0, %v4633_v21 }
 0xc23   : > { %4634 = vrcp.f32 %v1602_v16 }
 0xc24   : > { %4636 = vrcp.f32 %v1684_v59  ;;  %v5533_v59 = vld [vmem:[%s6371_s4 + $0x8] sm:$0xff]  }
 0xc30   : > { %v4635_v53 = vpop.eup %4634 }
 0xc31   : > { %v4637_v8 = vpop.eup %4636  ;;  %v1606_v34 = vmul.f32 %v4635_v53, %v5489_v46 }
 0xc32   : > { %v1688_v54 = vmul.f32 %v4637_v8, %v5499_v52 }
 0xc86   : > { %v1609_v33 = vpop.permute.xlu1 %1608 }
 0xc87   : > { %v1611_v19 = vmul.f32 %v4635_v53, %v1609_v33  ;;  %v5550_v33 = vld [vmem:[%s6372_s5 + $0x8] sm:$0xff]  }
 0xc89   : > { %1613 = vrot.lane.b32.xlu1 %v1611_v19, %s4859_s20  ;;  %v5559_v19 = vld [vmem:[%s6372_s5] sm:$0xff]  }
 0xc8d   : > { %1626 = vperm.xlu1 %4545, %v1624_v42  }
 0xc92   : > { %v1691_v9 = vpop.permute.xlu0 %1690 }
 0xc93   : > { %v1693_v3 = vmul.f32 %v4637_v8, %v1691_v9 }
 0xc95   : > { %1695 = vrot.lane.b32.xlu0 %v1693_v3, %s4859_s20 }
 0xc99   : > { %1708 = vperm.xlu0 %4544, %v1706_v30  }
 0xcfb   : > { %v1614_v48 = vpop.permute.xlu1 %1613 }
 0xcfc   : > { %v5492_v50 = vadd.f32 %v1614_v48, %v1606_v34 }
 0xcfe   : > { %4638 = vtanh.f32 %v5492_v50 }
 0xd07   : > { %v1696_v28 = vpop.permute.xlu0 %1695 }
 0xd08   : > { %v5502_v14 = vadd.f32 %v1696_v28, %v1688_v54  ;;  %v5507_v24 = vpop.permute.xlu1 %1626 }
 0xd09   : > { %vm1628_vm11 = vcmp.eq.s32.totalorder %v5507_v24, 1 }
 0xd0a   : > { %4640 = vtanh.f32 %v5502_v14 }
 0xd0b   : > { %v4639_v0 = vpop.eup %4638 }
 0xd0c   : > { %1619 = vrot.lane.b32.xlu1 %v4639_v0, %s4858_s26 }
 0xd14   : > { %v5518_v36 = vpop.permute.xlu0 %1708 }
 0xd15   : > { %vm1710_vm12 = vcmp.eq.s32.totalorder %v5518_v36, 1 }
 0xd17   : > { %v4641_v1 = vpop.eup %4640 }
 0xd18   : > { %1701 = vrot.lane.b32.xlu0 %v4641_v1, %s4858_s26 }
 0xd7e   : > { %v1620_v5 = vpop.permute.xlu1 %1619 }
 0xd7f   : > { %v1622_v31 = vmul.f32 %v4635_v53, %v1620_v5 }
 0xd81   : > { %v5513_v56 = vsel %vm1628_vm11, %v1622_v31, %v5445_v11 }
 0xd82   : > { %v1715_v2 = vpack.c.bf16 %v5513_v56, %v5513_v56 }
 0xd84   : > { %1717 = vrot.lane.b32.xlu1 %v1715_v2, %s4859_s20 }
 0xd8a   : > { %v1702_v17 = vpop.permute.xlu0 %1701 }
 0xd8b   : > { %v1704_v58 = vmul.f32 %v4637_v8, %v1702_v17 }
 0xd8d   : > { %v5524_v16 = vsel %vm1710_vm12, %v1704_v58, %v5456_v57  ;;  %v5542_v57 = vld [vmem:[%s6371_s4] sm:$0xff]  }
 0xd8e   : > { %v1797_v11 = vpack.c.bf16 %v5524_v16, %v5524_v16 }
 0xd90   : > { %1799 = vrot.lane.b32.xlu0 %v1797_v11, %s4859_s20 }
 0xdf6   : > { %v1718_v21 = vpop.permute.xlu1 %1717 }
 0xdf7   : > { %4265 = vmatmul.mubr.msk.bf16.vlgmr.msra.gmra.mxu1 %vm893_vm6, %v1718_v21 }
 0xdf8   : > { %4277 = vmatpush3.bf16.msra.mxu1 %v5533_v59  ;;  %4280 = vmatprep.mubr.msk.bf16.mxu1 %vm4857_vm0, %v4856_v22 }
 0xdf9   : > { %4278 = vmatprep.subr.bf16.mxu1 %v4856_v22 }
 0xdfc   : > { %4279 = vmatpush3.bf16.msra.mxu1 %v5542_v57 }
 0xdfd   : > { %4292 = vmatprep.subr.bf16.mxu1 %v4856_v22 }
 0xe02   : > { %v1800_v53 = vpop.permute.xlu0 %1799 }
 0xe03   : > { %4273 = vmatmul.mubr.msk.bf16.vlgmr.msra.gmra.mxu0 %vm893_vm6, %v1800_v53 }
 0xe04   : > { %4285 = vmatpush3.bf16.msra.mxu0 %v5550_v33  ;;  %4288 = vmatprep.mubr.msk.bf16.mxu0 %vm4857_vm0, %v4856_v22 }
 0xe05   : > { %4286 = vmatprep.subr.bf16.mxu0 %v4856_v22 }
 0xe08   : > { %4287 = vmatpush3.bf16.msra.mxu0 %v5559_v19 }
 0xe09   : > { %4300 = vmatprep.subr.bf16.mxu0 %v4856_v22 }
 0xeb7   : > { %v1756_v42 = vpop.f32.mrf.mxu1 }
 0xeb8   : > { %v1762_v8 = vadd.f32 %v1756_v42, %v5142_v23  ;;  %v1788_v42 = vsel %vm1787_vm15, 1, %v4855_v18  ;;  %vm1951_vm15 = vcmp.gt.s32.totalorder %v5221_v60, 6 }
 0xeb9   : > { %v4266_v9 = vpop.f32.mrf.mxu1 }
 0xeba   : > { %4642 = vtanh.f32 %v1762_v8  ;;  %v3994_v31 = vmul.f32 -1.442695, %v1762_v8 }
 0xebb   : > { %v1759_v3 = vpop.f32.mrf.mxu1 }
 0xebd   : > { %v4267_v30 = vpop.f32.mrf.mxu1 }
 0xebe   : > { %v1870_v30 = vsel %vm1869_vm1, 1, %v4855_v18 }
 0xec3   : > { %v1838_v34 = vpop.f32.mrf.mxu0 }
 0xec4   : > { %v1844_v48 = vadd.f32 %v1838_v34, %v5175_v49  ;;  %v5577_v34 = vsel %vm1628_vm11, %v5492_v50, %v5489_v46 }
 0xec5   : > { %v4274_v54 = vpop.f32.mrf.mxu0 }
 0xec6   : > { %4644 = vtanh.f32 %v1844_v48  ;;  %v3996_v23 = vmul.f32 -1.442695, %v1844_v48 }
 0xec7   : > { %v4643_v28 = vpop.eup %4642  ;;  %v1841_v0 = vpop.f32.mrf.mxu0  ;;  %4646 = vpow2.f32 %v3994_v31 }
 0xec8   : > { %1772 = vrot.lane.b32.xlu1 %v4643_v28, %s4858_s26  ;;  %4648 = vpow2.f32 %v3996_v23  ;;  %v5587_v0 = vsel %vm1710_vm12, %v5502_v14, %v5499_v52 }
 0xec9   : > { %v4275_v1 = vpop.f32.mrf.mxu0 }
 0xed3   : > { %v4645_v5 = vpop.eup %4644 }
 0xed4   : > { %1854 = vrot.lane.b32.xlu0 %v4645_v5, %s4858_s26  ;;  %v4647_v2 = vpop.eup %4646 }
 0xed5   : > { %v1766_v17 = vadd.f32 1.0, %v4647_v2  ;;  %v4649_v58 = vpop.eup %4648 }
 0xed6   : > { %v1848_v11 = vadd.f32 1.0, %v4649_v58 }
 0xed7   : > { %4650 = vrcp.f32 %v1766_v17 }
 0xed8   : > { %4652 = vrcp.f32 %v1848_v11 }
 0xee4   : > { %v4651_v49 = vpop.eup %4650 }
 0xee5   : > { %v4653_v8 = vpop.eup %4652  ;;  %v1770_v48 = vmul.f32 %v4651_v49, %v5577_v34 }
 0xee6   : > { %v1852_v1 = vmul.f32 %v4653_v8, %v5587_v0 }
 0xf3a   : > { %v1773_v21 = vpop.permute.xlu1 %1772 }
 0xf3b   : > { %v1775_v53 = vmul.f32 %v4651_v49, %v1773_v21 }
 0xf3d   : > { %1777 = vrot.lane.b32.xlu1 %v1775_v53, %s4859_s20 }
 0xf41   : > { %1790 = vperm.xlu1 %4545, %v1788_v42  }
 0xf46   : > { %v1855_v9 = vpop.permute.xlu0 %1854 }
 0xf47   : > { %v1857_v3 = vmul.f32 %v4653_v8, %v1855_v9 }
 0xf49   : > { %1859 = vrot.lane.b32.xlu0 %v1857_v3, %s4859_s20 }
 0xf4d   : > { %1872 = vperm.xlu0 %4544, %v1870_v30  }
 0xfaf   : > { %v1778_v54 = vpop.permute.xlu1 %1777 }
 0xfb0   : > { %v5580_v28 = vadd.f32 %v1778_v54, %v1770_v48 }
 0xfb2   : > { %4654 = vtanh.f32 %v5580_v28 }
 0xfbb   : > { %v1860_v5 = vpop.permute.xlu0 %1859 }
 0xfbc   : > { %v5590_v31 = vadd.f32 %v1860_v5, %v1852_v1  ;;  %v5595_v23 = vpop.permute.xlu1 %1790 }
 0xfbd   : > { %vm1792_vm7 = vcmp.eq.s32.totalorder %v5595_v23, 1 }
 0xfbe   : > { %4656 = vtanh.f32 %v5590_v31  ;;  %v5648_v60 = vsel %vm1792_vm7, %v5580_v28, %v5577_v34 }
 0xfbf   : > { %v4655_v46 = vpop.eup %4654 }
 0xfc0   : > { %1783 = vrot.lane.b32.xlu1 %v4655_v46, %s4858_s26 }
 0xfc8   : > { %v5606_v58 = vpop.permute.xlu0 %1872 }
 0xfc9   : > { %vm1874_vm8 = vcmp.eq.s32.totalorder %v5606_v58, 1 }
 0xfcb   : > { %v4657_v50 = vpop.eup %4656 }
 0xfcc   : > { %1865 = vrot.lane.b32.xlu0 %v4657_v50, %s4858_s26 }
0x1032   : > { %v1784_v2 = vpop.permute.xlu1 %1783 }
0x1033   : > { %v1786_v17 = vmul.f32 %v4651_v49, %v1784_v2 }
0x1035   : > { %v5601_v52 = vsel %vm1792_vm7, %v1786_v17, %v5513_v56 }
0x1036   : > { %v1879_v14 = vpack.c.bf16 %v5601_v52, %v5601_v52 }
0x1038   : > { %1881 = vrot.lane.b32.xlu1 %v1879_v14, %s4859_s20 }
0x103e   : > { %v1866_v11 = vpop.permute.xlu0 %1865 }
0x103f   : > { %v1868_v21 = vmul.f32 %v4653_v8, %v1866_v11 }
0x1041   : > { %v5612_v49 = vsel %vm1874_vm8, %v1868_v21, %v5524_v16 }
0x1042   : > { %v1961_v56 = vpack.c.bf16 %v5612_v49, %v5612_v49 }
0x1044   : > { %1963 = vrot.lane.b32.xlu0 %v1961_v56, %s4859_s20 }
0x10aa   : > { %v1882_v53 = vpop.permute.xlu1 %1881 }
0x10ab   : > { %4281 = vmatmul.mubr.msk.bf16.vlgmr.msra.gmra.mxu1 %vm893_vm6, %v1882_v53 }
0x10ac   : > { %4293 = vmatpush3.bf16.msra.mxu1 %v5533_v59  ;;  %4296 = vmatprep.mubr.msk.bf16.mxu1 %vm4857_vm0, %v4856_v22 }
0x10ad   : > { %4294 = vmatprep.subr.bf16.mxu1 %v4856_v22 }
0x10b0   : > { %4295 = vmatpush3.bf16.msra.mxu1 %v5542_v57 }
0x10b1   : > { %4308 = vmatprep.subr.bf16.mxu1 %v4856_v22 }
0x10b6   : > { %v1964_v16 = vpop.permute.xlu0 %1963 }
0x10b7   : > { %4289 = vmatmul.mubr.msk.bf16.vlgmr.msra.gmra.mxu0 %vm893_vm6, %v1964_v16 }
0x10b8   : > { %4301 = vmatpush3.bf16.msra.mxu0 %v5550_v33  ;;  %4304 = vmatprep.mubr.msk.bf16.mxu0 %vm4857_vm0, %v4856_v22 }
0x10b9   : > { %4302 = vmatprep.subr.bf16.mxu0 %v4856_v22 }
0x10bc   : > { %4303 = vmatpush3.bf16.msra.mxu0 %v5559_v19 }
0x10bd   : > { %4316 = vmatprep.subr.bf16.mxu0 %v4856_v22 }
0x116b   : > { %v1920_v42 = vpop.f32.mrf.mxu1 }
0x116c   : > { %v1926_v8 = vadd.f32 %v1920_v42, %v5148_v27  ;;  %v1952_v42 = vsel %vm1951_vm15, 1, %v4855_v18 }
0x116d   : > { %v4282_v9 = vpop.f32.mrf.mxu1 }
0x116e   : > { %4658 = vtanh.f32 %v1926_v8  ;;  %v3998_v17 = vmul.f32 -1.442695, %v1926_v8 }
0x116f   : > { %v1923_v3 = vpop.f32.mrf.mxu1 }
0x1171   : > { %v4283_v30 = vpop.f32.mrf.mxu1 }
0x1172   : > { %v5639_v30 = vld [vmem:[%s5218_s27] sm:$0xff]  ;;  %s615_s27 = scalar_lea.vmem %s6382_s15, %s5212_s23 }
0x1173   : > { %vm2033_vm1 = vcmp.gt.s32.totalorder %v5639_v30, 9  ;;  %vm2115_vm4 = vcmp.gt.s32.totalorder %v5639_v30, 7  ;;  %vm2197_vm5 = vcmp.gt.s32.totalorder %v5639_v30, 8 }
0x1177   : > { %v2002_v48 = vpop.f32.mrf.mxu0 }
0x1178   : > { %v2008_v54 = vadd.f32 %v2002_v48, %v5169_v45  ;;  %v2034_v48 = vsel %vm2033_vm1, 1, %v4855_v18 }
0x1179   : > { %v4290_v1 = vpop.f32.mrf.mxu0 }
0x117a   : > { %4660 = vtanh.f32 %v2008_v54  ;;  %v4000_v27 = vmul.f32 -1.442695, %v2008_v54 }
0x117b   : > { %v4659_v5 = vpop.eup %4658  ;;  %v2005_v46 = vpop.f32.mrf.mxu0  ;;  %4662 = vpow2.f32 %v3998_v17 }
0x117c   : > { %1936 = vrot.lane.b32.xlu1 %v4659_v5, %s4858_s26  ;;  %4664 = vpow2.f32 %v4000_v27  ;;  %v5658_v46 = vsel %vm1874_vm8, %v5590_v31, %v5587_v0 }
0x117d   : > { %v4291_v50 = vpop.f32.mrf.mxu0 }
0x1187   : > { %v4661_v2 = vpop.eup %4660 }
0x1188   : > { %2018 = vrot.lane.b32.xlu0 %v4661_v2, %s4858_s26  ;;  %v4663_v14 = vpop.eup %4662 }
0x1189   : > { %v1930_v11 = vadd.f32 1.0, %v4663_v14  ;;  %v4665_v21 = vpop.eup %4664 }
0x118a   : > { %v2012_v45 = vadd.f32 1.0, %v4665_v21 }
0x118b   : > { %4666 = vrcp.f32 %v1930_v11 }
0x118c   : > { %4668 = vrcp.f32 %v2012_v45 }
0x1198   : > { %v4667_v56 = vpop.eup %4666 }
0x1199   : > { %v4669_v8 = vpop.eup %4668  ;;  %v1934_v54 = vmul.f32 %v4667_v56, %v5648_v60 }
0x119a   : > { %v2016_v50 = vmul.f32 %v4669_v8, %v5658_v46 }
0x11ee   : > { %v1937_v53 = vpop.permute.xlu1 %1936 }
0x11ef   : > { %v1939_v16 = vmul.f32 %v4667_v56, %v1937_v53 }
0x11f1   : > { %1941 = vrot.lane.b32.xlu1 %v1939_v16, %s4859_s20 }
0x11f5   : > { %1954 = vperm.xlu1 %4545, %v1952_v42  }
0x11fa   : > { %v2019_v9 = vpop.permute.xlu0 %2018 }
0x11fb   : > { %v2021_v3 = vmul.f32 %v4669_v8, %v2019_v9 }
0x11fd   : > { %2023 = vrot.lane.b32.xlu0 %v2021_v3, %s4859_s20 }
0x1201   : > { %2036 = vperm.xlu0 %4544, %v2034_v48  }
0x1263   : > { %v1942_v1 = vpop.permute.xlu1 %1941 }
0x1264   : > { %v5651_v5 = vadd.f32 %v1942_v1, %v1934_v54 }
0x1266   : > { %4670 = vtanh.f32 %v5651_v5 }
0x126f   : > { %v2024_v2 = vpop.permute.xlu0 %2023 }
0x1270   : > { %v5661_v17 = vadd.f32 %v2024_v2, %v2016_v50  ;;  %v5666_v27 = vpop.permute.xlu1 %1954 }
0x1271   : > { %vm1956_vm15 = vcmp.eq.s32.totalorder %v5666_v27, 1 }
0x1272   : > { %4672 = vtanh.f32 %v5661_v17 }
0x1273   : > { %v4671_v34 = vpop.eup %4670 }
0x1274   : > { %1947 = vrot.lane.b32.xlu1 %v4671_v34, %s4858_s26 }
0x127c   : > { %v5677_v21 = vpop.permute.xlu0 %2036 }
0x127d   : > { %vm2038_vm1 = vcmp.eq.s32.totalorder %v5677_v21, 1 }
0x127e   : > { %v5726_v30 = vsel %vm2038_vm1, %v5661_v17, %v5658_v46 }
0x127f   : > { %v4673_v28 = vpop.eup %4672 }
0x1280   : > { %2029 = vrot.lane.b32.xlu0 %v4673_v28, %s4858_s26 }
0x12e6   : > { %v1948_v14 = vpop.permute.xlu1 %1947 }
0x12e7   : > { %v1950_v11 = vmul.f32 %v4667_v56, %v1948_v14 }
0x12e9   : > { %v5672_v0 = vsel %vm1956_vm15, %v1950_v11, %v5601_v52 }
0x12ea   : > { %v2043_v31 = vpack.c.bf16 %v5672_v0, %v5672_v0 }
0x12ec   : > { %2045 = vrot.lane.b32.xlu1 %v2043_v31, %s4859_s20 }
0x12f2   : > { %v2030_v45 = vpop.permute.xlu0 %2029 }
0x12f3   : > { %v2032_v53 = vmul.f32 %v4669_v8, %v2030_v45 }
0x12f5   : > { %v5683_v56 = vsel %vm2038_vm1, %v2032_v53, %v5612_v49 }
0x12f6   : > { %v2125_v52 = vpack.c.bf16 %v5683_v56, %v5683_v56 }
0x12f8   : > { %2127 = vrot.lane.b32.xlu0 %v2125_v52, %s4859_s20 }
0x135e   : > { %v2046_v16 = vpop.permute.xlu1 %2045 }
0x135f   : > { %4297 = vmatmul.mubr.msk.bf16.vlgmr.msra.gmra.mxu1 %vm893_vm6, %v2046_v16 }
0x1360   : > { %4309 = vmatpush3.bf16.msra.mxu1 %v5533_v59  ;;  %4312 = vmatprep.mubr.msk.bf16.mxu1 %vm4857_vm0, %v4856_v22 }
0x1361   : > { %4310 = vmatprep.subr.bf16.mxu1 %v4856_v22 }
0x1364   : > { %4311 = vmatpush3.bf16.msra.mxu1 %v5542_v57 }
0x1365   : > { %4324 = vmatprep.subr.bf16.mxu1 %v4856_v22 }
0x136a   : > { %v2128_v49 = vpop.permute.xlu0 %2127 }
0x136b   : > { %4305 = vmatmul.mubr.msk.bf16.vlgmr.msra.gmra.mxu0 %vm893_vm6, %v2128_v49 }
0x136c   : > { %4317 = vmatpush3.bf16.msra.mxu0 %v5550_v33  ;;  %4320 = vmatprep.mubr.msk.bf16.mxu0 %vm4857_vm0, %v4856_v22 }
0x136d   : > { %4318 = vmatprep.subr.bf16.mxu0 %v4856_v22 }
0x1370   : > { %4319 = vmatpush3.bf16.msra.mxu0 %v5559_v19 }
0x1371   : > { %4332 = vmatprep.subr.bf16.mxu0 %v4856_v22 }
0x141f   : > { %v2084_v42 = vpop.f32.mrf.mxu1 }
0x1420   : > { %v2090_v8 = vadd.f32 %v2084_v42, %v5154_v35  ;;  %v2116_v42 = vsel %vm2115_vm4, 1, %v4855_v18 }
0x1421   : > { %v4298_v9 = vpop.f32.mrf.mxu1 }
0x1422   : > { %4674 = vtanh.f32 %v2090_v8  ;;  %v4002_v11 = vmul.f32 -1.442695, %v2090_v8 }
0x1423   : > { %v2087_v3 = vpop.f32.mrf.mxu1 }
0x1425   : > { %v4299_v48 = vpop.f32.mrf.mxu1 }
0x1426   : > { %v2198_v48 = vsel %vm2197_vm5, 1, %v4855_v18 }
0x142b   : > { %v2166_v54 = vpop.f32.mrf.mxu0 }
0x142c   : > { %v2172_v1 = vadd.f32 %v2166_v54, %v5163_v41  ;;  %v5716_v54 = vsel %vm1956_vm15, %v5651_v5, %v5648_v60 }
0x142d   : > { %v4306_v50 = vpop.f32.mrf.mxu0 }
0x142e   : > { %4676 = vtanh.f32 %v2172_v1  ;;  %v4004_v35 = vmul.f32 -1.442695, %v2172_v1 }
0x142f   : > { %v4675_v2 = vpop.eup %4674  ;;  %v2169_v34 = vpop.f32.mrf.mxu0  ;;  %4678 = vpow2.f32 %v4002_v11 }
0x1430   : > { %2100 = vrot.lane.b32.xlu1 %v4675_v2, %s4858_s26  ;;  %4680 = vpow2.f32 %v4004_v35 }
0x1431   : > { %v4307_v28 = vpop.f32.mrf.mxu0 }
0x143b   : > { %v4677_v14 = vpop.eup %4676 }
0x143c   : > { %2182 = vrot.lane.b32.xlu0 %v4677_v14, %s4858_s26  ;;  %v4679_v31 = vpop.eup %4678 }
0x143d   : > { %v2094_v45 = vadd.f32 1.0, %v4679_v31  ;;  %v4681_v53 = vpop.eup %4680 }
0x143e   : > { %v2176_v52 = vadd.f32 1.0, %v4681_v53 }
0x143f   : > { %4682 = vrcp.f32 %v2094_v45 }
0x1440   : > { %4684 = vrcp.f32 %v2176_v52 }
0x144c   : > { %v4683_v41 = vpop.eup %4682 }
0x144d   : > { %v4685_v8 = vpop.eup %4684  ;;  %v2098_v1 = vmul.f32 %v4683_v41, %v5716_v54 }
0x144e   : > { %v2180_v18 = vmul.f32 %v4685_v8, %v5726_v30 }
0x14a2   : > { %v2101_v16 = vpop.permute.xlu1 %2100 }
0x14a3   : > { %v2103_v49 = vmul.f32 %v4683_v41, %v2101_v16 }
0x14a5   : > { %2105 = vrot.lane.b32.xlu1 %v2103_v49, %s4859_s20 }
0x14a9   : > { %2118 = vperm.xlu1 %4545, %v2116_v42  }
0x14ae   : > { %v2183_v9 = vpop.permute.xlu0 %2182 }
0x14af   : > { %v2185_v3 = vmul.f32 %v4685_v8, %v2183_v9 }
0x14b1   : > { %2187 = vrot.lane.b32.xlu0 %v2185_v3, %s4859_s20 }
0x14b5   : > { %2200 = vperm.xlu0 %4544, %v2198_v48  }
0x1517   : > { %v2106_v50 = vpop.permute.xlu1 %2105 }
0x1518   : > { %v5719_v2 = vadd.f32 %v2106_v50, %v2098_v1 }
0x151a   : > { %4686 = vtanh.f32 %v5719_v2 }
0x1523   : > { %v2188_v34 = vpop.permute.xlu0 %2187 }
0x1524   : > { %v5729_v28 = vadd.f32 %v2188_v34, %v2180_v18  ;;  %v5734_v14 = vpop.permute.xlu1 %2118 }
0x1525   : > { %vm2120_vm4 = vcmp.eq.s32.totalorder %v5734_v14, 1 }
0x1526   : > { %4688 = vtanh.f32 %v5729_v28 }
0x1527   : > { %v4687_v60 = vpop.eup %4686 }
0x1528   : > { %2111 = vrot.lane.b32.xlu1 %v4687_v60, %s4858_s26 }
0x1530   : > { %v5745_v31 = vpop.permute.xlu0 %2200 }
0x1531   : > { %vm2202_vm5 = vcmp.eq.s32.totalorder %v5745_v31, 1 }
0x1533   : > { %v4689_v5 = vpop.eup %4688 }
0x1534   : > { %2193 = vrot.lane.b32.xlu0 %v4689_v5, %s4858_s26 }
0x159a   : > { %v2112_v11 = vpop.permute.xlu1 %2111 }
0x159b   : > { %v2114_v35 = vmul.f32 %v4683_v41, %v2112_v11 }
0x159d   : > { %v5740_v46 = vsel %vm2120_vm4, %v2114_v35, %v5672_v0 }
0x159e   : > { %v2207_v17 = vpack.c.bf16 %v5740_v46, %v5740_v46 }
0x15a0   : > { %2209 = vrot.lane.b32.xlu1 %v2207_v17, %s4859_s20 }
0x15a6   : > { %v2194_v45 = vpop.permute.xlu0 %2193 }
0x15a7   : > { %v2196_v53 = vmul.f32 %v4685_v8, %v2194_v45 }
0x15a9   : > { %v5751_v52 = vsel %vm2202_vm5, %v2196_v53, %v5683_v56 }
0x15aa   : > { %v2283_v0 = vpack.c.bf16 %v5751_v52, %v5751_v52 }
0x15ac   : > { %2285 = vrot.lane.b32.xlu0 %v2283_v0, %s4859_s20 }
0x1612   : > { %v2210_v41 = vpop.permute.xlu1 %2209 }
0x1613   : > { %4313 = vmatmul.mubr.msk.bf16.vlgmr.msra.gmra.mxu1 %vm893_vm6, %v2210_v41 }
0x1614   : > { %4325 = vmatpush3.bf16.msra.mxu1 %v5533_v59  ;;  %4328 = vmatprep.mubr.msk.bf16.mxu1 %vm4857_vm0, %v4856_v22 }
0x1615   : > { %4326 = vmatprep.subr.bf16.mxu1 %v4856_v22 }
0x1618   : > { %4327 = vmatpush3.bf16.msra.mxu1 %v5542_v57 }
0x1619   : > { %4340 = vmatprep.subr.bf16.mxu1 %v4856_v22 }
0x161e   : > { %v2286_v56 = vpop.permute.xlu0 %2285 }
0x161f   : > { %4321 = vmatmul.mubr.msk.bf16.vlgmr.msra.gmra.mxu0 %vm893_vm6, %v2286_v56 }
0x1620   : > { %4333 = vmatpush3.bf16.msra.mxu0 %v5550_v33  ;;  %4336 = vmatprep.mubr.msk.bf16.mxu0 %vm4857_vm0, %v4856_v22 }
0x1621   : > { %4334 = vmatprep.subr.bf16.mxu0 %v4856_v22 }
0x1624   : > { %4335 = vmatpush3.bf16.msra.mxu0 %v5559_v19 }
0x1625   : > { %4348 = vmatprep.subr.bf16.mxu0 %v4856_v22 }
0x16d3   : > { %v2248_v16 = vpop.f32.mrf.mxu1 }
0x16d4   : > { %v2254_v49 = vadd.f32 %v2248_v16, %v5160_v39 }
0x16d5   : > { %v4314_v42 = vpop.f32.mrf.mxu1 }
0x16d6   : > { %4690 = vtanh.f32 %v2254_v49  ;;  %v4006_v5 = vmul.f32 -1.442695, %v2254_v49  ;;  %v5780_v49 = vsel %vm2120_vm4, %v5719_v2, %v5716_v54 }
0x16d7   : > { %v2251_v8 = vpop.f32.mrf.mxu1 }
0x16d9   : > { %v4315_v9 = vpop.f32.mrf.mxu1 }
0x16df   : > { %v2324_v3 = vpop.f32.mrf.mxu0 }
0x16e0   : > { %v2330_v48 = vadd.f32 %v2324_v3, %v5157_v37  ;;  %v5790_v3 = vsel %vm2202_vm5, %v5729_v28, %v5726_v30 }
0x16e1   : > { %v4322_v1 = vpop.f32.mrf.mxu0 }
0x16e2   : > { %4692 = vtanh.f32 %v2330_v48  ;;  %v4008_v39 = vmul.f32 -1.442695, %v2330_v48 }
0x16e3   : > { %v4691_v50 = vpop.eup %4690  ;;  %v2327_v18 = vpop.f32.mrf.mxu0  ;;  %4694 = vpow2.f32 %v4006_v5 }
0x16e4   : > { %2264 = vrot.lane.b32.xlu1 %v4691_v50, %s4858_s26  ;;  %4696 = vpow2.f32 %v4008_v39 }
0x16e5   : > { %v4323_v34 = vpop.f32.mrf.mxu0 }
0x16ef   : > { %v4693_v60 = vpop.eup %4692 }
0x16f0   : > { %2340 = vrot.lane.b32.xlu0 %v4693_v60, %s4858_s26  ;;  %v4695_v11 = vpop.eup %4694 }
0x16f1   : > { %v2258_v35 = vadd.f32 1.0, %v4695_v11  ;;  %v4697_v17 = vpop.eup %4696 }
0x16f2   : > { %v2334_v45 = vadd.f32 1.0, %v4697_v17 }
0x16f3   : > { %4698 = vrcp.f32 %v2258_v35 }
0x16f4   : > { %4700 = vrcp.f32 %v2334_v45 }
0x1700   : > { %v4699_v37 = vpop.eup %4698 }
0x1701   : > { %v4701_v41 = vpop.eup %4700  ;;  %v2262_v42 = vmul.f32 %v4699_v37, %v5780_v49 }
0x1702   : > { %v2338_v48 = vmul.f32 %v4701_v41, %v5790_v3 }
0x1756   : > { %v2265_v53 = vpop.permute.xlu1 %2264 }
0x1757   : > { %v2267_v0 = vmul.f32 %v4699_v37, %v2265_v53 }
0x1759   : > { %2269 = vrot.lane.b32.xlu1 %v2267_v0, %s4859_s20 }
0x1762   : > { %v2341_v56 = vpop.permute.xlu0 %2340 }
0x1763   : > { %v2343_v16 = vmul.f32 %v4701_v41, %v2341_v56 }
0x1765   : > { %2345 = vrot.lane.b32.xlu0 %v2343_v16, %s4859_s20 }
0x17cb   : > { %v2270_v8 = vpop.permute.xlu1 %2269 }
0x17cc   : > { %v5783_v9 = vadd.f32 %v2270_v8, %v2262_v42 }
0x17ce   : > { %4702 = vtanh.f32 %v5783_v9 }
0x17d7   : > { %v2346_v1 = vpop.permute.xlu0 %2345 }
0x17d8   : > { %v5793_v50 = vadd.f32 %v2346_v1, %v2338_v48 }
0x17da   : > { %4704 = vtanh.f32 %v5793_v50 }
0x17db   : > { %v4703_v54 = vpop.eup %4702 }
0x17dc   : > { %2275 = vrot.lane.b32.xlu1 %v4703_v54, %s4858_s26 }
0x17e7   : > { %v4705_v2 = vpop.eup %4704 }
0x17e8   : > { %2351 = vrot.lane.b32.xlu0 %v4705_v2, %s4858_s26 }
0x184e   : > { %v2276_v18 = vpop.permute.xlu1 %2275 }
0x184f   : > { %v2278_v34 = vmul.f32 %v4699_v37, %v2276_v18 }
0x1851   : > { %v5801_v30 = vsel %vm2202_vm5, %v2278_v34, %v5740_v46 }
0x1852   : > { %v2359_v28 = vpack.c.bf16 %v5801_v30, %v5801_v30 }
0x1854   : > { %2361 = vrot.lane.b32.xlu1 %v2359_v28, %s4859_s20 }
0x185a   : > { %v2352_v60 = vpop.permute.xlu0 %2351 }
0x185b   : > { %v2354_v5 = vmul.f32 %v4701_v41, %v2352_v60 }
0x185d   : > { %v5809_v39 = vsel %vm2120_vm4, %v2354_v5, %v5751_v52 }
0x185e   : > { %v2435_v11 = vpack.c.bf16 %v5809_v39, %v5809_v39 }
0x1860   : > { %2437 = vrot.lane.b32.xlu0 %v2435_v11, %s4859_s20 }
0x18c6   : > { %v2362_v35 = vpop.permute.xlu1 %2361 }
0x18c7   : > { %4329 = vmatmul.mubr.msk.bf16.vlgmr.msra.gmra.mxu1 %vm893_vm6, %v2362_v35 }
0x18c8   : > { %4341 = vmatpush3.bf16.msra.mxu1 %v5533_v59  ;;  %4344 = vmatprep.mubr.msk.bf16.mxu1 %vm4857_vm0, %v4856_v22 }
0x18c9   : > { %4342 = vmatprep.subr.bf16.mxu1 %v4856_v22 }
0x18cc   : > { %4343 = vmatpush3.bf16.msra.mxu1 %v5542_v57 }
0x18cd   : > { %4356 = vmatprep.subr.bf16.mxu1 %v4856_v22 }
0x18d2   : > { %v2438_v46 = vpop.permute.xlu0 %2437 }
0x18d3   : > { %4337 = vmatmul.mubr.msk.bf16.vlgmr.msra.gmra.mxu0 %vm893_vm6, %v2438_v46  ;;  %v5838_v46 = vsel %vm2202_vm5, %v5783_v9, %v5780_v49 }
0x18d4   : > { %4349 = vmatpush3.bf16.msra.mxu0 %v5550_v33  ;;  %4352 = vmatprep.mubr.msk.bf16.mxu0 %vm4857_vm0, %v4856_v22 }
0x18d5   : > { %4350 = vmatprep.subr.bf16.mxu0 %v4856_v22 }
0x18d8   : > { %4351 = vmatpush3.bf16.msra.mxu0 %v5559_v19 }
0x18d9   : > { %4364 = vmatprep.subr.bf16.mxu0 %v4856_v22 }
0x1987   : > { %v2400_v52 = vpop.f32.mrf.mxu1 }
0x1988   : > { %v2406_v17 = vadd.f32 %v2400_v52, %v5166_v43 }
0x1989   : > { %v4330_v45 = vpop.f32.mrf.mxu1 }
0x198a   : > { %4706 = vtanh.f32 %v2406_v17  ;;  %v4010_v1 = vmul.f32 -1.442695, %v2406_v17 }
0x198b   : > { %v2403_v37 = vpop.f32.mrf.mxu1 }
0x198c   : > { %v5848_v37 = vsel %vm2120_vm4, %v5793_v50, %v5790_v3 }
0x198d   : > { %v4331_v53 = vpop.f32.mrf.mxu1 }
0x1993   : > { %v2476_v0 = vpop.f32.mrf.mxu0 }
0x1994   : > { %v2482_v41 = vadd.f32 %v2476_v0, %v5151_v32 }
0x1995   : > { %v4338_v56 = vpop.f32.mrf.mxu0 }
0x1996   : > { %4708 = vtanh.f32 %v2482_v41  ;;  %v4012_v43 = vmul.f32 -1.442695, %v2482_v41 }
0x1997   : > { %v4707_v16 = vpop.eup %4706  ;;  %v2479_v42 = vpop.f32.mrf.mxu0  ;;  %4710 = vpow2.f32 %v4010_v1 }
0x1998   : > { %2416 = vrot.lane.b32.xlu1 %v4707_v16, %s4858_s26  ;;  %4712 = vpow2.f32 %v4012_v43 }
0x1999   : > { %v4339_v8 = vpop.f32.mrf.mxu0 }
0x19a3   : > { %v4709_v48 = vpop.eup %4708 }
0x19a4   : > { %2492 = vrot.lane.b32.xlu0 %v4709_v48, %s4858_s26  ;;  %v4711_v54 = vpop.eup %4710 }
0x19a5   : > { %v2410_v2 = vadd.f32 1.0, %v4711_v54  ;;  %v4713_v18 = vpop.eup %4712 }
0x19a6   : > { %v2486_v34 = vadd.f32 1.0, %v4713_v18 }
0x19a7   : > { %4714 = vrcp.f32 %v2410_v2 }
0x19a8   : > { %4716 = vrcp.f32 %v2486_v34 }
0x19b4   : > { %v4715_v32 = vpop.eup %4714 }
0x19b5   : > { %v4717_v5 = vpop.eup %4716  ;;  %v2414_v52 = vmul.f32 %v4715_v32, %v5838_v46 }
0x19b6   : > { %v2490_v53 = vmul.f32 %v4717_v5, %v5848_v37 }
0x1a0a   : > { %v2417_v28 = vpop.permute.xlu1 %2416 }
0x1a0b   : > { %v2419_v60 = vmul.f32 %v4715_v32, %v2417_v28 }
0x1a0d   : > { %2421 = vrot.lane.b32.xlu1 %v2419_v60, %s4859_s20 }
0x1a16   : > { %v2493_v11 = vpop.permute.xlu0 %2492 }
0x1a17   : > { %v2495_v35 = vmul.f32 %v4717_v5, %v2493_v11 }
0x1a19   : > { %2497 = vrot.lane.b32.xlu0 %v2495_v35, %s4859_s20 }
0x1a7f   : > { %v2422_v17 = vpop.permute.xlu1 %2421 }
0x1a80   : > { %v5841_v45 = vadd.f32 %v2422_v17, %v2414_v52 }
0x1a82   : > { %4718 = vtanh.f32 %v5841_v45 }
0x1a8b   : > { %v2498_v0 = vpop.permute.xlu0 %2497 }
0x1a8c   : > { %v5851_v41 = vadd.f32 %v2498_v0, %v2490_v53 }
0x1a8e   : > { %4720 = vtanh.f32 %v5851_v41 }
0x1a8f   : > { %v4719_v31 = vpop.eup %4718 }
0x1a90   : > { %2427 = vrot.lane.b32.xlu1 %v4719_v31, %s4858_s26 }
0x1a9b   : > { %v4721_v49 = vpop.eup %4720 }
0x1a9c   : > { %2503 = vrot.lane.b32.xlu0 %v4721_v49, %s4858_s26 }
0x1b02   : > { %v2428_v9 = vpop.permute.xlu1 %2427 }
0x1b03   : > { %v2430_v56 = vmul.f32 %v4715_v32, %v2428_v9 }
0x1b05   : > { %v5859_v14 = vsel %vm2038_vm1, %v2430_v56, %v5801_v30 }
0x1b06   : > { %v2511_v3 = vpack.c.bf16 %v5859_v14, %v5859_v14 }
0x1b08   : > { %2513 = vrot.lane.b32.xlu1 %v2511_v3, %s4859_s20 }
0x1b0e   : > { %v2504_v50 = vpop.permute.xlu0 %2503 }
0x1b0f   : > { %v2506_v16 = vmul.f32 %v4717_v5, %v2504_v50  ;;  %v5896_v50 = vsel %vm2038_vm1, %v5841_v45, %v5838_v46 }
0x1b11   : > { %v5867_v42 = vsel %vm1956_vm15, %v2506_v16, %v5809_v39 }
0x1b12   : > { %v2587_v8 = vpack.c.bf16 %v5867_v42, %v5867_v42 }
0x1b14   : > { %2589 = vrot.lane.b32.xlu0 %v2587_v8, %s4859_s20 }
0x1b7a   : > { %v2514_v48 = vpop.permute.xlu1 %2513 }
0x1b7b   : > { %4345 = vmatmul.mubr.msk.bf16.vlgmr.msra.gmra.mxu1 %vm893_vm6, %v2514_v48 }
0x1b7c   : > { %4357 = vmatpush3.bf16.msra.mxu1 %v5533_v59  ;;  %4360 = vmatprep.mubr.msk.bf16.mxu1 %vm4857_vm0, %v4856_v22 }
0x1b7d   : > { %4358 = vmatprep.subr.bf16.mxu1 %v4856_v22 }
0x1b80   : > { %4359 = vmatpush3.bf16.msra.mxu1 %v5542_v57 }
0x1b81   : > { %4372 = vmatprep.subr.bf16.mxu1 %v4856_v22 }
0x1b86   : > { %v2590_v30 = vpop.permute.xlu0 %2589 }
0x1b87   : > { %4353 = vmatmul.mubr.msk.bf16.vlgmr.msra.gmra.mxu0 %vm893_vm6, %v2590_v30  ;;  %v5906_v30 = vsel %vm1956_vm15, %v5851_v41, %v5848_v37 }
0x1b88   : > { %4365 = vmatpush3.bf16.msra.mxu0 %v5550_v33  ;;  %4368 = vmatprep.mubr.msk.bf16.mxu0 %vm4857_vm0, %v4856_v22 }
0x1b89   : > { %4366 = vmatprep.subr.bf16.mxu0 %v4856_v22 }
0x1b8c   : > { %4367 = vmatpush3.bf16.msra.mxu0 %v5559_v19 }
0x1b8d   : > { %4380 = vmatprep.subr.bf16.mxu0 %v4856_v22 }
0x1c3b   : > { %v2552_v39 = vpop.f32.mrf.mxu1 }
0x1c3c   : > { %v2558_v1 = vadd.f32 %v2552_v39, %v5172_v47 }
0x1c3d   : > { %v4346_v43 = vpop.f32.mrf.mxu1 }
0x1c3e   : > { %4722 = vtanh.f32 %v2558_v1  ;;  %v4014_v35 = vmul.f32 -1.442695, %v2558_v1 }
0x1c3f   : > { %v2555_v54 = vpop.f32.mrf.mxu1 }
0x1c41   : > { %v4347_v2 = vpop.f32.mrf.mxu1 }
0x1c47   : > { %v2628_v18 = vpop.f32.mrf.mxu0 }
0x1c48   : > { %v2634_v34 = vadd.f32 %v2628_v18, %v5145_v25 }
0x1c49   : > { %v4354_v32 = vpop.f32.mrf.mxu0 }
0x1c4a   : > { %4724 = vtanh.f32 %v2634_v34  ;;  %v4016_v47 = vmul.f32 -1.442695, %v2634_v34 }
0x1c4b   : > { %v4723_v28 = vpop.eup %4722  ;;  %v2631_v60 = vpop.f32.mrf.mxu0  ;;  %4726 = vpow2.f32 %v4014_v35 }
0x1c4c   : > { %2568 = vrot.lane.b32.xlu1 %v4723_v28, %s4858_s26  ;;  %4728 = vpow2.f32 %v4016_v47 }
0x1c4d   : > { %v4355_v5 = vpop.f32.mrf.mxu0 }
0x1c57   : > { %v4725_v11 = vpop.eup %4724 }
0x1c58   : > { %2644 = vrot.lane.b32.xlu0 %v4725_v11, %s4858_s26  ;;  %v4727_v52 = vpop.eup %4726 }
0x1c59   : > { %v2562_v17 = vadd.f32 1.0, %v4727_v52  ;;  %v4729_v53 = vpop.eup %4728 }
0x1c5a   : > { %v2638_v0 = vadd.f32 1.0, %v4729_v53 }
0x1c5b   : > { %4730 = vrcp.f32 %v2562_v17 }
0x1c5c   : > { %4732 = vrcp.f32 %v2638_v0 }
0x1c68   : > { %v4731_v25 = vpop.eup %4730 }
0x1c69   : > { %v4733_v9 = vpop.eup %4732  ;;  %v2566_v16 = vmul.f32 %v4731_v25, %v5896_v50 }
0x1c6a   : > { %v2642_v39 = vmul.f32 %v4733_v9, %v5906_v30 }
0x1cbe   : > { %v2569_v31 = vpop.permute.xlu1 %2568 }
0x1cbf   : > { %v2571_v49 = vmul.f32 %v4731_v25, %v2569_v31 }
0x1cc1   : > { %2573 = vrot.lane.b32.xlu1 %v2571_v49, %s4859_s20 }
0x1cca   : > { %v2645_v56 = vpop.permute.xlu0 %2644 }
0x1ccb   : > { %v2647_v3 = vmul.f32 %v4733_v9, %v2645_v56 }
0x1ccd   : > { %2649 = vrot.lane.b32.xlu0 %v2647_v3, %s4859_s20 }
0x1d33   : > { %v2574_v8 = vpop.permute.xlu1 %2573 }
0x1d34   : > { %v5899_v48 = vadd.f32 %v2574_v8, %v2566_v16 }
0x1d36   : > { %4734 = vtanh.f32 %v5899_v48  ;;  %v5954_v8 = vsel %vm1874_vm8, %v5899_v48, %v5896_v50 }
0x1d3f   : > { %v2650_v1 = vpop.permute.xlu0 %2649 }
0x1d40   : > { %v5909_v43 = vadd.f32 %v2650_v1, %v2642_v39 }
0x1d42   : > { %4736 = vtanh.f32 %v5909_v43 }
0x1d43   : > { %v4735_v21 = vpop.eup %4734 }
0x1d44   : > { %2579 = vrot.lane.b32.xlu1 %v4735_v21, %s4858_s26 }
0x1d4f   : > { %v4737_v46 = vpop.eup %4736 }
0x1d50   : > { %2655 = vrot.lane.b32.xlu0 %v4737_v46, %s4858_s26  ;;  %v5964_v46 = vsel %vm1792_vm7, %v5909_v43, %v5906_v30 }
0x1db6   : > { %v2580_v45 = vpop.permute.xlu1 %2579 }
0x1db7   : > { %v2582_v54 = vmul.f32 %v4731_v25, %v2580_v45 }
0x1db9   : > { %v5917_v27 = vsel %vm1874_vm8, %v2582_v54, %v5859_v14 }
0x1dba   : > { %v2663_v37 = vpack.c.bf16 %v5917_v27, %v5917_v27 }
0x1dbc   : > { %2665 = vrot.lane.b32.xlu1 %v2663_v37, %s4859_s20 }
0x1dc2   : > { %v2656_v41 = vpop.permute.xlu0 %2655 }
0x1dc3   : > { %v2658_v2 = vmul.f32 %v4733_v9, %v2656_v41 }
0x1dc5   : > { %v5925_v18 = vsel %vm1792_vm7, %v2658_v2, %v5867_v42 }
0x1dc6   : > { %v2739_v34 = vpack.c.bf16 %v5925_v18, %v5925_v18 }
0x1dc8   : > { %2741 = vrot.lane.b32.xlu0 %v2739_v34, %s4859_s20 }
0x1e2e   : > { %v2666_v32 = vpop.permute.xlu1 %2665 }
0x1e2f   : > { %4361 = vmatmul.mubr.msk.bf16.vlgmr.msra.gmra.mxu1 %vm893_vm6, %v2666_v32 }
0x1e30   : > { %4373 = vmatpush3.bf16.msra.mxu1 %v5533_v59  ;;  %4376 = vmatprep.mubr.msk.bf16.mxu1 %vm4857_vm0, %v4856_v22 }
0x1e31   : > { %4374 = vmatprep.subr.bf16.mxu1 %v4856_v22 }
0x1e34   : > { %4375 = vmatpush3.bf16.msra.mxu1 %v5542_v57 }
0x1e35   : > { %4388 = vmatprep.subr.bf16.mxu1 %v4856_v22 }
0x1e3a   : > { %v2742_v14 = vpop.permute.xlu0 %2741 }
0x1e3b   : > { %4369 = vmatmul.mubr.msk.bf16.vlgmr.msra.gmra.mxu0 %vm893_vm6, %v2742_v14 }
0x1e3c   : > { %4381 = vmatpush3.bf16.msra.mxu0 %v5550_v33  ;;  %4384 = vmatprep.mubr.msk.bf16.mxu0 %vm4857_vm0, %v4856_v22 }
0x1e3d   : > { %4382 = vmatprep.subr.bf16.mxu0 %v4856_v22 }
0x1e40   : > { %4383 = vmatpush3.bf16.msra.mxu0 %v5559_v19 }
0x1e41   : > { %4396 = vmatprep.subr.bf16.mxu0 %v4856_v22 }
0x1eef   : > { %v2704_v59 = vpop.f32.mrf.mxu1 }
0x1ef0   : > { %v2710_v42 = vadd.f32 %v2704_v59, %v5178_v51 }
0x1ef1   : > { %v4362_v57 = vpop.f32.mrf.mxu1 }
0x1ef2   : > { %4738 = vtanh.f32 %v2710_v42  ;;  %v4018_v17 = vmul.f32 -1.442695, %v2710_v42  ;;  %v6009_v42 = vld [vmem:[%s6372_s5 + $0x8] sm:$0xff]   ;;  %v6018_v57 = vld [vmem:[%s6372_s5] sm:$0xff]  }
0x1ef3   : > { %v2707_v28 = vpop.f32.mrf.mxu1 }
0x1ef5   : > { %v4363_v60 = vpop.f32.mrf.mxu1 }
0x1efb   : > { %v2780_v5 = vpop.f32.mrf.mxu0 }
0x1efc   : > { %v2786_v11 = vadd.f32 %v2780_v5, %v5139_v20 }
0x1efd   : > { %v4370_v33 = vpop.f32.mrf.mxu0 }
0x1efe   : > { %4740 = vtanh.f32 %v2786_v11  ;;  %v4020_v51 = vmul.f32 -1.442695, %v2786_v11 }
0x1eff   : > { %v4739_v35 = vpop.eup %4738  ;;  %v2783_v47 = vpop.f32.mrf.mxu0  ;;  %4742 = vpow2.f32 %v4018_v17 }
0x1f00   : > { %2720 = vrot.lane.b32.xlu1 %v4739_v35, %s4858_s26  ;;  %4744 = vpow2.f32 %v4020_v51 }
0x1f01   : > { %v4371_v52 = vpop.f32.mrf.mxu0 }
0x1f0b   : > { %v4741_v19 = vpop.eup %4740 }
0x1f0c   : > { %2796 = vrot.lane.b32.xlu0 %v4741_v19, %s4858_s26  ;;  %v4743_v53 = vpop.eup %4742 }
0x1f0d   : > { %v2714_v0 = vadd.f32 1.0, %v4743_v53  ;;  %v4745_v25 = vpop.eup %4744 }
0x1f0e   : > { %v2790_v31 = vadd.f32 1.0, %v4745_v25 }
0x1f0f   : > { %4746 = vrcp.f32 %v2714_v0 }
0x1f10   : > { %4748 = vrcp.f32 %v2790_v31 }
0x1f1c   : > { %v4747_v20 = vpop.eup %4746 }
0x1f1d   : > { %v4749_v56 = vpop.eup %4748  ;;  %v2718_v39 = vmul.f32 %v4747_v20, %v5954_v8 }
0x1f1e   : > { %v2794_v45 = vmul.f32 %v4749_v56, %v5964_v46 }
0x1f72   : > { %v2721_v49 = vpop.permute.xlu1 %2720 }
0x1f73   : > { %v2723_v9 = vmul.f32 %v4747_v20, %v2721_v49 }
0x1f75   : > { %2725 = vrot.lane.b32.xlu1 %v2723_v9, %s4859_s20 }
0x1f7e   : > { %v2797_v3 = vpop.permute.xlu0 %2796 }
0x1f7f   : > { %v2799_v16 = vmul.f32 %v4749_v56, %v2797_v3 }
0x1f81   : > { %2801 = vrot.lane.b32.xlu0 %v2799_v16, %s4859_s20 }
0x1fe7   : > { %v2726_v1 = vpop.permute.xlu1 %2725 }
0x1fe8   : > { %v5957_v21 = vadd.f32 %v2726_v1, %v2718_v39 }
0x1fea   : > { %4750 = vtanh.f32 %v5957_v21  ;;  %v6032_v1 = vsel %vm1710_vm12, %v5957_v21, %v5954_v8 }
0x1ff3   : > { %v2802_v54 = vpop.permute.xlu0 %2801 }
0x1ff4   : > { %v5967_v37 = vadd.f32 %v2802_v54, %v2794_v45 }
0x1ff6   : > { %4752 = vtanh.f32 %v5967_v37 }
0x1ff7   : > { %v4751_v58 = vpop.eup %4750 }
0x1ff8   : > { %2731 = vrot.lane.b32.xlu1 %v4751_v58, %s4858_s26 }
0x2003   : > { %v4753_v50 = vpop.eup %4752 }
0x2004   : > { %2807 = vrot.lane.b32.xlu0 %v4753_v50, %s4858_s26  ;;  %v6042_v50 = vsel %vm1628_vm11, %v5967_v37, %v5964_v46 }
0x206a   : > { %v2732_v48 = vpop.permute.xlu1 %2731 }
0x206b   : > { %v2734_v41 = vmul.f32 %v4747_v20, %v2732_v48 }
0x206d   : > { %v5975_v23 = vsel %vm1710_vm12, %v2734_v41, %v5917_v27  ;;  %v5992_v27 = vld [vmem:[%s6371_s4 + $0x8] sm:$0xff]  }
0x206e   : > { %v2815_v30 = vpack.c.bf16 %v5975_v23, %v5975_v23 }
0x2070   : > { %2817 = vrot.lane.b32.xlu1 %v2815_v30, %s4859_s20 }
0x2076   : > { %v2808_v43 = vpop.permute.xlu0 %2807 }
0x2077   : > { %v2810_v2 = vmul.f32 %v4749_v56, %v2808_v43 }
0x2079   : > { %v5983_v34 = vsel %vm1628_vm11, %v2810_v2, %v5925_v18  ;;  %v6001_v18 = vld [vmem:[%s6371_s4] sm:$0xff]  }
0x207a   : > { %v2891_v32 = vpack.c.bf16 %v5983_v34, %v5983_v34 }
0x207c   : > { %2893 = vrot.lane.b32.xlu0 %v2891_v32, %s4859_s20 }
0x20e2   : > { %v2818_v14 = vpop.permute.xlu1 %2817 }
0x20e3   : > { %4377 = vmatmul.mubr.msk.bf16.vlgmr.msra.gmra.mxu1 %vm893_vm6, %v2818_v14 }
0x20e4   : > { %4389 = vmatpush3.bf16.msra.mxu1 %v5992_v27  ;;  %4392 = vmatprep.mubr.msk.bf16.mxu1 %vm4857_vm0, %v4856_v22 }
0x20e5   : > { %4390 = vmatprep.subr.bf16.mxu1 %v4856_v22 }
0x20e8   : > { %4391 = vmatpush3.bf16.msra.mxu1 %v6001_v18 }
0x20e9   : > { %4404 = vmatprep.subr.bf16.mxu1 %v4856_v22 }
0x20ee   : > { %v2894_v59 = vpop.permute.xlu0 %2893 }
0x20ef   : > { %4385 = vmatmul.mubr.msk.bf16.vlgmr.msra.gmra.mxu0 %vm893_vm6, %v2894_v59 }
0x20f0   : > { %4397 = vmatpush3.bf16.msra.mxu0 %v6009_v42  ;;  %4400 = vmatprep.mubr.msk.bf16.mxu0 %vm4857_vm0, %v4856_v22 }
0x20f1   : > { %4398 = vmatprep.subr.bf16.mxu0 %v4856_v22 }
0x20f4   : > { %4399 = vmatpush3.bf16.msra.mxu0 %v6018_v57 }
0x20f5   : > { %4412 = vmatprep.subr.bf16.mxu0 %v4856_v22 }
0x21a3   : > { %v2856_v28 = vpop.f32.mrf.mxu1 }
0x21a4   : > { %v2862_v60 = vadd.f32 %v2856_v28, %v5184_v55 }
0x21a5   : > { %v4378_v5 = vpop.f32.mrf.mxu1 }
0x21a6   : > { %4754 = vtanh.f32 %v2862_v60  ;;  %v4022_v0 = vmul.f32 -1.442695, %v2862_v60 }
0x21a7   : > { %v2859_v11 = vpop.f32.mrf.mxu1 }
0x21a9   : > { %v4379_v33 = vpop.f32.mrf.mxu1 }
0x21af   : > { %v2932_v35 = vpop.f32.mrf.mxu0 }
0x21b0   : > { %v2938_v47 = vadd.f32 %v2932_v35, %v5133_v15 }
0x21b1   : > { %v4386_v52 = vpop.f32.mrf.mxu0 }
0x21b2   : > { %4756 = vtanh.f32 %v2938_v47  ;;  %v4024_v55 = vmul.f32 -1.442695, %v2938_v47 }
0x21b3   : > { %v4755_v19 = vpop.eup %4754  ;;  %v2935_v17 = vpop.f32.mrf.mxu0  ;;  %4758 = vpow2.f32 %v4022_v0 }
0x21b4   : > { %2872 = vrot.lane.b32.xlu1 %v4755_v19, %s4858_s26  ;;  %4760 = vpow2.f32 %v4024_v55 }
0x21b5   : > { %v4387_v51 = vpop.f32.mrf.mxu0 }
0x21bf   : > { %v4757_v53 = vpop.eup %4756 }
0x21c0   : > { %2948 = vrot.lane.b32.xlu0 %v4757_v53, %s4858_s26  ;;  %v4759_v25 = vpop.eup %4758 }
0x21c1   : > { %v2866_v31 = vadd.f32 1.0, %v4759_v25  ;;  %v4761_v20 = vpop.eup %4760 }
0x21c2   : > { %v2942_v49 = vadd.f32 1.0, %v4761_v20 }
0x21c3   : > { %4762 = vrcp.f32 %v2866_v31 }
0x21c4   : > { %4764 = vrcp.f32 %v2942_v49 }
0x21d0   : > { %v4763_v15 = vpop.eup %4762 }
0x21d1   : > { %v4765_v3 = vpop.eup %4764  ;;  %v2870_v45 = vmul.f32 %v4763_v15, %v6032_v1 }
0x21d2   : > { %v2946_v48 = vmul.f32 %v4765_v3, %v6042_v50 }
0x2226   : > { %v2873_v9 = vpop.permute.xlu1 %2872 }
0x2227   : > { %v2875_v56 = vmul.f32 %v4763_v15, %v2873_v9 }
0x2229   : > { %2877 = vrot.lane.b32.xlu1 %v2875_v56, %s4859_s20 }
0x2232   : > { %v2949_v16 = vpop.permute.xlu0 %2948 }
0x2233   : > { %v2951_v39 = vmul.f32 %v4765_v3, %v2949_v16 }
0x2235   : > { %2953 = vrot.lane.b32.xlu0 %v2951_v39, %s4859_s20 }
0x229b   : > { %v2878_v54 = vpop.permute.xlu1 %2877 }
0x229c   : > { %v6035_v58 = vadd.f32 %v2878_v54, %v2870_v45 }
0x229e   : > { %4766 = vtanh.f32 %v6035_v58 }
0x22a7   : > { %v2954_v41 = vpop.permute.xlu0 %2953 }
0x22a8   : > { %v6045_v30 = vadd.f32 %v2954_v41, %v2946_v48 }
0x22aa   : > { %4768 = vtanh.f32 %v6045_v30  ;;  %v6100_v54 = vsel %vm1464_vm2, %v6045_v30, %v6042_v50 }
0x22ab   : > { %v4767_v36 = vpop.eup %4766 }
0x22ac   : > { %2883 = vrot.lane.b32.xlu1 %v4767_v36, %s4858_s26 }
0x22b7   : > { %v4769_v8 = vpop.eup %4768 }
0x22b8   : > { %2959 = vrot.lane.b32.xlu0 %v4769_v8, %s4858_s26 }
0x231e   : > { %v2884_v21 = vpop.permute.xlu1 %2883 }
0x231f   : > { %v2886_v43 = vmul.f32 %v4763_v15, %v2884_v21 }
0x2321   : > { %v6053_v24 = vsel %vm1546_vm3, %v2886_v43, %v5975_v23 }
0x2322   : > { %v2967_v46 = vpack.c.bf16 %v6053_v24, %v6053_v24 }
0x2324   : > { %2969 = vrot.lane.b32.xlu1 %v2967_v46, %s4859_s20 }
0x232a   : > { %v2960_v37 = vpop.permute.xlu0 %2959 }
0x232b   : > { %v2962_v2 = vmul.f32 %v4765_v3, %v2960_v37  ;;  %v6090_v3 = vsel %vm1546_vm3, %v6035_v58, %v6032_v1 }
0x232d   : > { %v6061_v32 = vsel %vm1464_vm2, %v2962_v2, %v5983_v34 }
0x232e   : > { %v3043_v14 = vpack.c.bf16 %v6061_v32, %v6061_v32 }
0x2330   : > { %3045 = vrot.lane.b32.xlu0 %v3043_v14, %s4859_s20 }
0x2396   : > { %v2970_v59 = vpop.permute.xlu1 %2969 }
0x2397   : > { %4393 = vmatmul.mubr.msk.bf16.vlgmr.msra.gmra.mxu1 %vm893_vm6, %v2970_v59 }
0x2398   : > { %4405 = vmatpush3.bf16.msra.mxu1 %v5992_v27  ;;  %4408 = vmatprep.mubr.msk.bf16.mxu1 %vm4857_vm0, %v4856_v22 }
0x2399   : > { %4406 = vmatprep.subr.bf16.mxu1 %v4856_v22 }
0x239c   : > { %4407 = vmatpush3.bf16.msra.mxu1 %v6001_v18 }
0x239d   : > { %4420 = vmatprep.subr.bf16.mxu1 %v4856_v22 }
0x23a2   : > { %v3046_v23 = vpop.permute.xlu0 %3045 }
0x23a3   : > { %4401 = vmatmul.mubr.msk.bf16.vlgmr.msra.gmra.mxu0 %vm893_vm6, %v3046_v23 }
0x23a4   : > { %4413 = vmatpush3.bf16.msra.mxu0 %v6009_v42  ;;  %4416 = vmatprep.mubr.msk.bf16.mxu0 %vm4857_vm0, %v4856_v22 }
0x23a5   : > { %4414 = vmatprep.subr.bf16.mxu0 %v4856_v22 }
0x23a8   : > { %4415 = vmatpush3.bf16.msra.mxu0 %v6018_v57 }
0x23a9   : > { %4428 = vmatprep.subr.bf16.mxu0 %v4856_v22 }
0x2457   : > { %v3008_v34 = vpop.f32.mrf.mxu1 }
0x2458   : > { %v3014_v28 = vadd.f32 %v3008_v34, %v5190_v61 }
0x2459   : > { %v4394_v60 = vpop.f32.mrf.mxu1 }
0x245a   : > { %4770 = vtanh.f32 %v3014_v28  ;;  %v4026_v53 = vmul.f32 -1.442695, %v3014_v28 }
0x245b   : > { %v3011_v5 = vpop.f32.mrf.mxu1 }
0x245d   : > { %v4395_v11 = vpop.f32.mrf.mxu1 }
0x2463   : > { %v3084_v33 = vpop.f32.mrf.mxu0 }
0x2464   : > { %v3090_v35 = vadd.f32 %v3084_v33, %v5127_v10 }
0x2465   : > { %v4402_v47 = vpop.f32.mrf.mxu0 }
0x2466   : > { %4772 = vtanh.f32 %v3090_v35  ;;  %v4028_v61 = vmul.f32 -1.442695, %v3090_v35 }
0x2467   : > { %v4771_v52 = vpop.eup %4770  ;;  %v3087_v19 = vpop.f32.mrf.mxu0  ;;  %4774 = vpow2.f32 %v4026_v53 }
0x2468   : > { %3024 = vrot.lane.b32.xlu1 %v4771_v52, %s4858_s26  ;;  %4776 = vpow2.f32 %v4028_v61 }
0x2469   : > { %v4403_v17 = vpop.f32.mrf.mxu0 }
0x2473   : > { %v4773_v51 = vpop.eup %4772 }
0x2474   : > { %3100 = vrot.lane.b32.xlu0 %v4773_v51, %s4858_s26  ;;  %v4775_v0 = vpop.eup %4774 }
0x2475   : > { %v3018_v55 = vadd.f32 1.0, %v4775_v0  ;;  %v4777_v25 = vpop.eup %4776 }
0x2476   : > { %v3094_v31 = vadd.f32 1.0, %v4777_v25 }
0x2477   : > { %4778 = vrcp.f32 %v3018_v55 }
0x2478   : > { %4780 = vrcp.f32 %v3094_v31 }
0x2484   : > { %v4779_v10 = vpop.eup %4778 }
0x2485   : > { %v4781_v15 = vpop.eup %4780  ;;  %v3022_v16 = vmul.f32 %v4779_v10, %v6090_v3 }
0x2486   : > { %v3098_v48 = vmul.f32 %v4781_v15, %v6100_v54 }
0x24da   : > { %v3025_v20 = vpop.permute.xlu1 %3024 }
0x24db   : > { %v3027_v49 = vmul.f32 %v4779_v10, %v3025_v20 }
0x24dd   : > { %3029 = vrot.lane.b32.xlu1 %v3027_v49, %s4859_s20 }
0x24e6   : > { %v3101_v9 = vpop.permute.xlu0 %3100 }
0x24e7   : > { %v3103_v56 = vmul.f32 %v4781_v15, %v3101_v9 }
0x24e9   : > { %3105 = vrot.lane.b32.xlu0 %v3103_v56, %s4859_s20 }
0x254f   : > { %v3030_v39 = vpop.permute.xlu1 %3029 }
0x2550   : > { %v6093_v45 = vadd.f32 %v3030_v39, %v3022_v16 }
0x2552   : > { %4782 = vtanh.f32 %v6093_v45  ;;  %v6148_v61 = vsel %vm1382_vm14, %v6093_v45, %v6090_v3 }
0x255b   : > { %v3106_v41 = vpop.permute.xlu0 %3105 }
0x255c   : > { %v6103_v36 = vadd.f32 %v3106_v41, %v3098_v48 }
0x255e   : > { %4784 = vtanh.f32 %v6103_v36  ;;  %v6155_v31 = vsel %vm1300_vm13, %v6103_v36, %v6100_v54 }
0x255f   : > { %v4783_v44 = vpop.eup %4782 }
0x2560   : > { %3035 = vrot.lane.b32.xlu1 %v4783_v44, %s4858_s26 }
0x256b   : > { %v4785_v1 = vpop.eup %4784 }
0x256c   : > { %3111 = vrot.lane.b32.xlu0 %v4785_v1, %s4858_s26 }
0x25d2   : > { %v3036_v58 = vpop.permute.xlu1 %3035 }
0x25d3   : > { %v3038_v8 = vmul.f32 %v4779_v10, %v3036_v58 }
0x25d5   : > { %v6111_v13 = vsel %vm1382_vm14, %v3038_v8, %v6053_v24 }
0x25d6   : > { %v3119_v50 = vpack.c.bf16 %v6111_v13, %v6111_v13 }
0x25d8   : > { %3121 = vrot.lane.b32.xlu1 %v3119_v50, %s4859_s20 }
0x25de   : > { %v3112_v30 = vpop.permute.xlu0 %3111 }
0x25df   : > { %v3114_v21 = vmul.f32 %v4781_v15, %v3112_v30 }
0x25e1   : > { %v6119_v43 = vsel %vm1300_vm13, %v3114_v21, %v6061_v32 }
0x25e2   : > { %v3195_v46 = vpack.c.bf16 %v6119_v43, %v6119_v43 }
0x25e4   : > { %3197 = vrot.lane.b32.xlu0 %v3195_v46, %s4859_s20 }
0x264a   : > { %v3122_v37 = vpop.permute.xlu1 %3121 }
0x264b   : > { %4409 = vmatmul.mubr.msk.bf16.vlgmr.msra.gmra.mxu1 %vm893_vm6, %v3122_v37 }
0x264c   : > { %4421 = vmatpush3.bf16.msra.mxu1 %v5992_v27  ;;  %4424 = vmatprep.mubr.msk.bf16.mxu1 %vm4857_vm0, %v4856_v22 }
0x264d   : > { %4422 = vmatprep.subr.bf16.mxu1 %v4856_v22 }
0x2650   : > { %4423 = vmatpush3.bf16.msra.mxu1 %v6001_v18 }
0x2651   : > { %4436 = vmatprep.subr.mxu1 %v4856_v22 }
0x2656   : > { %v3198_v24 = vpop.permute.xlu0 %3197 }
0x2657   : > { %4417 = vmatmul.mubr.msk.bf16.vlgmr.msra.gmra.mxu0 %vm893_vm6, %v3198_v24 }
0x2658   : > { %4429 = vmatpush3.bf16.msra.mxu0 %v6009_v42  ;;  %4432 = vmatprep.mubr.msk.bf16.mxu0 %vm4857_vm0, %v4856_v22 }
0x2659   : > { %4430 = vmatprep.subr.bf16.mxu0 %v4856_v22 }
0x265c   : > { %4431 = vmatpush3.bf16.msra.mxu0 %v6018_v57 }
0x265d   : > { %4447 = vmatprep.subr.mxu0 %v4856_v22 }
0x270b   : > { %v3160_v27 = vpop.f32.mrf.mxu1 }
0x270c   : > { %v3166_v2 = vadd.f32 %v3160_v27, %v5196_v6 }
0x270d   : > { %v4410_v18 = vpop.f32.mrf.mxu1 }
0x270e   : > { %4786 = vtanh.f32 %v3166_v2  ;;  %v4030_v5 = vmul.f32 -1.442695, %v3166_v2 }
0x270f   : > { %v3163_v32 = vpop.f32.mrf.mxu1 }
0x2711   : > { %v4411_v14 = vpop.f32.mrf.mxu1 }
0x2717   : > { %v3236_v59 = vpop.f32.mrf.mxu0 }
0x2718   : > { %v3242_v23 = vadd.f32 %v3236_v59, %v5121_v4 }
0x2719   : > { %v4418_v42 = vpop.f32.mrf.mxu0 }
0x271a   : > { %4788 = vtanh.f32 %v3242_v23  ;;  %v4032_v6 = vmul.f32 -1.442695, %v3242_v23 }
0x271b   : > { %v4787_v34 = vpop.eup %4786  ;;  %v3239_v28 = vpop.f32.mrf.mxu0  ;;  %4790 = vpow2.f32 %v4030_v5 }
0x271c   : > { %3176 = vrot.lane.b32.xlu1 %v4787_v34, %s4858_s26  ;;  %4792 = vpow2.f32 %v4032_v6 }
0x271d   : > { %v4419_v60 = vpop.f32.mrf.mxu0 }
0x2727   : > { %v4789_v57 = vpop.eup %4788 }
0x2728   : > { %3252 = vrot.lane.b32.xlu0 %v4789_v57, %s4858_s26  ;;  %v4791_v11 = vpop.eup %4790 }
0x2729   : > { %v3170_v33 = vadd.f32 1.0, %v4791_v11  ;;  %v4793_v35 = vpop.eup %4792 }
0x272a   : > { %v3246_v47 = vadd.f32 1.0, %v4793_v35 }
0x272b   : > { %4794 = vrcp.f32 %v3170_v33 }
0x272c   : > { %4796 = vrcp.f32 %v3246_v47 }
0x2738   : > { %v4795_v4 = vpop.eup %4794 }
0x2739   : > { %v4797_v17 = vpop.eup %4796  ;;  %v3174_v0 = vmul.f32 %v4795_v4, %v6148_v61 }
0x273a   : > { %v3250_v10 = vmul.f32 %v4797_v17, %v6155_v31 }
0x278e   : > { %v3177_v52 = vpop.permute.xlu1 %3176 }
0x278f   : > { %v3179_v19 = vmul.f32 %v4795_v4, %v3177_v52  ;;  %v3418_v52 = vld [vmem:[%s6373_s6] sm:$0xff] }
0x2791   : > { %3181 = vrot.lane.b32.xlu1 %v3179_v19, %s4859_s20 }
0x279a   : > { %v3253_v51 = vpop.permute.xlu0 %3252 }
0x279b   : > { %v3255_v53 = vmul.f32 %v4797_v17, %v3253_v51  ;;  %v3424_v51 = vld [vmem:[%s6374_s7 + $0x10] sm:$0xff] }
0x279d   : > { %3257 = vrot.lane.b32.xlu0 %v3255_v53, %s4859_s20  ;;  %v3423_v53 = vld [vmem:[%s6374_s7 + $0x8] sm:$0xff] }
0x2803   : > { %v3182_v55 = vpop.permute.xlu1 %3181 }
0x2804   : > { %v3184_v25 = vadd.f32 %v3182_v55, %v3174_v0 }
0x2806   : > { %4798 = vtanh.f32 %v3184_v25  ;;  %v3192_v28 = vsel %vm1218_vm10, %v3184_v25, %v6148_v61  ;;  %v3422_v61 = vld [vmem:[%s6374_s7] sm:$0xff] }
0x280f   : > { %v3258_v20 = vpop.permute.xlu0 %3257 }
0x2810   : > { %v3260_v49 = vadd.f32 %v3258_v20, %v3250_v10 }
0x2812   : > { %4800 = vtanh.f32 %v3260_v49  ;;  %v3268_v6 = vsel %vm1136_vm9, %v3260_v49, %v6155_v31  ;;  %v3588_v49 = vld [vmem:[%s6376_s9 + $0x18] sm:$0xff] }
0x2813   : > { %v4799_v15 = vpop.eup %4798 }
0x2814   : > { %3187 = vrot.lane.b32.xlu1 %v4799_v15, %s4858_s26 }
0x281f   : > { %v4801_v38 = vpop.eup %4800 }
0x2820   : > { %3263 = vrot.lane.b32.xlu0 %v4801_v38, %s4858_s26  ;;  %v3585_v38 = vld [vmem:[%s6376_s9] sm:$0xff] }
0x2886   : > { %v3188_v9 = vpop.permute.xlu1 %3187 }
0x2887   : > { %v3190_v56 = vmul.f32 %v4795_v4, %v3188_v9  ;;  %v3420_v4 = vld [vmem:[%s6373_s6 + $0x10] sm:$0xff]  ;;  %v3592_v9 = vld [vmem:[%s6377_s10 + $0x18] sm:$0xff] }
0x2889   : > { %v6163_v3 = vsel %vm1218_vm10, %v3190_v56, %v6111_v13  ;;  %vm6386_vm10 = vcmp.eq.s32.totalorder %v5239_v29, 1  ;;  %v3586_v29 = vld [vmem:[%s6376_s9 + $0x8] sm:$0xff] }
0x288a   : > { %v3271_v7 = vpack.c.bf16 %v6163_v3, %v6163_v3 }
0x288c   : > { %3273 = vrot.lane.b32.xlu1 %v3271_v7, %s4859_s20  ;;  %v3590_v7 = vld [vmem:[%s6377_s10 + $0x8] sm:$0xff] }
0x2892   : > { %v3264_v16 = vpop.permute.xlu0 %3263 }
0x2893   : > { %v3266_v39 = vmul.f32 %v4797_v17, %v3264_v16  ;;  %v3425_v17 = vld [vmem:[%s6374_s7 + $0x18] sm:$0xff]  ;;  %v3589_v16 = vld [vmem:[%s6377_s10] sm:$0xff] }
0x2895   : > { %v6171_v45 = vsel %vm1136_vm9, %v3266_v39, %v6119_v43  ;;  %vm6385_vm9 = vcmp.eq.s32.totalorder %v5249_v40, 1  ;;  %v3587_v40 = vld [vmem:[%s6376_s9 + $0x10] sm:$0xff]  ;;  %v3757_v39 = vld [vmem:[%s6379_s12 + $0x78] sm:$0xff] }
0x2896   : > { %v3345_v54 = vpack.c.bf16 %v6171_v45, %v6171_v45 }
0x2898   : > { %3347 = vrot.lane.b32.xlu0 %v3345_v54, %s4859_s20  ;;  %v3755_v54 = vld [vmem:[%s6379_s12 + $0x68] sm:$0xff] }
0x28fe   : > { %v3274_v48 = vpop.permute.xlu1 %3273 }
0x28ff   : > { %4425 = vmatmul.mubr.msk.bf16.vlgmr.msra.gmra.mxu1 %vm893_vm6, %v3274_v48  ;;  %v3754_v48 = vld [vmem:[%s6379_s12 + $0x60] sm:$0xff] }
0x2900   : > { %4444 = vmatprep.mubr.msk.f32.mxu1 %vm4857_vm0, %v4856_v22  ;;  %4437 = vmatpush3.msra.mxu1 %v3425_v17 }
0x2901   : > { %4438 = vmatprep.subr.mxu1 %v4856_v22 }
0x2902   : > { %4439 = vmatpush3.msra.mxu1 %v3424_v51 }
0x2903   : > { %4440 = vmatprep.subr.mxu1 %v4856_v22 }
0x2904   : > { %4441 = vmatpush3.msra.mxu1 %v3423_v53 }
0x2905   : > { %4442 = vmatprep.subr.mxu1 %v4856_v22 }
0x2906   : > { %4443 = vmatpush3.msra.mxu1 %v3422_v61 }
0x2907   : > { %4458 = vmatprep.subr.mxu1 %v4856_v22 }
0x290a   : > { %v3348_v41 = vpop.permute.xlu0 %3347 }
0x290b   : > { %4433 = vmatmul.mubr.msk.bf16.vlgmr.msra.gmra.mxu0 %vm893_vm6, %v3348_v41  ;;  %v3753_v41 = vld [vmem:[%s6379_s12 + $0x58] sm:$0xff] }
0x290c   : > { %4455 = vmatprep.mubr.msk.f32.mxu0 %vm4857_vm0, %v4856_v22  ;;  %4448 = vmatpush3.msra.mxu0 %v3421_v62 }
0x290d   : > { %4449 = vmatprep.subr.mxu0 %v4856_v22 }
0x290e   : > { %4450 = vmatpush3.msra.mxu0 %v3420_v4 }
0x290f   : > { %4451 = vmatprep.subr.mxu0 %v4856_v22 }
0x2910   : > { %4452 = vmatpush3.msra.mxu0 %v3419_v26 }
0x2911   : > { %4453 = vmatprep.subr.mxu0 %v4856_v22 }
0x2912   : > { %4454 = vmatpush3.msra.mxu0 %v3418_v52 }
0x2913   : > { %4469 = vmatprep.subr.mxu0 %v4856_v22 }
0x29bf   : > { %v3312_v36 = vpop.f32.mrf.mxu1 }
0x29c0   : > { %v3318_v44 = vadd.f32 %v3312_v36, %v5202_v12  ;;  %v3752_v36 = vld [vmem:[%s6379_s12 + $0x50] sm:$0xff] }
0x29c1   : > { %v4426_v1 = vpop.f32.mrf.mxu1 }
0x29c2   : > { %4802 = vtanh.f32 %v3318_v44  ;;  %v4034_v24 = vmul.f32 -1.442695, %v3318_v44  ;;  %v3751_v44 = vld [vmem:[%s6379_s12 + $0x48] sm:$0xff]  ;;  %v3750_v1 = vld [vmem:[%s6379_s12 + $0x40] sm:$0xff] }
0x29c3   : > { %v3315_v58 = vpop.f32.mrf.mxu1 }
0x29c4   : > { %v3749_v58 = vld [vmem:[%s6379_s12 + $0x38] sm:$0xff] }
0x29c5   : > { %v4427_v8 = vpop.f32.mrf.mxu1 }
0x29c6   : > { %v3748_v8 = vld [vmem:[%s6379_s12 + $0x30] sm:$0xff] }
0x29cb   : > { %v3386_v13 = vpop.f32.mrf.mxu0 }
0x29cc   : > { %v3392_v50 = vadd.f32 %v3386_v13, %v5113_v63  ;;  %v3747_v13 = vld [vmem:[%s6379_s12 + $0x28] sm:$0xff] }
0x29cd   : > { %v4434_v30 = vpop.f32.mrf.mxu0 }
0x29ce   : > { %4804 = vtanh.f32 %v3392_v50  ;;  %v4036_v12 = vmul.f32 -1.442695, %v3392_v50  ;;  %v3746_v50 = vld [vmem:[%s6379_s12 + $0x20] sm:$0xff]  ;;  %v3745_v30 = vld [vmem:[%s6379_s12 + $0x18] sm:$0xff] }
0x29cf   : > { %v4803_v21 = vpop.eup %4802  ;;  %v3389_v43 = vpop.f32.mrf.mxu0  ;;  %4806 = vpow2.f32 %v4034_v24 }
0x29d0   : > { %3328 = vrot.lane.b32.xlu1 %v4803_v21, %s4858_s26  ;;  %4808 = vpow2.f32 %v4036_v12  ;;  %v3744_v21 = vld [vmem:[%s6379_s12 + $0x10] sm:$0xff]  ;;  %v3743_v43 = vld [vmem:[%s6379_s12 + $0x8] sm:$0xff] }
0x29d1   : > { %v4435_v46 = vpop.f32.mrf.mxu0 }
0x29d2   : > { %v3742_v46 = vld [vmem:[%s6379_s12] sm:$0xff] }
0x29db   : > { %v4805_v37 = vpop.eup %4804 }
0x29dc   : > { %3402 = vrot.lane.b32.xlu0 %v4805_v37, %s4858_s26  ;;  %v4807_v27 = vpop.eup %4806 }
0x29dd   : > { %v3322_v2 = vadd.f32 1.0, %v4807_v27  ;;  %v4809_v18 = vpop.eup %4808 }
0x29de   : > { %v3396_v32 = vadd.f32 1.0, %v4809_v18  ;;  %v4039_v18 = vld [vmem:[%s6375_s8] ss:$0 sm:$0xff] }
0x29df   : > { %4810 = vrcp.f32 %v3322_v2 }
0x29e0   : > { %4812 = vrcp.f32 %v3396_v32 }
0x29ec   : > { %v4811_v63 = vpop.eup %4810 }
0x29ed   : > { %v4813_v23 = vpop.eup %4812  ;;  %v3326_v60 = vmul.f32 %v4811_v63, %v3192_v28 }
0x29ee   : > { %v3400_v11 = vmul.f32 %v4813_v23, %v3268_v6 }
0x2a42   : > { %v3329_v14 = vpop.permute.xlu1 %3328 }
0x2a43   : > { %v3331_v59 = vmul.f32 %v4811_v63, %v3329_v14 }
0x2a45   : > { %3333 = vrot.lane.b32.xlu1 %v3331_v59, %s4859_s20  ;;  %v4042_v59 = vld [vmem:[%s6378_s11] ss:$0 sm:$0xff] }
0x2a4e   : > { %v3403_v42 = vpop.permute.xlu0 %3402 }
0x2a4f   : > { %v3405_v34 = vmul.f32 %v4813_v23, %v3403_v42 }
0x2a51   : > { %3407 = vrot.lane.b32.xlu0 %v3405_v34, %s4859_s20 }
0x2ab7   : > { %v3334_v57 = vpop.permute.xlu1 %3333 }
0x2ab8   : > { %v3336_v5 = vadd.f32 %v3334_v57, %v3326_v60  ;;  %v4043_v60 = vld [vmem:[%s6380_s13] ss:$0 sm:$0xff] }
0x2aba   : > { %4814 = vtanh.f32 %v3336_v5 }
0x2ac3   : > { %v3408_v33 = vpop.permute.xlu0 %3407 }
0x2ac4   : > { %v3410_v35 = vadd.f32 %v3408_v33, %v3400_v11 }
0x2ac6   : > { %4816 = vtanh.f32 %v3410_v35 }
0x2ac7   : > { %v4815_v47 = vpop.eup %4814 }
0x2ac8   : > { %3339 = vrot.lane.b32.xlu1 %v4815_v47, %s4858_s26 }
0x2ad3   : > { %v4817_v19 = vpop.eup %4816 }
0x2ad4   : > { %3413 = vrot.lane.b32.xlu0 %v4817_v19, %s4858_s26 }
0x2b3a   : > { %v3340_v0 = vpop.permute.xlu1 %3339 }
0x2b3b   : > { %v3342_v55 = vmul.f32 %v4811_v63, %v3340_v0 }
0x2b3d   : > { %v3343_v25 = vsel %vm6385_vm9, %v3342_v55, %v6163_v3  ;;  %v3591_v3 = vld [vmem:[%s6377_s10 + $0x10] sm:$0xff] }
0x2b3e   : > { %3502 = vrot.lane.b32.xlu0 %v3343_v25, %s4859_s20 }
0x2b46   : > { %v3414_v31 = vpop.permute.xlu0 %3413 }
0x2b47   : > { %v3416_v10 = vmul.f32 %v4813_v23, %v3414_v31 }
0x2b49   : > { %v3417_v20 = vsel %vm6386_vm10, %v3416_v10, %v6171_v45  ;;  %v3756_v45 = vld [vmem:[%s6379_s12 + $0x70] sm:$0xff] }
0x2b4a   : > { %3427 = vrot.lane.b32.xlu1 %v3417_v20, %s4859_s20 }
0x2bb0   : > { %v3503_v15 = vpop.permute.xlu0 %3502 }
0x2bb1   : > { %4456 = vmatmul.mubr.msk.f32.vlgmr.msra.gmra.mxu0 %vm893_vm6, %v3503_v15 }
0x2bb2   : > { %4470 = vmatpush3.msra.mxu0 %v3588_v49  ;;  %4477 = vmatprep.mubr.msk.f32.mxu0 %vm4857_vm0, %v4856_v22 }
0x2bb3   : > { %4471 = vmatprep.subr.mxu0 %v4856_v22 }
0x2bb4   : > { %4472 = vmatpush3.msra.mxu0 %v3587_v40 }
0x2bb5   : > { %4473 = vmatprep.subr.mxu0 %v4856_v22 }
0x2bb6   : > { %4474 = vmatpush3.msra.mxu0 %v3586_v29 }
0x2bb7   : > { %4475 = vmatprep.subr.mxu0 %v4856_v22 }
0x2bb8   : > { %4476 = vmatpush3.msra.mxu0 %v3585_v38 }
0x2bb9   : > { %4478 = vmatmul.mubr.msk.f32.vlgmr.msra.gmra.mxu0 %vm893_vm6, %v3503_v15 }
0x2bbc   : > { %v3428_v56 = vpop.permute.xlu1 %3427 }
0x2bbd   : > { %4445 = vmatmul.mubr.msk.f32.vlgmr.msra.gmra.mxu1 %vm893_vm6, %v3428_v56 }
0x2bbe   : > { %4459 = vmatpush3.msra.mxu1 %v3592_v9  ;;  %4466 = vmatprep.mubr.msk.f32.mxu1 %vm4857_vm0, %v4856_v22 }
0x2bbf   : > { %4460 = vmatprep.subr.mxu1 %v4856_v22 }
0x2bc0   : > { %4461 = vmatpush3.msra.mxu1 %v3591_v3 }
0x2bc1   : > { %4462 = vmatprep.subr.mxu1 %v4856_v22 }
0x2bc2   : > { %4463 = vmatpush3.msra.mxu1 %v3590_v7 }
0x2bc3   : > { %4464 = vmatprep.subr.mxu1 %v4856_v22 }
0x2bc4   : > { %4465 = vmatpush3.msra.mxu1 %v3589_v16 }
0x2bc5   : > { %4467 = vmatmul.mubr.msk.f32.vlgmr.msra.gmra.mxu1 %vm893_vm6, %v3428_v56  ;;  %4480 = vmatprep.subr.mxu1 %v4856_v22 }
0x2bc6   : > { %4481 = vmatpush3.msra.mxu1 %v3757_v39  ;;  %4512 = vmatprep.mubr.msk.f32.mxu1 %vm4857_vm0, %v4856_v22 }
0x2bc7   : > { %4482 = vmatprep.subr.mxu1 %v4856_v22 }
0x2bc8   : > { %4483 = vmatpush3.msra.mxu1 %v3756_v45 }
0x2bc9   : > { %4484 = vmatprep.subr.mxu1 %v4856_v22 }
0x2bca   : > { %4485 = vmatpush3.msra.mxu1 %v3755_v54 }
0x2bcb   : > { %4486 = vmatprep.subr.mxu1 %v4856_v22 }
0x2bcc   : > { %4487 = vmatpush3.msra.mxu1 %v3754_v48 }
0x2bcd   : > { %4488 = vmatprep.subr.mxu1 %v4856_v22 }
0x2bce   : > { %4489 = vmatpush3.msra.mxu1 %v3753_v41 }
0x2bcf   : > { %4490 = vmatprep.subr.mxu1 %v4856_v22 }
0x2bd0   : > { %4491 = vmatpush3.msra.mxu1 %v3752_v36 }
0x2bd1   : > { %4492 = vmatprep.subr.mxu1 %v4856_v22 }
0x2bd2   : > { %4493 = vmatpush3.msra.mxu1 %v3751_v44 }
0x2bd3   : > { %4494 = vmatprep.subr.mxu1 %v4856_v22 }
0x2bd4   : > { %4495 = vmatpush3.msra.mxu1 %v3750_v1 }
0x2bd5   : > { %4496 = vmatprep.subr.mxu1 %v4856_v22 }
0x2bd6   : > { %4497 = vmatpush3.msra.mxu1 %v3749_v58 }
0x2bd7   : > { %4498 = vmatprep.subr.mxu1 %v4856_v22 }
0x2bd8   : > { %4499 = vmatpush3.msra.mxu1 %v3748_v8 }
0x2bd9   : > { %4500 = vmatprep.subr.mxu1 %v4856_v22 }
0x2bda   : > { %4501 = vmatpush3.msra.mxu1 %v3747_v13 }
0x2bdb   : > { %4502 = vmatprep.subr.mxu1 %v4856_v22 }
0x2bdc   : > { %4503 = vmatpush3.msra.mxu1 %v3746_v50 }
0x2bdd   : > { %4504 = vmatprep.subr.mxu1 %v4856_v22 }
0x2bde   : > { %4505 = vmatpush3.msra.mxu1 %v3745_v30 }
0x2bdf   : > { %4506 = vmatprep.subr.mxu1 %v4856_v22 }
0x2be0   : > { %4507 = vmatpush3.msra.mxu1 %v3744_v21 }
0x2be1   : > { %4508 = vmatprep.subr.mxu1 %v4856_v22 }
0x2be2   : > { %4509 = vmatpush3.msra.mxu1 %v3743_v43 }
0x2be3   : > { %4510 = vmatprep.subr.mxu1 %v4856_v22 }
0x2be4   : > { %4511 = vmatpush3.msra.mxu1 %v3742_v46 }
0x2c71   : > { %v3572_v37 = vpop.f32.mrf.mxu0 }
0x2c73   : > { %v4457_v24 = vpop.f32.mrf.mxu0 }
0x2c79   : > { %v3729_v12 = vpop.f32.mrf.mxu0 }
0x2c7b   : > { %v4479_v27 = vpop.f32.mrf.mxu0 }
0x2c7d   : > { %v3497_v2 = vpop.f32.mrf.mxu1 }
0x2c7e   : > { %v3573_v32 = vadd.f32 %v3572_v37, %v3497_v2 }
0x2c7f   : > { %v4446_v22 = vpop.f32.mrf.mxu1 }
0x2c80   : > { %v3583_v63 = vadd.f32 %v4039_v18, %v3573_v32 }
0x2c82   : > { %3584 = vst [vmem:[%s611_s29] sm:$0xff] %v3583_v63 }
0x2c85   : > { %v3659_v14 = vpop.f32.mrf.mxu1 }
0x2c86   : > { %v3730_v23 = vadd.f32 %v3729_v12, %v3659_v14 }
0x2c87   : > { %v4468_v42 = vpop.f32.mrf.mxu1 }
0x2c88   : > { %v3740_v34 = vadd.f32 %v4042_v59, %v3730_v23 }
0x2c8a   : > { %v3741_v28 = vmax.f32 %v3740_v34, 0.0 }
0x2c8c   : > { %4513 = vmatmul.mubr.f32.vlgmr.msra.gmra.mxu1 %v3741_v28 }
0x2d4c   : > { %v3831_v57 = vpop.f32.mrf.mxu1 }
0x2d4d   : > { %v3832_v5 = vadd.f32 %v4043_v60, %v3831_v57 }
0x2d4e   : > { %v4514_v6 = vpop.f32.mrf.mxu1 }
0x2d4f   : > { %v4044_v11 = vmul.f32 -1.442695, %v3832_v5 }
0x2d51   : > { %4818 = vpow2.f32 %v4044_v11 }
0x2d5e   : > { %v4819_v33 = vpop.eup %4818 }
0x2d5f   : > { %v3838_v35 = vadd.f32 1.0, %v4819_v33 }
0x2d61   : > { %4820 = vrcp.f32 %v3838_v35 }
0x2d6e   : > { %v4821_v47 = vpop.eup %4820 }
0x2d6f   : > { %3841 = vst [vmem:[%s615_s27] sm:$0xff] %v4821_v47 }
0x2d70 PF: > { %p23_p9 = scmp.ge.s32.totalorder %s4957_s22, 4   ;;  %s6387_s18 = smov %s4849_s19 }
0x2d71   : > { %s6388_s19 = smov %s4966_s25  ;;  %s6389_s20 = smov %s4957_s22 }
0x2d72   :  { %25 = sbr.rel (!%p23_p9) target bundleno = 2 (0x2), region = 194 }

</bundles_post_ra>
